<compile_context>
chip_gen: v7x
topology: tpu7x:2x2x1
jax: 0.10.0
libtpu: 0.0.40
codegen_flags: <defaults>
</compile_context>

<pallas_src>
import functools

import jax
import jax.numpy as jnp
from jax import lax
from jax.experimental import pallas as pl
from jax.experimental.pallas import tpu as pltpu

# --- small, module-consistent sizes -----------------------------------------
B, CIN, H, W = 2, 32, 16, 16            # input x : (B, CIN, H, W)  (NCHW, like torch)
COUT = CIN                              # out_channels == in_channels (module default)
CINTER = CIN // 4                       # inter_channels
CQK = CINTER // 4                       # query/key channels inside CC_module
LN_EPS = 1e-5
LRELU_SLOPE = 0.3
PAD_BASE = 128                          # lane-aligned placement of data in the padded scratch


# =============================================================================
# In-kernel building blocks
# =============================================================================
def _conv3x3_ln_lrelu(feat, padf_ref, stack_ref, colmask_ref, w9_ref,
                      ln_w, ln_b, h, w):
    """3x3 conv (padding=1, no bias) + LayerNorm([C,H,W]) + LeakyReLU(0.3).

    feat     : (Cin, HW) f32 value
    padf_ref : VMEM scratch (Cmax, PAD_BASE + HW + W + 1); halo columns are zero
               (zeroed once per sample by the caller) so vertical taps read zeros.
    stack_ref: VMEM scratch (9*Cmax, HW) staging the 9 shifted windows.
    colmask_ref: (2, HW) masks zeroing wrapped horizontal taps (w==0 / w==W-1).
    w9_ref   : (Cout, 9*Cin) conv taps, column block t = 3*kh + kw.
    ln_w/b   : (Cout, HW)
    returns  : (Cout, HW) f32
    """
    cin = feat.shape[0]
    hw = h * w
    cout = w9_ref.shape[0]

    # only the data region is (re)written; the halo stays zero across both convs
    padf_ref[0:cin, PAD_BASE:PAD_BASE + hw] = feat

    m_left = colmask_ref[0:1, :]                 # zero where column == 0     (kw == 0)
    m_right = colmask_ref[1:2, :]                # zero where column == W - 1 (kw == 2)

    # stage the 9 shifted windows -> one wide-K matmul
    for kh in range(3):
        for kw in range(3):
            s = PAD_BASE + (kh - 1) * w + (kw - 1)
            xs = padf_ref[0:cin, s:s + hw]       # (Cin, HW) shifted window
            if kw == 0:
                xs = xs * m_left
            elif kw == 2:
                xs = xs * m_right
            t = 3 * kh + kw
            stack_ref[t * cin:(t + 1) * cin, :] = xs

    acc = jnp.dot(w9_ref[...], stack_ref[0:9 * cin, :],
                  preferred_element_type=jnp.float32)          # (Cout, HW)

    # single-pass LayerNorm over the whole (C, H, W) sample (biased variance)
    inv_n = 1.0 / float(cout * hw)
    mu = jnp.sum(acc) * inv_n
    var = jnp.sum(acc * acc) * inv_n - mu * mu
    y = (acc - mu) * lax.rsqrt(var + LN_EPS)
    y = y * ln_w + ln_b
    return jnp.where(y >= 0, y, LRELU_SLOPE * y)


def _cc_attention(feat, wqkv, bqkv, ccmask, gamma, c_v, c_qk_pad):
    """CC_module forward on one sample, full-energy lane-dense formulation.

    feat   : (C, HW) f32
    wqkv   : (C + 2*c_qk_pad, C) fused v/q/k 1x1 projection (q/k rows zero-padded to 8)
    bqkv   : (C + 2*c_qk_pad, 1)
    ccmask : (HW, HW) additive mask: 0 on same-row / same-column-excluding-self, -1e30 else
    returns: (C, HW) f32
    """
    qkv = jnp.dot(wqkv, feat, preferred_element_type=jnp.float32) + bqkv   # (nq, HW)
    v = qkv[0:c_v, :]                                   # (C, HW)
    q = qkv[c_v:c_v + c_qk_pad, :]                      # (8, HW)  rows >= CQK are zero
    k = qkv[c_v + c_qk_pad:c_v + 2 * c_qk_pad, :]       # (8, HW)  rows >= CQK are zero

    # full energy: E[i, j] = sum_c q[c, i] * k[c, j]   (zero-padded rows contribute 0)
    e = jnp.dot(jnp.transpose(q), k, preferred_element_type=jnp.float32)   # (HW, HW)
    e = e + ccmask

    # one lane-dense row softmax over all HW positions (masked -> exp underflows to 0)
    m = jnp.max(e, axis=-1, keepdims=True)
    p = jnp.exp(e - m)
    l = jnp.sum(p, axis=-1, keepdims=True)
    p = p * pl.reciprocal(l, approx=True)

    # out[c, i] = sum_j v[c, j] * p[i, j]   (criss-cross aggregation, V @ P^T)
    out = lax.dot_general(v, p, dimension_numbers=(((1,), (1,)), ((), ())),
                          preferred_element_type=jnp.float32)              # (C, HW)
    return gamma * out + feat


def _rcca_kernel(x_ref, colmask_ref, wa_ref, ln1w_ref, ln1b_ref,
                 wqkv_ref, bqkv_ref, ccmask_ref, gamma_ref,
                 wb_ref, ln2w_ref, ln2b_ref,
                 o_ref, padf_ref, stack_ref, *, h, w, c_v, c_qk_pad, recurrence):
    x = x_ref[0]                                                           # (CIN, HW)

    # zero the padded conv scratch ONCE per sample (halo stays zero for both convs)
    padf_ref[...] = jnp.zeros(padf_ref.shape, padf_ref.dtype)

    # conva: 3x3 conv + LN + LeakyReLU
    feat = _conv3x3_ln_lrelu(x, padf_ref, stack_ref, colmask_ref, wa_ref,
                             ln1w_ref[...], ln1b_ref[...], h, w)

    # recurrent criss-cross attention; loop-invariant operands loaded once
    gamma = gamma_ref[0]
    wqkv = wqkv_ref[...]
    bqkv = bqkv_ref[...]
    ccmask = ccmask_ref[...]
    for _ in range(recurrence):
        feat = _cc_attention(feat, wqkv, bqkv, ccmask, gamma, c_v, c_qk_pad)

    # convb: 3x3 conv + LN + LeakyReLU, then the final  output * x + x
    out = _conv3x3_ln_lrelu(feat, padf_ref, stack_ref, colmask_ref, wb_ref,
                            ln2w_ref[...], ln2b_ref[...], h, w)
    o_ref[0] = (out * x + x).astype(o_ref.dtype)


# =============================================================================
# Wrapper: one fused pallas_call, gridded (parallel) over batch
# =============================================================================
def rcca_forward(x_nchw, p, recurrence=2):
    n, cin, h, w = x_nchw.shape
    hw = h * w
    cinter = p['conva_w'].shape[0]
    cout = p['convb_w'].shape[0]
    cqk = p['wq'].shape[0]
    assert cout == cin, "final residual (out*x + x) needs out_channels == in_channels"
    assert cinter % 8 == 0, "aligned sublane slices need inter_channels % 8 == 0"
    assert PAD_BASE >= w + 1

    x_flat = x_nchw.reshape(n, cin, hw)                       # lane-dense (C, HW)

    # 3x3 conv taps packed for one wide-K matmul: w9[o, t*Cin + c] = W[o, c, kh, kw]
    wa9 = jnp.transpose(p['conva_w'], (0, 2, 3, 1)).reshape(cinter, 9 * cin)
    wb9 = jnp.transpose(p['convb_w'], (0, 2, 3, 1)).reshape(cout, 9 * cinter)
    ln1w = p['ln1_w'].reshape(cinter, hw)
    ln1b = p['ln1_b'].reshape(cinter, hw)
    ln2w = p['ln2_w'].reshape(cout, hw)
    ln2b = p['ln2_b'].reshape(cout, hw)

    # fused v/q/k 1x1 projection; q/k rows zero-padded to a sublane tile (8) so the
    # in-kernel row slices are tile-aligned (padded rows contribute exactly 0 energy)
    cqk_pad = ((cqk + 7) // 8) * 8

    def _padrows(a, rows):
        if a.shape[0] >= rows:
            return a
        return jnp.concatenate(
            [a, jnp.zeros((rows - a.shape[0],) + a.shape[1:], a.dtype)], axis=0)

    wqkv = jnp.concatenate([p['wv'], _padrows(p['wq'], cqk_pad),
                            _padrows(p['wk'], cqk_pad)], axis=0)            # (C+2*8, C)
    bqkv = jnp.concatenate([p['bv'], _padrows(p['bq'], cqk_pad),
                            _padrows(p['bk'], cqk_pad)], axis=0).reshape(-1, 1)

    # criss-cross additive mask: allow same row (incl. self) and same column (excl. self)
    ii = jnp.arange(hw, dtype=jnp.int32)
    h_i = ii // w
    w_i = ii % w
    same_row = h_i[:, None] == h_i[None, :]
    same_col = w_i[:, None] == w_i[None, :]
    allowed = same_row | (same_col & (ii[:, None] != ii[None, :]))
    ccmask = jnp.where(allowed, 0.0, -1e30).astype(jnp.float32)             # (HW, HW)

    # column-edge masks for the horizontal conv taps (kw == 0 / kw == 2)
    colmask = jnp.stack([(w_i != 0), (w_i != w - 1)], axis=0).astype(jnp.float32)

    cmax = max(cin, cinter)
    padlen = PAD_BASE + hw + w + 1

    kern = functools.partial(_rcca_kernel, h=h, w=w, c_v=cinter,
                             c_qk_pad=cqk_pad, recurrence=recurrence)

    def _const(a):
        z = (0,) * a.ndim
        return pl.BlockSpec(a.shape, lambda nn, _z=z: _z)

    out = pl.pallas_call(
        kern,
        out_shape=jax.ShapeDtypeStruct((n, cout, hw), x_nchw.dtype),
        grid_spec=pltpu.PrefetchScalarGridSpec(
            num_scalar_prefetch=0,
            grid=(n,),
            in_specs=[
                pl.BlockSpec((1, cin, hw), lambda nn: (nn, 0, 0)),
                _const(colmask), _const(wa9), _const(ln1w), _const(ln1b),
                _const(wqkv), _const(bqkv), _const(ccmask),
                pl.BlockSpec(memory_space=pltpu.MemorySpace.SMEM),   # gamma scalar
                _const(wb9), _const(ln2w), _const(ln2b),
            ],
            out_specs=pl.BlockSpec((1, cout, hw), lambda nn: (nn, 0, 0)),
            scratch_shapes=[pltpu.VMEM((cmax, padlen), jnp.float32),
                            pltpu.VMEM((9 * cmax, hw), jnp.float32)],
        ),
        compiler_params=pltpu.CompilerParams(
            dimension_semantics=("parallel",)),     # v7x: shard batch over 2 TCs
    )(x_flat, colmask, wa9, ln1w, ln1b, wqkv, bqkv, ccmask,
      p['gamma'], wb9, ln2w, ln2b)

    return out.reshape(n, cout, h, w)


# =============================================================================
# Pure-JAX reference (same math, plain XLA) for correctness checking
# =============================================================================
def reference_forward(x, p, recurrence=2):
    def conv_ln_lrelu(inp, wconv, ln_w, ln_b):
        y = lax.conv_general_dilated(inp, wconv, (1, 1), ((1, 1), (1, 1)),
                                     dimension_numbers=('NCHW', 'OIHW', 'NCHW'))
        mu = jnp.mean(y, axis=(1, 2, 3), keepdims=True)
        var = jnp.mean(jnp.square(y - mu), axis=(1, 2, 3), keepdims=True)
        y = (y - mu) * lax.rsqrt(var + LN_EPS)
        y = y * ln_w[None] + ln_b[None]
        return jnp.where(y >= 0, y, LRELU_SLOPE * y)

    def cc(feat):
        q = jnp.einsum('oc,bchw->bohw', p['wq'], feat) + p['bq'][None, :, None, None]
        k = jnp.einsum('oc,bchw->bohw', p['wk'], feat) + p['bk'][None, :, None, None]
        v = jnp.einsum('oc,bchw->bohw', p['wv'], feat) + p['bv'][None, :, None, None]
        hh = feat.shape[2]
        e_h = jnp.einsum('bchw,bcgw->bhwg', q, k)
        e_w = jnp.einsum('bchw,bchv->bhwv', q, k)
        diag = jnp.where(jnp.eye(hh, dtype=bool), -1e30, 0.0).astype(jnp.float32)
        e_h = e_h + diag[None, :, None, :]
        att = jax.nn.softmax(jnp.concatenate([e_h, e_w], axis=-1), axis=-1)
        att_h, att_w = att[..., :hh], att[..., hh:]
        out_h = jnp.einsum('bhwg,bcgw->bchw', att_h, v)
        out_w = jnp.einsum('bhwv,bchv->bchw', att_w, v)
        return p['gamma'][0] * (out_h + out_w) + feat

    out = conv_ln_lrelu(x, p['conva_w'], p['ln1_w'], p['ln1_b'])
    for _ in range(recurrence):
        out = cc(out)
    out = conv_ln_lrelu(out, p['convb_w'], p['ln2_w'], p['ln2_b'])
    return out * x + x


# =============================================================================
# Parameter init (shapes from the PyTorch __init__; gamma = zeros like torch)
# =============================================================================
def init_params(key):
    ks = jax.random.split(key, 12)
    f32 = jnp.float32
    p = {}
    p['conva_w'] = 0.05 * jax.random.normal(ks[0], (CINTER, CIN, 3, 3), f32)
    p['ln1_w'] = jnp.ones((CINTER, H, W), f32) + 0.01 * jax.random.normal(ks[1], (CINTER, H, W), f32)
    p['ln1_b'] = 0.01 * jax.random.normal(ks[2], (CINTER, H, W), f32)
    p['wq'] = 0.1 * jax.random.normal(ks[3], (CQK, CINTER), f32)
    p['bq'] = 0.01 * jax.random.normal(ks[4], (CQK,), f32)
    p['wk'] = 0.1 * jax.random.normal(ks[5], (CQK, CINTER), f32)
    p['bk'] = 0.01 * jax.random.normal(ks[6], (CQK,), f32)
    p['wv'] = 0.1 * jax.random.normal(ks[7], (CINTER, CINTER), f32)
    p['bv'] = 0.01 * jax.random.normal(ks[8], (CINTER,), f32)
    p['gamma'] = jnp.zeros((1,), f32)            # torch: nn.Parameter(torch.zeros(1))
    p['convb_w'] = 0.05 * jax.random.normal(ks[9], (COUT, CINTER, 3, 3), f32)
    p['ln2_w'] = jnp.ones((COUT, H, W), f32) + 0.01 * jax.random.normal(ks[10], (COUT, H, W), f32)
    p['ln2_b'] = 0.01 * jax.random.normal(ks[11], (COUT, H, W), f32)
    return p


if __name__ == "__main__":
    key = jax.random.PRNGKey(0)
    pkey, xkey = jax.random.split(key)
    params = init_params(pkey)
    x = jax.random.normal(xkey, (B, CIN, H, W), jnp.float32)    # NCHW, like torch

    fwd = jax.jit(lambda xx, pp: rcca_forward(xx, pp, recurrence=2))
    ref = jax.jit(lambda xx, pp: reference_forward(xx, pp, recurrence=2))

    # 1) torch-default init (gamma == 0)
    out0 = jax.block_until_ready(fwd(x, params))
    # 2) non-zero gamma so the attention path is numerically exercised
    params_g = dict(params, gamma=jnp.full((1,), 0.5, jnp.float32))
    out1 = jax.block_until_ready(fwd(x, params_g))

    assert out0.shape == (B, COUT, H, W), out0.shape
    assert bool(jnp.all(jnp.isfinite(out0))) and bool(jnp.all(jnp.isfinite(out1)))

    for o, pp in ((out0, params), (out1, params_g)):
        r = ref(x, pp)
        err = float(jnp.max(jnp.abs(o - r)))
        tol = 5e-3 * (1.0 + float(jnp.max(jnp.abs(r))))
        assert err <= tol, (err, tol)

    print("KERNEL_OK")
</pallas_src>

<mosaic_0001>
module attributes {stable_mosaic.version = 11 : i64} {
  func.func @_rcca_kernel(%arg0: i32, %arg1: memref<1x32x256xf32, #tpu.memory_space<vmem>>, %arg2: memref<2x256xf32, #tpu.memory_space<vmem>>, %arg3: memref<8x288xf32, #tpu.memory_space<vmem>>, %arg4: memref<8x256xf32, #tpu.memory_space<vmem>>, %arg5: memref<8x256xf32, #tpu.memory_space<vmem>>, %arg6: memref<24x8xf32, #tpu.memory_space<vmem>>, %arg7: memref<24x1xf32, #tpu.memory_space<vmem>>, %arg8: memref<256x256xf32, #tpu.memory_space<vmem>>, %arg9: memref<1xf32, #tpu.memory_space<smem>>, %arg10: memref<32x72xf32, #tpu.memory_space<vmem>>, %arg11: memref<32x256xf32, #tpu.memory_space<vmem>>, %arg12: memref<32x256xf32, #tpu.memory_space<vmem>>, %arg13: memref<1x32x256xf32, #tpu.memory_space<vmem>>, %arg14: memref<32x401xf32, #tpu.memory_space<vmem>>, %arg15: memref<288x256xf32, #tpu.memory_space<vmem>>) attributes {dimension_semantics = [#tpu.dimension_semantics<parallel>], iteration_bounds = array<i64: 2>, scalar_prefetch = 0 : i64, scratch_operands = 2 : i64, tpu.core_type = #tpu.core_type<tc>, window_params = [{transform_indices = @transform_0, window_bounds = array<i64: 1, 32, 256>}, {pipeline_mode = #tpu.pipeline_mode<synchronous>, transform_indices = @transform_1, window_bounds = array<i64: 2, 256>}, {pipeline_mode = #tpu.pipeline_mode<synchronous>, transform_indices = @transform_2, window_bounds = array<i64: 8, 288>}, {pipeline_mode = #tpu.pipeline_mode<synchronous>, transform_indices = @transform_3, window_bounds = array<i64: 8, 256>}, {pipeline_mode = #tpu.pipeline_mode<synchronous>, transform_indices = @transform_4, window_bounds = array<i64: 8, 256>}, {pipeline_mode = #tpu.pipeline_mode<synchronous>, transform_indices = @transform_5, window_bounds = array<i64: 24, 8>}, {pipeline_mode = #tpu.pipeline_mode<synchronous>, transform_indices = @transform_6, window_bounds = array<i64: 24, 1>}, {pipeline_mode = #tpu.pipeline_mode<synchronous>, transform_indices = @transform_7, window_bounds = array<i64: 256, 256>}, {transform_indices = @transform_8, window_bounds = array<i64: 1>}, {pipeline_mode = #tpu.pipeline_mode<synchronous>, transform_indices = @transform_9, window_bounds = array<i64: 32, 72>}, {pipeline_mode = #tpu.pipeline_mode<synchronous>, transform_indices = @transform_10, window_bounds = array<i64: 32, 256>}, {pipeline_mode = #tpu.pipeline_mode<synchronous>, transform_indices = @transform_11, window_bounds = array<i64: 32, 256>}, {transform_indices = @transform_12, window_bounds = array<i64: 1, 32, 256>}]} {
    %c0 = arith.constant 0 : index
    %c0_0 = arith.constant 0 : index
    %c0_1 = arith.constant 0 : index
    %0 = vector.load %arg1[%c0, %c0_0, %c0_1] : memref<1x32x256xf32, #tpu.memory_space<vmem>>, vector<1x32x256xf32>
    %1 = vector.shape_cast %0 : vector<1x32x256xf32> to vector<32x256xf32>
    %cst = arith.constant 0.000000e+00 : f32
    %2 = vector.broadcast %cst : f32 to vector<32x401xf32>
    %c0_2 = arith.constant 0 : index
    %c0_3 = arith.constant 0 : index
    %3 = vector.load %arg14[%c0_2, %c0_3] : memref<32x401xf32, #tpu.memory_space<vmem>>, vector<32x401xf32>
    tpu.vector_store %arg14[%c0_2, %c0_3], %2 {strides = array<i32>} : memref<32x401xf32, #tpu.memory_space<vmem>>, vector<32x401xf32>,
    %c0_4 = arith.constant 0 : index
    %c0_5 = arith.constant 0 : index
    %4 = vector.load %arg4[%c0_4, %c0_5] : memref<8x256xf32, #tpu.memory_space<vmem>>, vector<8x256xf32>
    %c0_6 = arith.constant 0 : index
    %c0_7 = arith.constant 0 : index
    %5 = vector.load %arg5[%c0_6, %c0_7] : memref<8x256xf32, #tpu.memory_space<vmem>>, vector<8x256xf32>
    %c0_8 = arith.constant 0 : index
    %c128 = arith.constant 128 : index
    %6 = vector.load %arg14[%c0_8, %c128] : memref<32x401xf32, #tpu.memory_space<vmem>>, vector<32x256xf32>
    tpu.vector_store %arg14[%c0_8, %c128], %1 {strides = array<i32>} : memref<32x401xf32, #tpu.memory_space<vmem>>, vector<32x256xf32>,
    %c0_9 = arith.constant 0 : index
    %c0_10 = arith.constant 0 : index
    %7 = vector.load %arg2[%c0_9, %c0_10] : memref<2x256xf32, #tpu.memory_space<vmem>>, vector<1x256xf32>
    %c1 = arith.constant 1 : index
    %c0_11 = arith.constant 0 : index
    %8 = vector.load %arg2[%c1, %c0_11] : memref<2x256xf32, #tpu.memory_space<vmem>>, vector<1x256xf32>
    %c0_12 = arith.constant 0 : index
    %c111 = arith.constant 111 : index
    %9 = vector.load %arg14[%c0_12, %c111] : memref<32x401xf32, #tpu.memory_space<vmem>>, vector<32x256xf32>
    %10 = vector.broadcast %7 : vector<1x256xf32> to vector<32x256xf32>
    %11 = arith.mulf %9, %10 : vector<32x256xf32>
    %c0_13 = arith.constant 0 : index
    %c0_14 = arith.constant 0 : index
    %12 = vector.load %arg15[%c0_13, %c0_14] : memref<288x256xf32, #tpu.memory_space<vmem>>, vector<32x256xf32>
    tpu.vector_store %arg15[%c0_13, %c0_14], %11 {strides = array<i32>} : memref<288x256xf32, #tpu.memory_space<vmem>>, vector<32x256xf32>,
    %c0_15 = arith.constant 0 : index
    %c112 = arith.constant 112 : index
    %13 = vector.load %arg14[%c0_15, %c112] : memref<32x401xf32, #tpu.memory_space<vmem>>, vector<32x256xf32>
    %c32 = arith.constant 32 : index
    %c0_16 = arith.constant 0 : index
    %14 = vector.load %arg15[%c32, %c0_16] : memref<288x256xf32, #tpu.memory_space<vmem>>, vector<32x256xf32>
    tpu.vector_store %arg15[%c32, %c0_16], %13 {strides = array<i32>} : memref<288x256xf32, #tpu.memory_space<vmem>>, vector<32x256xf32>,
    %c0_17 = arith.constant 0 : index
    %c113 = arith.constant 113 : index
    %15 = vector.load %arg14[%c0_17, %c113] : memref<32x401xf32, #tpu.memory_space<vmem>>, vector<32x256xf32>
    %16 = vector.broadcast %8 : vector<1x256xf32> to vector<32x256xf32>
    %17 = arith.mulf %15, %16 : vector<32x256xf32>
    %c64 = arith.constant 64 : index
    %c0_18 = arith.constant 0 : index
    %18 = vector.load %arg15[%c64, %c0_18] : memref<288x256xf32, #tpu.memory_space<vmem>>, vector<32x256xf32>
    tpu.vector_store %arg15[%c64, %c0_18], %17 {strides = array<i32>} : memref<288x256xf32, #tpu.memory_space<vmem>>, vector<32x256xf32>,
    %c0_19 = arith.constant 0 : index
    %c127 = arith.constant 127 : index
    %19 = vector.load %arg14[%c0_19, %c127] : memref<32x401xf32, #tpu.memory_space<vmem>>, vector<32x256xf32>
    %20 = vector.broadcast %7 : vector<1x256xf32> to vector<32x256xf32>
    %21 = arith.mulf %19, %20 : vector<32x256xf32>
    %c96 = arith.constant 96 : index
    %c0_20 = arith.constant 0 : index
    %22 = vector.load %arg15[%c96, %c0_20] : memref<288x256xf32, #tpu.memory_space<vmem>>, vector<32x256xf32>
    tpu.vector_store %arg15[%c96, %c0_20], %21 {strides = array<i32>} : memref<288x256xf32, #tpu.memory_space<vmem>>, vector<32x256xf32>,
    %c0_21 = arith.constant 0 : index
    %c128_22 = arith.constant 128 : index
    %23 = vector.load %arg14[%c0_21, %c128_22] : memref<32x401xf32, #tpu.memory_space<vmem>>, vector<32x256xf32>
    %c128_23 = arith.constant 128 : index
    %c0_24 = arith.constant 0 : index
    %24 = vector.load %arg15[%c128_23, %c0_24] : memref<288x256xf32, #tpu.memory_space<vmem>>, vector<32x256xf32>
    tpu.vector_store %arg15[%c128_23, %c0_24], %23 {strides = array<i32>} : memref<288x256xf32, #tpu.memory_space<vmem>>, vector<32x256xf32>,
    %c0_25 = arith.constant 0 : index
    %c129 = arith.constant 129 : index
    %25 = vector.load %arg14[%c0_25, %c129] : memref<32x401xf32, #tpu.memory_space<vmem>>, vector<32x256xf32>
    %26 = vector.broadcast %8 : vector<1x256xf32> to vector<32x256xf32>
    %27 = arith.mulf %25, %26 : vector<32x256xf32>
    %c160 = arith.constant 160 : index
    %c0_26 = arith.constant 0 : index
    %28 = vector.load %arg15[%c160, %c0_26] : memref<288x256xf32, #tpu.memory_space<vmem>>, vector<32x256xf32>
    tpu.vector_store %arg15[%c160, %c0_26], %27 {strides = array<i32>} : memref<288x256xf32, #tpu.memory_space<vmem>>, vector<32x256xf32>,
    %c0_27 = arith.constant 0 : index
    %c143 = arith.constant 143 : index
    %29 = vector.load %arg14[%c0_27, %c143] : memref<32x401xf32, #tpu.memory_space<vmem>>, vector<32x256xf32>
    %30 = vector.broadcast %7 : vector<1x256xf32> to vector<32x256xf32>
    %31 = arith.mulf %29, %30 : vector<32x256xf32>
    %c192 = arith.constant 192 : index
    %c0_28 = arith.constant 0 : index
    %32 = vector.load %arg15[%c192, %c0_28] : memref<288x256xf32, #tpu.memory_space<vmem>>, vector<32x256xf32>
    tpu.vector_store %arg15[%c192, %c0_28], %31 {strides = array<i32>} : memref<288x256xf32, #tpu.memory_space<vmem>>, vector<32x256xf32>,
    %c0_29 = arith.constant 0 : index
    %c144 = arith.constant 144 : index
    %33 = vector.load %arg14[%c0_29, %c144] : memref<32x401xf32, #tpu.memory_space<vmem>>, vector<32x256xf32>
    %c224 = arith.constant 224 : index
    %c0_30 = arith.constant 0 : index
    %34 = vector.load %arg15[%c224, %c0_30] : memref<288x256xf32, #tpu.memory_space<vmem>>, vector<32x256xf32>
    tpu.vector_store %arg15[%c224, %c0_30], %33 {strides = array<i32>} : memref<288x256xf32, #tpu.memory_space<vmem>>, vector<32x256xf32>,
    %c0_31 = arith.constant 0 : index
    %c145 = arith.constant 145 : index
    %35 = vector.load %arg14[%c0_31, %c145] : memref<32x401xf32, #tpu.memory_space<vmem>>, vector<32x256xf32>
    %36 = vector.broadcast %8 : vector<1x256xf32> to vector<32x256xf32>
    %37 = arith.mulf %35, %36 : vector<32x256xf32>
    %c256 = arith.constant 256 : index
    %c0_32 = arith.constant 0 : index
    %38 = vector.load %arg15[%c256, %c0_32] : memref<288x256xf32, #tpu.memory_space<vmem>>, vector<32x256xf32>
    tpu.vector_store %arg15[%c256, %c0_32], %37 {strides = array<i32>} : memref<288x256xf32, #tpu.memory_space<vmem>>, vector<32x256xf32>,
    %c0_33 = arith.constant 0 : index
    %c0_34 = arith.constant 0 : index
    %39 = vector.load %arg3[%c0_33, %c0_34] : memref<8x288xf32, #tpu.memory_space<vmem>>, vector<8x288xf32>
    %c0_35 = arith.constant 0 : index
    %c0_36 = arith.constant 0 : index
    %40 = vector.load %arg15[%c0_35, %c0_36] : memref<288x256xf32, #tpu.memory_space<vmem>>, vector<288x256xf32>
    %cst_37 = arith.constant dense<0.000000e+00> : vector<8x256xf32>
    %41 = tpu.matmul %39, %40, %cst_37 {dimension_numbers = #tpu.dot_dimension_numbers<[1], [0], [0], [1], [0, 0, 1, 1], [], []>} : vector<8x288xf32>, vector<288x256xf32>, vector<8x256xf32> -> vector<8x256xf32>
    %42 = vector.shape_cast %41 : vector<8x256xf32> to vector<1x8x256xf32>
    %cst_38 = arith.constant dense<0.000000e+00> : vector<1xf32>
    %43 = vector.multi_reduction <add>, %42, %cst_38 [1, 2] : vector<1x8x256xf32> to vector<1xf32>
    %44 = vector.shape_cast %43 : vector<1xf32> to vector<1x1x1xf32>
    %45 = vector.extract %44[0, 0, 0] : f32 from vector<1x1x1xf32>
    %cst_39 = arith.constant 4.8828125E-4 : f32
    %46 = arith.mulf %45, %cst_39 : f32
    %47 = arith.mulf %41, %41 : vector<8x256xf32>
    %48 = vector.shape_cast %47 : vector<8x256xf32> to vector<1x8x256xf32>
    %cst_40 = arith.constant dense<0.000000e+00> : vector<1xf32>
    %49 = vector.multi_reduction <add>, %48, %cst_40 [1, 2] : vector<1x8x256xf32> to vector<1xf32>
    %50 = vector.shape_cast %49 : vector<1xf32> to vector<1x1x1xf32>
    %51 = vector.extract %50[0, 0, 0] : f32 from vector<1x1x1xf32>
    %cst_41 = arith.constant 4.8828125E-4 : f32
    %52 = arith.mulf %51, %cst_41 : f32
    %53 = arith.mulf %46, %46 : f32
    %54 = arith.subf %52, %53 : f32
    %55 = vector.broadcast %46 : f32 to vector<8x256xf32>
    %56 = arith.subf %41, %55 : vector<8x256xf32>
    %cst_42 = arith.constant 9.99999974E-6 : f32
    %57 = arith.addf %54, %cst_42 : f32
    %58 = math.rsqrt %57 : f32
    %59 = vector.broadcast %58 : f32 to vector<8x256xf32>
    %60 = arith.mulf %56, %59 : vector<8x256xf32>
    %61 = arith.mulf %60, %4 : vector<8x256xf32>
    %62 = arith.addf %61, %5 : vector<8x256xf32>
    %cst_43 = arith.constant 0.000000e+00 : f32
    %63 = vector.broadcast %cst_43 : f32 to vector<8x256xf32>
    %64 = arith.cmpf oge, %62, %63 : vector<8x256xf32>
    %cst_44 = arith.constant 3.000000e-01 : f32
    %65 = vector.broadcast %cst_44 : f32 to vector<8x256xf32>
    %66 = arith.mulf %65, %62 : vector<8x256xf32>
    %67 = arith.select %64, %62, %66 : vector<8x256xi1>, vector<8x256xf32>
    %c0_45 = arith.constant 0 : index
    %68 = memref.load %arg9[%c0_45] : memref<1xf32, #tpu.memory_space<smem>>
    %c0_46 = arith.constant 0 : index
    %c0_47 = arith.constant 0 : index
    %69 = vector.load %arg6[%c0_46, %c0_47] : memref<24x8xf32, #tpu.memory_space<vmem>>, vector<24x8xf32>
    %c0_48 = arith.constant 0 : index
    %c0_49 = arith.constant 0 : index
    %70 = vector.load %arg7[%c0_48, %c0_49] : memref<24x1xf32, #tpu.memory_space<vmem>>, vector<24x1xf32>
    %c0_50 = arith.constant 0 : index
    %c0_51 = arith.constant 0 : index
    %71 = vector.load %arg8[%c0_50, %c0_51] : memref<256x256xf32, #tpu.memory_space<vmem>>, vector<256x256xf32>
    %cst_52 = arith.constant dense<0.000000e+00> : vector<24x256xf32>
    %72 = tpu.matmul %69, %67, %cst_52 {dimension_numbers = #tpu.dot_dimension_numbers<[1], [0], [0], [1], [0, 0, 1, 1], [], []>} : vector<24x8xf32>, vector<8x256xf32>, vector<24x256xf32> -> vector<24x256xf32>
    %73 = vector.broadcast %70 : vector<24x1xf32> to vector<24x256xf32>
    %74 = arith.addf %72, %73 : vector<24x256xf32>
    %75 = vector.extract_strided_slice %74 {offsets = [0, 0], sizes = [8, 256], strides = [1, 1]} : vector<24x256xf32> to vector<8x256xf32>
    %76 = vector.extract_strided_slice %74 {offsets = [8, 0], sizes = [8, 256], strides = [1, 1]} : vector<24x256xf32> to vector<8x256xf32>
    %77 = vector.extract_strided_slice %74 {offsets = [16, 0], sizes = [8, 256], strides = [1, 1]} : vector<24x256xf32> to vector<8x256xf32>
    %78 = tpu.transpose %76, [1, 0] : vector<8x256xf32> -> vector<256x8xf32>
    %cst_53 = arith.constant dense<0.000000e+00> : vector<256x256xf32>
    %79 = tpu.matmul %78, %77, %cst_53 {dimension_numbers = #tpu.dot_dimension_numbers<[1], [0], [0], [1], [0, 0, 1, 1], [], []>} : vector<256x8xf32>, vector<8x256xf32>, vector<256x256xf32> -> vector<256x256xf32>
    %80 = arith.addf %79, %71 : vector<256x256xf32>
    %cst_54 = arith.constant dense<0xFF800000> : vector<256xf32>
    %81 = vector.multi_reduction <maximumf>, %80, %cst_54 [1] : vector<256x256xf32> to vector<256xf32>
    %82 = vector.shape_cast %81 : vector<256xf32> to vector<256x1xf32>
    %83 = vector.broadcast %82 : vector<256x1xf32> to vector<256x256xf32>
    %84 = arith.subf %80, %83 : vector<256x256xf32>
    %85 = math.exp %84 : vector<256x256xf32>
    %cst_55 = arith.constant dense<0.000000e+00> : vector<256xf32>
    %86 = vector.multi_reduction <add>, %85, %cst_55 [1] : vector<256x256xf32> to vector<256xf32>
    %87 = vector.shape_cast %86 : vector<256xf32> to vector<256x1xf32>
    %88 = tpu.reciprocal %87 {approx = true} : vector<256x1xf32> -> vector<256x1xf32>
    %89 = vector.broadcast %88 : vector<256x1xf32> to vector<256x256xf32>
    %90 = arith.mulf %85, %89 : vector<256x256xf32>
    %cst_56 = arith.constant dense<0.000000e+00> : vector<8x256xf32>
    %91 = tpu.matmul %75, %90, %cst_56 {dimension_numbers = #tpu.dot_dimension_numbers<[1], [1], [0], [0], [0, 0, 1, 0], [], []>} : vector<8x256xf32>, vector<256x256xf32>, vector<8x256xf32> -> vector<8x256xf32>
    %92 = vector.broadcast %68 : f32 to vector<8x256xf32>
    %93 = arith.mulf %92, %91 : vector<8x256xf32>
    %94 = arith.addf %93, %67 : vector<8x256xf32>
    %cst_57 = arith.constant dense<0.000000e+00> : vector<24x256xf32>
    %95 = tpu.matmul %69, %94, %cst_57 {dimension_numbers = #tpu.dot_dimension_numbers<[1], [0], [0], [1], [0, 0, 1, 1], [], []>} : vector<24x8xf32>, vector<8x256xf32>, vector<24x256xf32> -> vector<24x256xf32>
    %96 = vector.broadcast %70 : vector<24x1xf32> to vector<24x256xf32>
    %97 = arith.addf %95, %96 : vector<24x256xf32>
    %98 = vector.extract_strided_slice %97 {offsets = [0, 0], sizes = [8, 256], strides = [1, 1]} : vector<24x256xf32> to vector<8x256xf32>
    %99 = vector.extract_strided_slice %97 {offsets = [8, 0], sizes = [8, 256], strides = [1, 1]} : vector<24x256xf32> to vector<8x256xf32>
    %100 = vector.extract_strided_slice %97 {offsets = [16, 0], sizes = [8, 256], strides = [1, 1]} : vector<24x256xf32> to vector<8x256xf32>
    %101 = tpu.transpose %99, [1, 0] : vector<8x256xf32> -> vector<256x8xf32>
    %cst_58 = arith.constant dense<0.000000e+00> : vector<256x256xf32>
    %102 = tpu.matmul %101, %100, %cst_58 {dimension_numbers = #tpu.dot_dimension_numbers<[1], [0], [0], [1], [0, 0, 1, 1], [], []>} : vector<256x8xf32>, vector<8x256xf32>, vector<256x256xf32> -> vector<256x256xf32>
    %103 = arith.addf %102, %71 : vector<256x256xf32>
    %cst_59 = arith.constant dense<0xFF800000> : vector<256xf32>
    %104 = vector.multi_reduction <maximumf>, %103, %cst_59 [1] : vector<256x256xf32> to vector<256xf32>
    %105 = vector.shape_cast %104 : vector<256xf32> to vector<256x1xf32>
    %106 = vector.broadcast %105 : vector<256x1xf32> to vector<256x256xf32>
    %107 = arith.subf %103, %106 : vector<256x256xf32>
    %108 = math.exp %107 : vector<256x256xf32>
    %cst_60 = arith.constant dense<0.000000e+00> : vector<256xf32>
    %109 = vector.multi_reduction <add>, %108, %cst_60 [1] : vector<256x256xf32> to vector<256xf32>
    %110 = vector.shape_cast %109 : vector<256xf32> to vector<256x1xf32>
    %111 = tpu.reciprocal %110 {approx = true} : vector<256x1xf32> -> vector<256x1xf32>
    %112 = vector.broadcast %111 : vector<256x1xf32> to vector<256x256xf32>
    %113 = arith.mulf %108, %112 : vector<256x256xf32>
    %cst_61 = arith.constant dense<0.000000e+00> : vector<8x256xf32>
    %114 = tpu.matmul %98, %113, %cst_61 {dimension_numbers = #tpu.dot_dimension_numbers<[1], [1], [0], [0], [0, 0, 1, 0], [], []>} : vector<8x256xf32>, vector<256x256xf32>, vector<8x256xf32> -> vector<8x256xf32>
    %115 = vector.broadcast %68 : f32 to vector<8x256xf32>
    %116 = arith.mulf %115, %114 : vector<8x256xf32>
    %117 = arith.addf %116, %94 : vector<8x256xf32>
    %c0_62 = arith.constant 0 : index
    %c0_63 = arith.constant 0 : index
    %118 = vector.load %arg11[%c0_62, %c0_63] : memref<32x256xf32, #tpu.memory_space<vmem>>, vector<32x256xf32>
    %c0_64 = arith.constant 0 : index
    %c0_65 = arith.constant 0 : index
    %119 = vector.load %arg12[%c0_64, %c0_65] : memref<32x256xf32, #tpu.memory_space<vmem>>, vector<32x256xf32>
    %c0_66 = arith.constant 0 : index
    %c128_67 = arith.constant 128 : index
    %120 = vector.load %arg14[%c0_66, %c128_67] : memref<32x401xf32, #tpu.memory_space<vmem>>, vector<8x256xf32>
    tpu.vector_store %arg14[%c0_66, %c128_67], %117 {strides = array<i32>} : memref<32x401xf32, #tpu.memory_space<vmem>>, vector<8x256xf32>,
    %c0_68 = arith.constant 0 : index
    %c0_69 = arith.constant 0 : index
    %121 = vector.load %arg2[%c0_68, %c0_69] : memref<2x256xf32, #tpu.memory_space<vmem>>, vector<1x256xf32>
    %c1_70 = arith.constant 1 : index
    %c0_71 = arith.constant 0 : index
    %122 = vector.load %arg2[%c1_70, %c0_71] : memref<2x256xf32, #tpu.memory_space<vmem>>, vector<1x256xf32>
    %c0_72 = arith.constant 0 : index
    %c111_73 = arith.constant 111 : index
    %123 = vector.load %arg14[%c0_72, %c111_73] : memref<32x401xf32, #tpu.memory_space<vmem>>, vector<8x256xf32>
    %124 = vector.broadcast %121 : vector<1x256xf32> to vector<8x256xf32>
    %125 = arith.mulf %123, %124 : vector<8x256xf32>
    %c0_74 = arith.constant 0 : index
    %c0_75 = arith.constant 0 : index
    %126 = vector.load %arg15[%c0_74, %c0_75] : memref<288x256xf32, #tpu.memory_space<vmem>>, vector<8x256xf32>
    tpu.vector_store %arg15[%c0_74, %c0_75], %125 {strides = array<i32>} : memref<288x256xf32, #tpu.memory_space<vmem>>, vector<8x256xf32>,
    %c0_76 = arith.constant 0 : index
    %c112_77 = arith.constant 112 : index
    %127 = vector.load %arg14[%c0_76, %c112_77] : memref<32x401xf32, #tpu.memory_space<vmem>>, vector<8x256xf32>
    %c8 = arith.constant 8 : index
    %c0_78 = arith.constant 0 : index
    %128 = vector.load %arg15[%c8, %c0_78] : memref<288x256xf32, #tpu.memory_space<vmem>>, vector<8x256xf32>
    tpu.vector_store %arg15[%c8, %c0_78], %127 {strides = array<i32>} : memref<288x256xf32, #tpu.memory_space<vmem>>, vector<8x256xf32>,
    %c0_79 = arith.constant 0 : index
    %c113_80 = arith.constant 113 : index
    %129 = vector.load %arg14[%c0_79, %c113_80] : memref<32x401xf32, #tpu.memory_space<vmem>>, vector<8x256xf32>
    %130 = vector.broadcast %122 : vector<1x256xf32> to vector<8x256xf32>
    %131 = arith.mulf %129, %130 : vector<8x256xf32>
    %c16 = arith.constant 16 : index
    %c0_81 = arith.constant 0 : index
    %132 = vector.load %arg15[%c16, %c0_81] : memref<288x256xf32, #tpu.memory_space<vmem>>, vector<8x256xf32>
    tpu.vector_store %arg15[%c16, %c0_81], %131 {strides = array<i32>} : memref<288x256xf32, #tpu.memory_space<vmem>>, vector<8x256xf32>,
    %c0_82 = arith.constant 0 : index
    %c127_83 = arith.constant 127 : index
    %133 = vector.load %arg14[%c0_82, %c127_83] : memref<32x401xf32, #tpu.memory_space<vmem>>, vector<8x256xf32>
    %134 = vector.broadcast %121 : vector<1x256xf32> to vector<8x256xf32>
    %135 = arith.mulf %133, %134 : vector<8x256xf32>
    %c24 = arith.constant 24 : index
    %c0_84 = arith.constant 0 : index
    %136 = vector.load %arg15[%c24, %c0_84] : memref<288x256xf32, #tpu.memory_space<vmem>>, vector<8x256xf32>
    tpu.vector_store %arg15[%c24, %c0_84], %135 {strides = array<i32>} : memref<288x256xf32, #tpu.memory_space<vmem>>, vector<8x256xf32>,
    %c0_85 = arith.constant 0 : index
    %c128_86 = arith.constant 128 : index
    %137 = vector.load %arg14[%c0_85, %c128_86] : memref<32x401xf32, #tpu.memory_space<vmem>>, vector<8x256xf32>
    %c32_87 = arith.constant 32 : index
    %c0_88 = arith.constant 0 : index
    %138 = vector.load %arg15[%c32_87, %c0_88] : memref<288x256xf32, #tpu.memory_space<vmem>>, vector<8x256xf32>
    tpu.vector_store %arg15[%c32_87, %c0_88], %137 {strides = array<i32>} : memref<288x256xf32, #tpu.memory_space<vmem>>, vector<8x256xf32>,
    %c0_89 = arith.constant 0 : index
    %c129_90 = arith.constant 129 : index
    %139 = vector.load %arg14[%c0_89, %c129_90] : memref<32x401xf32, #tpu.memory_space<vmem>>, vector<8x256xf32>
    %140 = vector.broadcast %122 : vector<1x256xf32> to vector<8x256xf32>
    %141 = arith.mulf %139, %140 : vector<8x256xf32>
    %c40 = arith.constant 40 : index
    %c0_91 = arith.constant 0 : index
    %142 = vector.load %arg15[%c40, %c0_91] : memref<288x256xf32, #tpu.memory_space<vmem>>, vector<8x256xf32>
    tpu.vector_store %arg15[%c40, %c0_91], %141 {strides = array<i32>} : memref<288x256xf32, #tpu.memory_space<vmem>>, vector<8x256xf32>,
    %c0_92 = arith.constant 0 : index
    %c143_93 = arith.constant 143 : index
    %143 = vector.load %arg14[%c0_92, %c143_93] : memref<32x401xf32, #tpu.memory_space<vmem>>, vector<8x256xf32>
    %144 = vector.broadcast %121 : vector<1x256xf32> to vector<8x256xf32>
    %145 = arith.mulf %143, %144 : vector<8x256xf32>
    %c48 = arith.constant 48 : index
    %c0_94 = arith.constant 0 : index
    %146 = vector.load %arg15[%c48, %c0_94] : memref<288x256xf32, #tpu.memory_space<vmem>>, vector<8x256xf32>
    tpu.vector_store %arg15[%c48, %c0_94], %145 {strides = array<i32>} : memref<288x256xf32, #tpu.memory_space<vmem>>, vector<8x256xf32>,
    %c0_95 = arith.constant 0 : index
    %c144_96 = arith.constant 144 : index
    %147 = vector.load %arg14[%c0_95, %c144_96] : memref<32x401xf32, #tpu.memory_space<vmem>>, vector<8x256xf32>
    %c56 = arith.constant 56 : index
    %c0_97 = arith.constant 0 : index
    %148 = vector.load %arg15[%c56, %c0_97] : memref<288x256xf32, #tpu.memory_space<vmem>>, vector<8x256xf32>
    tpu.vector_store %arg15[%c56, %c0_97], %147 {strides = array<i32>} : memref<288x256xf32, #tpu.memory_space<vmem>>, vector<8x256xf32>,
    %c0_98 = arith.constant 0 : index
    %c145_99 = arith.constant 145 : index
    %149 = vector.load %arg14[%c0_98, %c145_99] : memref<32x401xf32, #tpu.memory_space<vmem>>, vector<8x256xf32>
    %150 = vector.broadcast %122 : vector<1x256xf32> to vector<8x256xf32>
    %151 = arith.mulf %149, %150 : vector<8x256xf32>
    %c64_100 = arith.constant 64 : index
    %c0_101 = arith.constant 0 : index
    %152 = vector.load %arg15[%c64_100, %c0_101] : memref<288x256xf32, #tpu.memory_space<vmem>>, vector<8x256xf32>
    tpu.vector_store %arg15[%c64_100, %c0_101], %151 {strides = array<i32>} : memref<288x256xf32, #tpu.memory_space<vmem>>, vector<8x256xf32>,
    %c0_102 = arith.constant 0 : index
    %c0_103 = arith.constant 0 : index
    %153 = vector.load %arg10[%c0_102, %c0_103] : memref<32x72xf32, #tpu.memory_space<vmem>>, vector<32x72xf32>
    %c0_104 = arith.constant 0 : index
    %c0_105 = arith.constant 0 : index
    %154 = vector.load %arg15[%c0_104, %c0_105] : memref<288x256xf32, #tpu.memory_space<vmem>>, vector<72x256xf32>
    %cst_106 = arith.constant dense<0.000000e+00> : vector<32x256xf32>
    %155 = tpu.matmul %153, %154, %cst_106 {dimension_numbers = #tpu.dot_dimension_numbers<[1], [0], [0], [1], [0, 0, 1, 1], [], []>} : vector<32x72xf32>, vector<72x256xf32>, vector<32x256xf32> -> vector<32x256xf32>
    %156 = vector.shape_cast %155 : vector<32x256xf32> to vector<1x32x256xf32>
    %cst_107 = arith.constant dense<0.000000e+00> : vector<1xf32>
    %157 = vector.multi_reduction <add>, %156, %cst_107 [1, 2] : vector<1x32x256xf32> to vector<1xf32>
    %158 = vector.shape_cast %157 : vector<1xf32> to vector<1x1x1xf32>
    %159 = vector.extract %158[0, 0, 0] : f32 from vector<1x1x1xf32>
    %cst_108 = arith.constant 1.22070313E-4 : f32
    %160 = arith.mulf %159, %cst_108 : f32
    %161 = arith.mulf %155, %155 : vector<32x256xf32>
    %162 = vector.shape_cast %161 : vector<32x256xf32> to vector<1x32x256xf32>
    %cst_109 = arith.constant dense<0.000000e+00> : vector<1xf32>
    %163 = vector.multi_reduction <add>, %162, %cst_109 [1, 2] : vector<1x32x256xf32> to vector<1xf32>
    %164 = vector.shape_cast %163 : vector<1xf32> to vector<1x1x1xf32>
    %165 = vector.extract %164[0, 0, 0] : f32 from vector<1x1x1xf32>
    %cst_110 = arith.constant 1.22070313E-4 : f32
    %166 = arith.mulf %165, %cst_110 : f32
    %167 = arith.mulf %160, %160 : f32
    %168 = arith.subf %166, %167 : f32
    %169 = vector.broadcast %160 : f32 to vector<32x256xf32>
    %170 = arith.subf %155, %169 : vector<32x256xf32>
    %cst_111 = arith.constant 9.99999974E-6 : f32
    %171 = arith.addf %168, %cst_111 : f32
    %172 = math.rsqrt %171 : f32
    %173 = vector.broadcast %172 : f32 to vector<32x256xf32>
    %174 = arith.mulf %170, %173 : vector<32x256xf32>
    %175 = arith.mulf %174, %118 : vector<32x256xf32>
    %176 = arith.addf %175, %119 : vector<32x256xf32>
    %cst_112 = arith.constant 0.000000e+00 : f32
    %177 = vector.broadcast %cst_112 : f32 to vector<32x256xf32>
    %178 = arith.cmpf oge, %176, %177 : vector<32x256xf32>
    %cst_113 = arith.constant 3.000000e-01 : f32
    %179 = vector.broadcast %cst_113 : f32 to vector<32x256xf32>
    %180 = arith.mulf %179, %176 : vector<32x256xf32>
    %181 = arith.select %178, %176, %180 : vector<32x256xi1>, vector<32x256xf32>
    %182 = arith.mulf %181, %1 : vector<32x256xf32>
    %183 = arith.addf %182, %1 : vector<32x256xf32>
    %c0_114 = arith.constant 0 : index
    %c0_115 = arith.constant 0 : index
    %c0_116 = arith.constant 0 : index
    %184 = vector.load %arg13[%c0_114, %c0_115, %c0_116] : memref<1x32x256xf32, #tpu.memory_space<vmem>>, vector<1x32x256xf32>
    %185 = vector.shape_cast %184 : vector<1x32x256xf32> to vector<32x256xf32>
    %186 = vector.shape_cast %183 : vector<32x256xf32> to vector<1x32x256xf32>
    tpu.vector_store %arg13[%c0_114, %c0_115, %c0_116], %186 {strides = array<i32>} : memref<1x32x256xf32, #tpu.memory_space<vmem>>, vector<1x32x256xf32>,
    return
  }
  func.func @transform_0(%arg0: i32) -> (i32, i32, i32) {
    %c0_i32 = arith.constant 0 : i32
    %c0_i32_0 = arith.constant 0 : i32
    %c0_i32_1 = arith.constant 0 : i32
    return %arg0, %c0_i32, %c0_i32_0 : i32, i32, i32
  }
  func.func @transform_1(%arg0: i32) -> (i32, i32) {
    %c0_i32 = arith.constant 0 : i32
    %c0_i32_0 = arith.constant 0 : i32
    %c0_i32_1 = arith.constant 0 : i32
    return %c0_i32, %c0_i32_0 : i32, i32
  }
  func.func @transform_2(%arg0: i32) -> (i32, i32) {
    %c0_i32 = arith.constant 0 : i32
    %c0_i32_0 = arith.constant 0 : i32
    %c0_i32_1 = arith.constant 0 : i32
    return %c0_i32, %c0_i32_0 : i32, i32
  }
  func.func @transform_3(%arg0: i32) -> (i32, i32) {
    %c0_i32 = arith.constant 0 : i32
    %c0_i32_0 = arith.constant 0 : i32
    %c0_i32_1 = arith.constant 0 : i32
    return %c0_i32, %c0_i32_0 : i32, i32
  }
  func.func @transform_4(%arg0: i32) -> (i32, i32) {
    %c0_i32 = arith.constant 0 : i32
    %c0_i32_0 = arith.constant 0 : i32
    %c0_i32_1 = arith.constant 0 : i32
    return %c0_i32, %c0_i32_0 : i32, i32
  }
  func.func @transform_5(%arg0: i32) -> (i32, i32) {
    %c0_i32 = arith.constant 0 : i32
    %c0_i32_0 = arith.constant 0 : i32
    %c0_i32_1 = arith.constant 0 : i32
    return %c0_i32, %c0_i32_0 : i32, i32
  }
  func.func @transform_6(%arg0: i32) -> (i32, i32) {
    %c0_i32 = arith.constant 0 : i32
    %c0_i32_0 = arith.constant 0 : i32
    %c0_i32_1 = arith.constant 0 : i32
    return %c0_i32, %c0_i32_0 : i32, i32
  }
  func.func @transform_7(%arg0: i32) -> (i32, i32) {
    %c0_i32 = arith.constant 0 : i32
    %c0_i32_0 = arith.constant 0 : i32
    %c0_i32_1 = arith.constant 0 : i32
    return %c0_i32, %c0_i32_0 : i32, i32
  }
  func.func @transform_8(%arg0: i32) -> i32 {
    %c0_i32 = arith.constant 0 : i32
    %c0_i32_0 = arith.constant 0 : i32
    return %c0_i32 : i32
  }
  func.func @transform_9(%arg0: i32) -> (i32, i32) {
    %c0_i32 = arith.constant 0 : i32
    %c0_i32_0 = arith.constant 0 : i32
    %c0_i32_1 = arith.constant 0 : i32
    return %c0_i32, %c0_i32_0 : i32, i32
  }
  func.func @transform_10(%arg0: i32) -> (i32, i32) {
    %c0_i32 = arith.constant 0 : i32
    %c0_i32_0 = arith.constant 0 : i32
    %c0_i32_1 = arith.constant 0 : i32
    return %c0_i32, %c0_i32_0 : i32, i32
  }
  func.func @transform_11(%arg0: i32) -> (i32, i32) {
    %c0_i32 = arith.constant 0 : i32
    %c0_i32_0 = arith.constant 0 : i32
    %c0_i32_1 = arith.constant 0 : i32
    return %c0_i32, %c0_i32_0 : i32, i32
  }
  func.func @transform_12(%arg0: i32) -> (i32, i32, i32) {
    %c0_i32 = arith.constant 0 : i32
    %c0_i32_0 = arith.constant 0 : i32
    %c0_i32_1 = arith.constant 0 : i32
    return %arg0, %c0_i32, %c0_i32_0 : i32, i32, i32
  }
}

</mosaic_0001>

<bundles_post_ra>
// kernel: _lambda_.1
= control target key start
LH: loop header
LB: loop body
LE: loop exit
PB: predicated region body
PF: predicated region fallthrough
CT: control target
= control target key end

     0   :  { %s5394_s23 = smov 0   ;;  %s7726_s0 = inlined_call_operand.vmem [shape: f32[2,32,256], index: 0, kind: input, shape index: {}]   ;;  %s7727_s1 = inlined_call_operand.vmem [shape: f32[2,256], index: 1, kind: input, shape index: {}]   ;;  %s7728_s2 = inlined_call_operand.vmem [shape: f32[8,288], index: 2, kind: input, shape index: {}]   ;;  %s7729_s3 = inlined_call_operand.vmem [shape: f32[8,256], index: 3, kind: input, shape index: {}]   ;;  %s7730_s4 = inlined_call_operand.vmem [shape: f32[8,256], index: 4, kind: input, shape index: {}]   ;;  %s7731_s5 = inlined_call_operand.vmem [shape: f32[24,8], index: 5, kind: input, shape index: {}]   ;;  %s7732_s6 = inlined_call_operand.vmem [shape: f32[24,1], index: 6, kind: input, shape index: {}]   ;;  %s7733_s7 = inlined_call_operand.vmem [shape: f32[256,256], index: 7, kind: input, shape index: {}]   ;;  %s7734_s8 = inlined_call_operand.<no memory space> [shape: f32[1], index: 8, kind: input, shape index: {}]   ;;  %s7735_s9 = inlined_call_operand.vmem [shape: f32[32,72], index: 9, kind: input, shape index: {}]   ;;  %s7736_s10 = inlined_call_operand.vmem [shape: f32[32,256], index: 10, kind: input, shape index: {}]   ;;  %s7737_s11 = inlined_call_operand.vmem [shape: f32[32,256], index: 11, kind: input, shape index: {}]   ;;  %s7738_s12 = inlined_call_operand.vmem [shape: f32[2,32,256], index: 12, kind: output, shape index: {}]  }
   0x1   :  { %17 = sst [smem:[#allocation4]] %s7734_s8 }
   0x2 LB: > { %s4227_s24 = sadd.s32 4294967295, %s5314_s23   ;;  %p4231_p0 = scmp.ge.s32.totalorder %s5314_s23, 1  ;;  %s5314_s23 = sphi %s5394_s23, %s23_s23  }
   0x3   : > { %p363_p1 = scmp.lt.s32.totalorder %s5314_s23, 3 }
   0x5   : > { %p364_p2 = pnand %p4231_p0, %p363_p1 }
   0x7   : > { %367 = sbr.rel (%p364_p2) target bundleno = 4118 (0x1016), region = 68 }
   0xe   : > { %v468_v0 = vlaneseq  ;;  %v5316_v1 = vmov 0.0   ;;  %v4236_v2 = vld [vmem:[%s7727_s1 + $0x1] ss:$2 sm:$0x3]  ;;  %vm426_vm0 = vcmask 138240   ;;  %p405_p3 = scmp.lt.s32.totalorder %s4227_s24, 1 }
   0xf   : > { %423 = vst [vmem:[#allocation2] sm:$0xff] %v5316_v1  ;;  %1406 = vmatprep.mubr.f32.mxu1 %v5316_v1  ;;  %v452_v4 = vld [vmem:[%s7727_s1] ss:$2 sm:$0x3]  ;;  %431 = vst.msk [vmem:[#allocation2 + $0x38] sm:$0xff] %vm426_vm0, %v5316_v1  ;;  %s5317_s29 = smov 113  }
  0x10   : > { %v469_v3 = vshrl.u32 %v468_v0, 7  ;;  %427 = vst.msk [vmem:[#allocation2 + $0x18] sm:$0xff] %vm426_vm0, %v5316_v1  ;;  %435 = vst.msk [vmem:[#allocation2 + $0x58] sm:$0xff] %vm426_vm0, %v5316_v1  ;;  %s7960_s24 = smov (!%p405_p3, %s4227_s24), 1  ;;  %s5318_s30 = smov 111   ;;  %vm480_vm1 = vcmask 908288  }
  0x11   : > { %439 = vst.msk [vmem:[#allocation2 + $0x78] sm:$0xff] %vm426_vm0, %v5316_v1  ;;  %s7739_s28 = sshll.u32 %s7960_s24, 6  ;;  %s5319_s16 = smov 127   ;;  %vm655_vm2 = vcmask 924672   ;;  %vm749_vm3 = vcmask 1039360   ;;  %vm802_vm4 = vcmask 7168  }
  0x12   : > { %v5412_v5 = vsub.s32 0, %v469_v3  ;;  %v5414_v6 = vsub.s32 1, %v469_v3  ;;  %s5430_s15 = scalar_lea.vmem %s7726_s0, %s7739_s28  ;;  %s5320_s17 = smov 1   ;;  %vm708_vm5 = vcmask 121856   ;;  %vm605_vm6 = vcmask 130048  }
  0x13   : > { %v5433_v11 = vld [vmem:[%s5430_s15 + $0x10] sm:$0xff]  ;;  %v5436_v12 = vld [vmem:[%s5430_s15 + $0x18] sm:$0xff]  ;;  %v5441_v13 = vld [vmem:[%s5430_s15 + $0x20] sm:$0xff]  ;;  %s7746_s18 = smov 15   ;;  %s7744_s19 = smov 17   ;;  %vm1075_vm7 = vcmask 916480  }
  0x14   : > { %7818 = vst [vmem:[#allocation5_spill] sm:$0xff] %v5412_v5  ;;  %7819 = vst [vmem:[#allocation6_spill] sm:$0xff] %v5414_v6  ;;  %v646_v7 = vrot.slane %v4236_v2, %v5412_v5  ;;  %v471_v8 = vrot.slane %v452_v4, %v5412_v5  ;;  %v650_v9 = vrot.slane %v4236_v2, %v5414_v6  ;;  %v5444_v14 = vld [vmem:[%s5430_s15 + $0x28] sm:$0xff]  ;;  %v5449_v15 = vld [vmem:[%s5430_s15 + $0x30] sm:$0xff]  ;;  %s7742_s20 = smov 16   ;;  %s7740_s21 = smov 112  }
  0x15   : > { %v475_v10 = vrot.slane %v452_v4, %v5414_v6  ;;  %446 = vst [vmem:[#allocation2 + $0x28] sm:$0xff] %v5433_v11  ;;  %447 = vst [vmem:[#allocation2 + $0x30] sm:$0xff] %v5436_v12  ;;  %v5452_v16 = vld [vmem:[%s5430_s15 + $0x38] sm:$0xff]  ;;  %v5465_v17 = vld [vmem:[%s5430_s15] sm:$0xff]  ;;  %v4570_v19 = vpack.i.bf16 %v5436_v12, %v5433_v11  ;;  %v4580_v21 = vpack.i.bf16 %v5444_v14, %v5441_v13  ;;  %vm1267_vm8 = vcmask 261120  }
  0x16   : > { %651 = vrot.lane.b32.xlu1 %v646_v7, %s5317_s29  ;;  %476 = vrot.lane.b32.xlu0 %v471_v8, %s5318_s30  ;;  %448 = vst [vmem:[#allocation2 + $0x48] sm:$0xff] %v5441_v13  ;;  %449 = vst [vmem:[#allocation2 + $0x50] sm:$0xff] %v5444_v14  ;;  %v5468_v18 = vld [vmem:[%s5430_s15 + $0x8] sm:$0xff]  ;;  %v4585_v22 = vpack.i.bf16 %v5452_v16, %v5449_v15  ;;  %v5530_v61 = vld [vmem:[#allocation2 + $0x38] sm:$0xff]  ;;  %vm1545_vm11 = vcmask 64512   ;;  %vm3940_vm12 = vcmask 588800  }
  0x17   : > { %450 = vst [vmem:[#allocation2 + $0x68] sm:$0xff] %v5449_v15  ;;  %451 = vst [vmem:[#allocation2 + $0x70] sm:$0xff] %v5452_v16  ;;  %v4565_v20 = vpack.i.bf16 %v5468_v18, %v5465_v17  ;;  %v4670_v63 = vpack.i.bf16 %v5530_v61, %v5436_v12  ;;  %v5536_v0 = vld [vmem:[#allocation2 + $0x18] sm:$0xff] }
  0x1a   : > { %653 = vrot.lane.b32.xlu1 %v650_v9, %s5317_s29  ;;  %478 = vrot.lane.b32.xlu0 %v475_v10, %s5318_s30 }
  0x1e   : > { %747 = vrot.lane.b32.xlu1 %v475_v10, %s5319_s16  ;;  %745 = vrot.lane.b32.xlu0 %v471_v8, %s5319_s16 }
  0x22   : > { %857 = vrot.lane.b32.xlu1 %v650_v9, %s5320_s17  ;;  %855 = vrot.lane.b32.xlu0 %v646_v7, %s5320_s17 }
  0x26   : > { %949 = vrot.lane.b32.xlu1 %v475_v10, %s7746_s18  ;;  %947 = vrot.lane.b32.xlu0 %v471_v8, %s7746_s18 }
  0x2a   : > { %1114 = vrot.lane.b32.xlu1 %v650_v9, %s7744_s19  ;;  %1112 = vrot.lane.b32.xlu0 %v646_v7, %s7744_s19 }
  0x2e   : > { %4571 = vrot.lane.b32.xlu1 %v4570_v19, %s7742_s20  ;;  %4566 = vrot.lane.b32.xlu0 %v4565_v20, %s7742_s20 }
  0x32   : > { %4581 = vrot.lane.b32.xlu1 %v4580_v21, %s7742_s20  ;;  %4576 = vrot.lane.b32.xlu0 %v5316_v1, %s7742_s20 }
  0x36   : > { %4591 = vrot.lane.b32.xlu1 %v5316_v1, %s7742_s20  ;;  %4586 = vrot.lane.b32.xlu0 %v4585_v22, %s7742_s20  ;;  %v4665_v1 = vpack.i.bf16 %v5536_v0, %v5468_v18 }
  0x88   : > { %v652_v23 = vpop.permute.xlu1 %651  ;;  %v477_v24 = vpop.permute.xlu0 %476 }
  0x89   : > { %v491_v25 = vmul.f32 0.0, %v477_v24  ;;  %v666_v26 = vmul.f32 0.0, %v652_v23 }
  0x8b   : > { %v4600_v27 = vpack.i.bf16 %v491_v25, %v491_v25  ;;  %v4610_v29 = vpack.i.bf16 %v666_v26, %v666_v26 }
  0x8c   : > { %v479_v28 = vpop.permute.xlu0 %478  ;;  %v654_v58 = vpop.permute.xlu1 %653 }
  0x8d   : > { %4601 = vrot.lane.b32.xlu1 %v4600_v27, %s7744_s19  ;;  %4596 = vrot.lane.b32.xlu0 %v4600_v27, %s7744_s19  ;;  %v481_v34 = vsel %vm480_vm1, %v477_v24, %v479_v28  ;;  %v490_v41 = vmul.f32 %v479_v28, %v5436_v12  ;;  %v487_v44 = vmul.f32 %v479_v28, %v5468_v18 }
  0x8e   : > { %v489_v40 = vmul.f32 %v481_v34, %v5433_v11  ;;  %v486_v43 = vmul.f32 %v481_v34, %v5465_v17  ;;  %v492_v47 = vmul.f32 %v481_v34, %v5441_v13  ;;  %v493_v48 = vmul.f32 %v479_v28, %v5444_v14 }
  0x8f   : > { %v495_v50 = vmul.f32 %v481_v34, %v5449_v15  ;;  %v496_v51 = vmul.f32 %v479_v28, %v5452_v16  ;;  %v656_v62 = vsel %vm655_vm2, %v652_v23, %v654_v58  ;;  %v665_v3 = vmul.f32 %v654_v58, %v5436_v12 }
  0x90   : > { %v5488_v30 = vpop.permute.xlu0 %745  ;;  %v4640_v46 = vpack.i.bf16 %v490_v41, %v489_v40  ;;  %v4635_v49 = vpack.i.bf16 %v487_v44, %v486_v43  ;;  %v4645_v56 = vpack.i.bf16 %v493_v48, %v492_v47  ;;  %v664_v2 = vmul.f32 %v656_v62, %v5433_v11  ;;  %v748_v8 = vpop.permute.xlu1 %747 }
  0x91   : > { %4611 = vrot.lane.b32.xlu1 %v4610_v29, %s7746_s18  ;;  %4606 = vrot.lane.b32.xlu0 %v4610_v29, %s7746_s18  ;;  %v760_v31 = vmul.f32 0.0, %v5488_v30  ;;  %v4650_v57 = vpack.i.bf16 %v496_v51, %v495_v50  ;;  %v661_v4 = vmul.f32 %v656_v62, %v5465_v17  ;;  %v662_v7 = vmul.f32 %v654_v58, %v5468_v18 }
  0x92   : > { %v4680_v9 = vpack.i.bf16 %v665_v3, %v664_v2  ;;  %v667_v10 = vmul.f32 %v656_v62, %v5441_v13  ;;  %v668_v19 = vmul.f32 %v654_v58, %v5444_v14  ;;  %v670_v21 = vmul.f32 %v656_v62, %v5449_v15 }
  0x93   : > { %v4620_v32 = vpack.i.bf16 %v760_v31, %v760_v31  ;;  %v4675_v20 = vpack.i.bf16 %v662_v7, %v661_v4  ;;  %v671_v22 = vmul.f32 %v654_v58, %v5452_v16  ;;  %v750_v23 = vsel %vm749_vm3, %v5488_v30, %v748_v8 }
  0x94   : > { %v5493_v33 = vpop.permute.xlu0 %855  ;;  %v4685_v24 = vpack.i.bf16 %v668_v19, %v667_v10  ;;  %v758_v25 = vmul.f32 %v750_v23, %v5433_v11  ;;  %v759_v26 = vmul.f32 %v748_v8, %v5436_v12  ;;  %v755_v28 = vmul.f32 %v750_v23, %v5465_v17 }
  0x95   : > { %4621 = vrot.lane.b32.xlu1 %v4620_v32, %s5320_s17  ;;  %4616 = vrot.lane.b32.xlu0 %v4620_v32, %s5320_s17  ;;  %v869_v35 = vmul.f32 %v5493_v33, %v5441_v13  ;;  %v872_v36 = vmul.f32 %v5493_v33, %v5449_v15  ;;  %v863_v37 = vmul.f32 %v5493_v33, %v5465_v17 }
  0x96   : > { %v866_v38 = vmul.f32 %v5493_v33, %v5433_v11  ;;  %v4690_v27 = vpack.i.bf16 %v671_v22, %v670_v21  ;;  %v756_v29 = vmul.f32 %v748_v8, %v5468_v18  ;;  %v4700_v30 = vpack.i.bf16 %v759_v26, %v758_v25 }
  0x97   : > { %v4630_v39 = vpack.i.bf16 %v872_v36, %v869_v35  ;;  %v761_v32 = vmul.f32 %v750_v23, %v5441_v13  ;;  %v762_v34 = vmul.f32 %v748_v8, %v5444_v14  ;;  %v764_v36 = vmul.f32 %v750_v23, %v5449_v15 }
  0x98   : > { %v4625_v42 = vpack.i.bf16 %v866_v38, %v863_v37  ;;  %v5512_v45 = vpop.permute.xlu0 %947  ;;  %v4695_v35 = vpack.i.bf16 %v756_v29, %v755_v28  ;;  %v765_v37 = vmul.f32 %v748_v8, %v5452_v16  ;;  %v4715_v44 = vpack.i.bf16 %v5433_v11, %v5465_v17 }
  0x99   : > { %4631 = vrot.lane.b32.xlu1 %v4630_v39, %s5319_s16  ;;  %v961_v52 = vmul.f32 %v5512_v45, %v5441_v13  ;;  %v964_v53 = vmul.f32 %v5512_v45, %v5449_v15  ;;  %v955_v54 = vmul.f32 %v5512_v45, %v5465_v17  ;;  %v958_v55 = vmul.f32 %v5512_v45, %v5433_v11 }
  0x9a   : > { %4626 = vrot.lane.b32.xlu0 %v4625_v42, %s5319_s16  ;;  %v4705_v40 = vpack.i.bf16 %v762_v34, %v761_v32  ;;  %v4710_v41 = vpack.i.bf16 %v765_v37, %v764_v36  ;;  %v858_v42 = vpop.permute.xlu1 %857 }
  0x9b   : > { %v4660_v59 = vpack.i.bf16 %v964_v53, %v961_v52  ;;  %v4655_v60 = vpack.i.bf16 %v958_v55, %v955_v54  ;;  %v859_v47 = vsel %vm802_vm4, %v5493_v33, %v858_v42  ;;  %v868_v52 = vmul.f32 %v5530_v61, %v858_v42 }
  0x9c   : > { %v5561_v31 = vpop.permute.xlu0 %1112  ;;  %v867_v51 = vmul.f32 %v859_v47, %v5436_v12  ;;  %v864_v53 = vmul.f32 %v859_v47, %v5468_v18  ;;  %v865_v54 = vmul.f32 %v5536_v0, %v858_v42 }
  0x9d   : > { %4641 = vrot.lane.b32.xlu1 %v4640_v46, %s7744_s19  ;;  %v1120_v38 = vmul.f32 %v5561_v31, %v5465_v17  ;;  %v1123_v39 = vmul.f32 %v5561_v31, %v5433_v11  ;;  %v1038_v46 = vld [vmem:[#allocation2 + $0x78] sm:$0xff]  ;;  %v1126_v37 = vmul.f32 %v5561_v31, %v5441_v13 }
  0x9e   : > { %4636 = vrot.lane.b32.xlu0 %v4635_v49, %s7744_s19  ;;  %v4730_v48 = vpack.i.bf16 %v1038_v46, %v5452_v16  ;;  %v1035_v49 = vld [vmem:[#allocation2 + $0x58] sm:$0xff]  ;;  %v950_v55 = vpop.permute.xlu1 %949  ;;  %v4740_v33 = vpack.i.bf16 %v868_v52, %v867_v51  ;;  %v4735_v58 = vpack.i.bf16 %v865_v54, %v864_v53 }
  0x9f   : > { %v4720_v43 = vpack.i.bf16 %v1123_v39, %v1120_v38  ;;  %v4725_v50 = vpack.i.bf16 %v1035_v49, %v5444_v14  ;;  %v951_v62 = vsel %vm708_vm5, %v5512_v45, %v950_v55  ;;  %v960_v2 = vmul.f32 %v5530_v61, %v950_v55 }
  0xa0   : > { %v956_v4 = vmul.f32 %v951_v62, %v5468_v18  ;;  %v957_v7 = vmul.f32 %v5536_v0, %v950_v55  ;;  %v963_v10 = vmul.f32 %v1035_v49, %v950_v55  ;;  %v966_v21 = vmul.f32 %v1038_v46, %v950_v55 }
  0xa1   : > { %4646 = vrot.lane.b32.xlu1 %v4645_v56, %s7744_s19  ;;  %v870_v56 = vmul.f32 %v859_v47, %v5444_v14  ;;  %v1129_v38 = vmul.f32 %v5561_v31, %v5449_v15 }
  0xa2   : > { %4651 = vrot.lane.b32.xlu0 %v4650_v57, %s7744_s19  ;;  %v871_v57 = vmul.f32 %v1035_v49, %v858_v42  ;;  %v1115_v8 = vpop.permute.xlu1 %1114  ;;  %v4755_v19 = vpack.i.bf16 %v957_v7, %v956_v4 }
  0xa3   : > { %v1116_v22 = vsel %vm426_vm0, %v5561_v31, %v1115_v8  ;;  %v1125_v25 = vmul.f32 %v1115_v8, %v5530_v61  ;;  %v1122_v28 = vmul.f32 %v1115_v8, %v5536_v0  ;;  %v1131_v32 = vmul.f32 %v1115_v8, %v1038_v46  ;;  %v1193_v61 = vld [vmem:[%s7728_s2 + $0x8] sm:$0xff] }
  0xa4   : > { %v1128_v36 = vmul.f32 %v1115_v8, %v1035_v49  ;;  %1335 = vmatprep.mubr.f32.mxu0 %v1193_v61 }
  0xa5   : > { %4661 = vrot.lane.b32.xlu1 %v4660_v59, %s5317_s29  ;;  %v873_v59 = vmul.f32 %v859_v47, %v5452_v16 }
  0xa6   : > { %4656 = vrot.lane.b32.xlu0 %v4655_v60, %s5317_s29  ;;  %v874_v60 = vmul.f32 %v1038_v46, %v858_v42  ;;  %v5630_v42 = vpop.permute.xlu1 %4571 }
  0xa8   : > { %v4750_v3 = vpack.i.bf16 %v874_v60, %v873_v59 }
  0xa9   : > { %4671 = vrot.lane.b32.xlu1 %v4670_v63, %s7740_s21  ;;  %v4745_v63 = vpack.i.bf16 %v871_v57, %v870_v56  ;;  %v4573_v56 = vunpack.i.l.bf16 %v5630_v42 }
  0xaa   : > { %4666 = vrot.lane.b32.xlu0 %v4665_v1, %s7740_s21  ;;  %v959_v1 = vmul.f32 %v951_v62, %v5436_v12 }
  0xac   : > { %v4760_v45 = vpack.i.bf16 %v960_v2, %v959_v1 }
  0xad   : > { %4681 = vrot.lane.b32.xlu1 %v4680_v9, %s7746_s18  ;;  %v962_v9 = vmul.f32 %v951_v62, %v5444_v14 }
  0xae   : > { %4676 = vrot.lane.b32.xlu0 %v4675_v20, %s7746_s18  ;;  %v965_v20 = vmul.f32 %v951_v62, %v5452_v16 }
  0xaf   : > { %v4765_v23 = vpack.i.bf16 %v963_v10, %v962_v9 }
  0xb0   : > { %v4770_v26 = vpack.i.bf16 %v966_v21, %v965_v20 }
  0xb1   : > { %4686 = vrot.lane.b32.xlu1 %v4685_v24, %s7746_s18  ;;  %v1124_v24 = vmul.f32 %v1116_v22, %v5436_v12 }
  0xb2   : > { %4691 = vrot.lane.b32.xlu0 %v4690_v27, %s7746_s18  ;;  %v1121_v27 = vmul.f32 %v1116_v22, %v5468_v18  ;;  %s7950_s18 = smov 17  }
  0xb3   : > { %v4780_v29 = vpack.i.bf16 %v1125_v25, %v1124_v24 }
  0xb4   : > { %v4775_v34 = vpack.i.bf16 %v1122_v28, %v1121_v27 }
  0xb5   : > { %4701 = vrot.lane.b32.xlu1 %v4700_v30, %s5320_s17  ;;  %v1130_v30 = vmul.f32 %v1116_v22, %v5452_v16 }
  0xb6   : > { %4696 = vrot.lane.b32.xlu0 %v4695_v35, %s5320_s17  ;;  %v1127_v35 = vmul.f32 %v1116_v22, %v5444_v14 }
  0xb7   : > { %v4795_v0 = vpack.i.bf16 %v1131_v32, %v1130_v30 }
  0xb8   : > { %v4785_v39 = vpack.i.bf16 %v1128_v36, %v1127_v35 }
  0xb9   : > { %4706 = vrot.lane.b32.xlu1 %v4705_v40, %s5320_s17  ;;  %v4790_v40 = vpack.i.bf16 %v5449_v15, %v5441_v13 }
  0xba   : > { %4711 = vrot.lane.b32.xlu0 %v4710_v41, %s5320_s17  ;;  %v4800_v41 = vpack.i.bf16 %v1129_v38, %v1126_v37 }
  0xbd   : > { %4721 = vrot.lane.b32.xlu1 %v4720_v43, %s5318_s30  ;;  %v5632_v43 = vpop.permute.xlu0 %4566 }
  0xbe   : > { %4716 = vrot.lane.b32.xlu0 %v4715_v44, %s7740_s21  ;;  %v5634_v44 = vpop.permute.xlu1 %4581  ;;  %v4568_v1 = vunpack.i.l.bf16 %v5632_v43 }
  0xbf   : > { %v4584_v7 = vunpack.i.h.bf16 %v5634_v44  ;;  %v4583_v8 = vunpack.i.l.bf16 %v5634_v44 }
  0xc1   : > { %4731 = vrot.lane.b32.xlu1 %v4730_v48, %s7740_s21  ;;  %v5636_v31 = vpop.permute.xlu0 %4576 }
  0xc2   : > { %4726 = vrot.lane.b32.xlu0 %v4725_v50, %s7740_s21  ;;  %v5638_v46 = vpop.permute.xlu1 %4591  ;;  %v4579_v10 = vunpack.i.h.bf16 %v5636_v31  ;;  %v4578_v28 = vunpack.i.l.bf16 %v5636_v31 }
  0xc3   : > { %v4594_v44 = vunpack.i.h.bf16 %v5638_v46  ;;  %v4593_v31 = vunpack.i.l.bf16 %v5638_v46 }
  0xc5   : > { %4741 = vrot.lane.b32.xlu1 %v4740_v33, %s5319_s16  ;;  %v5640_v47 = vpop.permute.xlu0 %4586  ;;  %v4574_v33 = vunpack.i.h.bf16 %v5630_v42  ;;  %v610_v46 = vsel %vm605_vm6, %v4593_v31, %v4583_v8 }
  0xc6   : > { %4736 = vrot.lane.b32.xlu0 %v4735_v58, %s5319_s16  ;;  %v4569_v58 = vunpack.i.h.bf16 %v5632_v43  ;;  %v4588_v37 = vunpack.i.l.bf16 %v5640_v47 }
  0xc7   : > { %v609_v61 = vsel %vm605_vm6, %v4573_v56, %v4574_v33 }
  0xc8   : > { %v607_v36 = vsel %vm605_vm6, %v4568_v1, %v4569_v58 }
  0xc9   : > { %4746 = vrot.lane.b32.xlu1 %v4745_v63, %s5319_s16 }
  0xca   : > { %4751 = vrot.lane.b32.xlu0 %v4750_v3, %s5319_s16 }
  0xcd   : > { %4761 = vrot.lane.b32.xlu1 %v4760_v45, %s5317_s29 }
  0xce   : > { %4756 = vrot.lane.b32.xlu0 %v4755_v19, %s5317_s29 }
  0xd1   : > { %4766 = vrot.lane.b32.xlu1 %v4765_v23, %s5317_s29 }
  0xd2   : > { %4771 = vrot.lane.b32.xlu0 %v4770_v26, %s5317_s29 }
  0xd5   : > { %4781 = vrot.lane.b32.xlu1 %v4780_v29, %s5318_s30 }
  0xd6   : > { %4776 = vrot.lane.b32.xlu0 %v4775_v34, %s5318_s30 }
  0xd9   : > { %4796 = vrot.lane.b32.xlu1 %v4795_v0, %s5318_s30  ;;  %v4589_v0 = vunpack.i.h.bf16 %v5640_v47  ;;  %v608_v47 = vsel %vm605_vm6, %v4579_v10, %v4573_v56 }
  0xda   : > { %4786 = vrot.lane.b32.xlu0 %v4785_v39, %s5318_s30 }
  0xdb   : > { %v613_v58 = vsel %vm605_vm6, %v4588_v37, %v4589_v0 }
  0xdd   : > { %4801 = vrot.lane.b32.xlu1 %v4800_v41, %s5318_s30 }
  0xde   : > { %4791 = vrot.lane.b32.xlu0 %v4790_v40, %s7740_s21 }
  0xff   : > { %v4602_v48 = vpop.permute.xlu1 %4601  ;;  %v4597_v49 = vpop.permute.xlu0 %4596 }
 0x100   : > { %v4599_v59 = vunpack.i.h.bf16 %v4597_v49  ;;  %v4598_v2 = vunpack.i.l.bf16 %v4597_v49  ;;  %v4603_v19 = vunpack.i.l.bf16 %v4602_v48  ;;  %v4604_v29 = vunpack.i.h.bf16 %v4602_v48 }
 0x101   : > { %v4325_v48 = vpack.c.bf16 %v609_v61, %v607_v36  ;;  %v606_v49 = vsel %vm605_vm6, %v4578_v28, %v4568_v1 }
 0x103   : > { %v5642_v50 = vpop.permute.xlu1 %4611  ;;  %v5644_v51 = vpop.permute.xlu0 %4606 }
 0x104   : > { %v4609_v56 = vunpack.i.h.bf16 %v5644_v51  ;;  %v4614_v28 = vunpack.i.h.bf16 %v5642_v50 }
 0x107   : > { %v5646_v52 = vpop.permute.xlu1 %4621  ;;  %v5648_v53 = vpop.permute.xlu0 %4616 }
 0x10b   : > { %v5650_v54 = vpop.permute.xlu1 %4631 }
 0x10c   : > { %v5652_v55 = vpop.permute.xlu0 %4626 }
 0x10f   : > { %v4642_v57 = vpop.permute.xlu1 %4641 }
 0x110   : > { %v4644_v60 = vunpack.i.h.bf16 %v4642_v57  ;;  %v4643_v62 = vunpack.i.l.bf16 %v4642_v57  ;;  %v4637_v63 = vpop.permute.xlu0 %4636  ;;  %v611_v57 = vsel %vm605_vm6, %v4583_v8, %v4584_v7  ;;  %v4608_v7 = vunpack.i.l.bf16 %v5644_v51 }
 0x111   : > { %v4639_v3 = vunpack.i.h.bf16 %v4637_v63  ;;  %v4638_v4 = vunpack.i.l.bf16 %v4637_v63  ;;  %v612_v63 = vsel %vm605_vm6, %v4594_v44, %v4588_v37  ;;  %v4613_v8 = vunpack.i.l.bf16 %v5642_v50 }
 0x112   : > { %v536_v45 = vsel %vm426_vm0, %v4643_v62, %v4644_v60  ;;  %v535_v9 = vsel %vm426_vm0, %v4599_v59, %v4643_v62  ;;  %v4327_v60 = vpack.c.bf16 %v608_v47, %v606_v49  ;;  %v4329_v62 = vpack.c.bf16 %v613_v58, %v611_v57 }
 0x113   : > { %v4647_v20 = vpop.permute.xlu1 %4646  ;;  %v534_v21 = vsel %vm426_vm0, %v4638_v4, %v4639_v3  ;;  %v533_v22 = vsel %vm426_vm0, %v4598_v2, %v4638_v4  ;;  %v4331_v10 = vpack.c.bf16 %v612_v63, %v610_v46  ;;  %v4623_v47 = vunpack.i.l.bf16 %v5646_v52 }
 0x114   : > { %v4649_v23 = vunpack.i.h.bf16 %v4647_v20  ;;  %v4648_v24 = vunpack.i.l.bf16 %v4647_v20  ;;  %v4652_v25 = vpop.permute.xlu0 %4651  ;;  %v4317_v26 = vpack.c.bf16 %v536_v45, %v534_v21  ;;  %v4319_v27 = vpack.c.bf16 %v535_v9, %v533_v22 }
 0x115   : > { %v4654_v30 = vunpack.i.h.bf16 %v4652_v25  ;;  %v4653_v32 = vunpack.i.l.bf16 %v4652_v25 }
 0x116   : > { %4318 = vmatprep.subr.bf16.mxu0 %v4317_v26  ;;  %v538_v34 = vsel %vm426_vm0, %v4648_v24, %v4649_v23  ;;  %v537_v35 = vsel %vm426_vm0, %v4603_v19, %v4648_v24 }
 0x117   : > { %4320 = vmatpush1.bf16.msra.mxu0 %v4319_v27  ;;  %v5672_v38 = vpop.permute.xlu1 %4661  ;;  %v540_v39 = vsel %vm426_vm0, %v4653_v32, %v4654_v30  ;;  %v539_v40 = vsel %vm426_vm0, %v4604_v29, %v4653_v32 }
 0x118   : > { %v5676_v41 = vpop.permute.xlu0 %4656  ;;  %v4321_v42 = vpack.c.bf16 %v540_v39, %v538_v34  ;;  %v4323_v43 = vpack.c.bf16 %v539_v40, %v537_v35  ;;  %v4619_v35 = vunpack.i.h.bf16 %v5648_v53 }
 0x11a   : > { %4322 = vmatprep.subr.bf16.mxu0 %v4321_v42 }
 0x11b   : > { %4324 = vmatpush1.bf16.msra.mxu0 %v4323_v43  ;;  %v5682_v33 = vpop.permute.xlu1 %4671  ;;  %v4618_v43 = vunpack.i.l.bf16 %v5648_v53 }
 0x11c   : > { %v5686_v59 = vpop.permute.xlu0 %4666  ;;  %4326 = vmatprep.subr.bf16.mxu0 %v4325_v48 }
 0x11f   : > { %4328 = vmatpush1.bf16.msra.mxu0 %v4327_v60  ;;  %v4682_v1 = vpop.permute.xlu1 %4681 }
 0x120   : > { %v4684_v2 = vunpack.i.h.bf16 %v4682_v1  ;;  %v4683_v3 = vunpack.i.l.bf16 %v4682_v1  ;;  %v4677_v4 = vpop.permute.xlu0 %4676  ;;  %4330 = vmatprep.subr.bf16.mxu0 %v4329_v62 }
 0x121   : > { %v4679_v45 = vunpack.i.h.bf16 %v4677_v4  ;;  %v4678_v9 = vunpack.i.l.bf16 %v4677_v4 }
 0x122   : > { %v712_v19 = vsel %vm708_vm5, %v4683_v3, %v4684_v2  ;;  %v711_v20 = vsel %vm708_vm5, %v4609_v56, %v4683_v3  ;;  %v4624_v56 = vunpack.i.h.bf16 %v5646_v52  ;;  %v4349_v52 = vpack.c.bf16 %v5436_v12, %v5468_v18 }
 0x123   : > { %4332 = vmatpush1.bf16.msra.mxu0 %v4331_v10  ;;  %v4687_v21 = vpop.permute.xlu1 %4686  ;;  %v710_v22 = vsel %vm708_vm5, %v4678_v9, %v4679_v45  ;;  %v709_v23 = vsel %vm708_vm5, %v4608_v7, %v4678_v9  ;;  %v4629_v12 = vunpack.i.h.bf16 %v5652_v55 }
 0x124   : > { %v4689_v24 = vunpack.i.h.bf16 %v4687_v21  ;;  %v4688_v25 = vunpack.i.l.bf16 %v4687_v21  ;;  %v4692_v26 = vpop.permute.xlu0 %4691  ;;  %v4333_v27 = vpack.c.bf16 %v712_v19, %v710_v22  ;;  %v4335_v51 = vpack.c.bf16 %v711_v20, %v709_v23 }
 0x125   : > { %v4694_v29 = vunpack.i.h.bf16 %v4692_v26  ;;  %v4693_v30 = vunpack.i.l.bf16 %v4692_v26  ;;  %v4351_v22 = vpack.c.bf16 %v5433_v11, %v5465_v17  ;;  %v4355_v26 = vpack.c.bf16 %v5449_v15, %v5441_v13 }
 0x126   : > { %4334 = vmatprep.subr.bf16.mxu0 %v4333_v27  ;;  %v714_v32 = vsel %vm708_vm5, %v4688_v25, %v4689_v24  ;;  %v713_v34 = vsel %vm708_vm5, %v4613_v8, %v4688_v25  ;;  %v4353_v24 = vpack.c.bf16 %v5452_v16, %v5444_v14  ;;  %v4633_v14 = vunpack.i.l.bf16 %v5650_v54 }
 0x127   : > { %4336 = vmatpush1.bf16.msra.mxu0 %v4335_v51  ;;  %v4702_v36 = vpop.permute.xlu1 %4701  ;;  %v716_v61 = vsel %vm708_vm5, %v4693_v30, %v4694_v29  ;;  %v715_v0 = vsel %vm708_vm5, %v4614_v28, %v4693_v30  ;;  %v4628_v28 = vunpack.i.l.bf16 %v5652_v55 }
 0x128   : > { %v4704_v37 = vunpack.i.h.bf16 %v4702_v36  ;;  %v4703_v39 = vunpack.i.l.bf16 %v4702_v36  ;;  %v4697_v40 = vpop.permute.xlu0 %4696  ;;  %v4337_v42 = vpack.c.bf16 %v716_v61, %v714_v32  ;;  %v4339_v50 = vpack.c.bf16 %v715_v0, %v713_v34 }
 0x129   : > { %v4699_v44 = vunpack.i.h.bf16 %v4697_v40  ;;  %v4698_v31 = vunpack.i.l.bf16 %v4697_v40  ;;  %v4634_v61 = vunpack.i.h.bf16 %v5650_v54  ;;  %v4659_v0 = vunpack.i.h.bf16 %v5676_v41 }
 0x12a   : > { %4338 = vmatprep.subr.bf16.mxu0 %v4337_v42  ;;  %v806_v48 = vsel %vm802_vm4, %v4703_v39, %v4704_v37  ;;  %v805_v49 = vsel %vm802_vm4, %v4619_v35, %v4703_v39  ;;  %v4674_v40 = vunpack.i.h.bf16 %v5682_v33  ;;  %v4673_v42 = vunpack.i.l.bf16 %v5682_v33 }
 0x12b   : > { %4340 = vmatpush1.bf16.msra.mxu0 %v4339_v50  ;;  %v4707_v57 = vpop.permute.xlu1 %4706  ;;  %v804_v58 = vsel %vm802_vm4, %v4698_v31, %v4699_v44  ;;  %v803_v60 = vsel %vm802_vm4, %v4618_v43, %v4698_v31  ;;  %v4669_v44 = vunpack.i.h.bf16 %v5686_v59  ;;  %v4668_v31 = vunpack.i.l.bf16 %v5686_v59 }
 0x12c   : > { %v4709_v62 = vunpack.i.h.bf16 %v4707_v57  ;;  %v4708_v46 = vunpack.i.l.bf16 %v4707_v57  ;;  %v4712_v63 = vpop.permute.xlu0 %4711  ;;  %v4341_v1 = vpack.c.bf16 %v806_v48, %v804_v58  ;;  %v4343_v53 = vpack.c.bf16 %v805_v49, %v803_v60 }
 0x12d   : > { %v4714_v2 = vunpack.i.h.bf16 %v4712_v63  ;;  %v4713_v3 = vunpack.i.l.bf16 %v4712_v63  ;;  %v4658_v63 = vunpack.i.l.bf16 %v5676_v41 }
 0x12e   : > { %4342 = vmatprep.subr.bf16.mxu0 %v4341_v1  ;;  %v808_v4 = vsel %vm802_vm4, %v4708_v46, %v4709_v62  ;;  %v807_v7 = vsel %vm802_vm4, %v4623_v47, %v4708_v46  ;;  %v4664_v46 = vunpack.i.h.bf16 %v5672_v38 }
 0x12f   : > { %4344 = vmatpush1.bf16.msra.mxu0 %v4343_v53  ;;  %v5712_v45 = vpop.permute.xlu1 %4721  ;;  %v810_v9 = vsel %vm802_vm4, %v4713_v3, %v4714_v2  ;;  %v809_v10 = vsel %vm802_vm4, %v4624_v56, %v4713_v3  ;;  %v4663_v56 = vunpack.i.l.bf16 %v5672_v38  ;;  %v1079_v3 = vsel %vm1075_vm7, %v4673_v42, %v4674_v40 }
 0x130   : > { %v5716_v19 = vpop.permute.xlu0 %4716  ;;  %v4345_v20 = vpack.c.bf16 %v810_v9, %v808_v4  ;;  %v4347_v8 = vpack.c.bf16 %v809_v10, %v807_v7  ;;  %v4724_v4 = vunpack.i.h.bf16 %v5712_v45  ;;  %v1077_v10 = vsel %vm1075_vm7, %v4668_v31, %v4669_v44 }
 0x132   : > { %4346 = vmatprep.subr.bf16.mxu0 %v4345_v20 }
 0x133   : > { %4348 = vmatpush1.bf16.msra.mxu0 %v4347_v8  ;;  %v5720_v21 = vpop.permute.xlu1 %4731 }
 0x134   : > { %v5724_v23 = vpop.permute.xlu0 %4726  ;;  %4350 = vmatprep.subr.bf16.mxu0 %v4349_v52 }
 0x137   : > { %4352 = vmatpush1.bf16.msra.mxu0 %v4351_v22  ;;  %v4742_v25 = vpop.permute.xlu1 %4741 }
 0x138   : > { %v4744_v18 = vunpack.i.h.bf16 %v4742_v25  ;;  %v4743_v27 = vunpack.i.l.bf16 %v4742_v25  ;;  %v4737_v51 = vpop.permute.xlu0 %4736  ;;  %4354 = vmatprep.subr.bf16.mxu0 %v4353_v24  ;;  %v4719_v24 = vunpack.i.h.bf16 %v5716_v19  ;;  %v4718_v25 = vunpack.i.l.bf16 %v5716_v19 }
 0x139   : > { %v4739_v11 = vunpack.i.h.bf16 %v4737_v51  ;;  %v4738_v17 = vunpack.i.l.bf16 %v4737_v51 }
 0x13a   : > { %v914_v29 = vsel %vm749_vm3, %v4743_v27, %v4744_v18  ;;  %v913_v30 = vsel %vm749_vm3, %v4629_v12, %v4743_v27  ;;  %v4734_v18 = vunpack.i.h.bf16 %v5720_v21  ;;  %v4733_v27 = vunpack.i.l.bf16 %v5720_v21 }
 0x13b   : > { %4356 = vmatpush1.bf16.msra.mxu0 %v4355_v26  ;;  %v4747_v16 = vpop.permute.xlu1 %4746  ;;  %v912_v13 = vsel %vm749_vm3, %v4738_v17, %v4739_v11  ;;  %v911_v15 = vsel %vm749_vm3, %v4628_v28, %v4738_v17  ;;  %v4729_v11 = vunpack.i.h.bf16 %v5724_v23  ;;  %v4728_v17 = vunpack.i.l.bf16 %v5724_v23 }
 0x13c   : > { %v4749_v32 = vunpack.i.h.bf16 %v4747_v16  ;;  %v4748_v34 = vunpack.i.l.bf16 %v4747_v16  ;;  %v4752_v35 = vpop.permute.xlu0 %4751  ;;  %v4357_v36 = vpack.c.bf16 %v914_v29, %v912_v13  ;;  %v4359_v55 = vpack.c.bf16 %v913_v30, %v911_v15 }
 0x13d   : > { %v4754_v37 = vunpack.i.h.bf16 %v4752_v35  ;;  %v4753_v39 = vunpack.i.l.bf16 %v4752_v35  ;;  %v1076_v23 = vsel %vm1075_vm7, %v4718_v25, %v4668_v31  ;;  %v1081_v40 = vsel %vm1075_vm7, %v4728_v17, %v4729_v11 }
 0x13e   : > { %4358 = vmatprep.subr.bf16.mxu0 %v4357_v36  ;;  %v916_v50 = vsel %vm749_vm3, %v4748_v34, %v4749_v32  ;;  %v915_v43 = vsel %vm749_vm3, %v4633_v14, %v4748_v34  ;;  %v4723_v32 = vunpack.i.l.bf16 %v5712_v45  ;;  %v4373_v36 = vpack.c.bf16 %v1079_v3, %v1077_v10  ;;  %v1192_v10 = vld [vmem:[%s7728_s2] sm:$0xff] }
 0x13f   : > { %4360 = vmatpush1.bf16.msra.mxu0 %v4359_v55  ;;  %v4762_v48 = vpop.permute.xlu1 %4761  ;;  %v918_v54 = vsel %vm749_vm3, %v4753_v39, %v4754_v37  ;;  %v917_v49 = vsel %vm749_vm3, %v4634_v61, %v4753_v39  ;;  %v1078_v61 = vsel %vm1075_vm7, %v4719_v24, %v4673_v42 }
 0x140   : > { %v4764_v47 = vunpack.i.h.bf16 %v4762_v48  ;;  %v4763_v57 = vunpack.i.l.bf16 %v4762_v48  ;;  %v4757_v58 = vpop.permute.xlu0 %4756  ;;  %v4361_v60 = vpack.c.bf16 %v918_v54, %v916_v50  ;;  %v4363_v62 = vpack.c.bf16 %v917_v49, %v915_v43 }
 0x141   : > { %v4759_v1 = vunpack.i.h.bf16 %v4757_v58  ;;  %v4758_v53 = vunpack.i.l.bf16 %v4757_v58  ;;  %v1083_v50 = vsel %vm1075_vm7, %v4733_v27, %v4734_v18  ;;  %v4375_v49 = vpack.c.bf16 %v1078_v61, %v1076_v23 }
 0x142   : > { %4362 = vmatprep.subr.bf16.mxu0 %v4361_v60  ;;  %v1006_v59 = vsel %vm655_vm2, %v4763_v57, %v4764_v47  ;;  %v1005_v2 = vsel %vm655_vm2, %v4659_v0, %v4763_v57  ;;  %v4377_v47 = vpack.c.bf16 %v1083_v50, %v1081_v40  ;;  %v441_v40 = vld [vmem:[%s7729_s3 + $0x8] sm:$0xff] }
 0x143   : > { %4364 = vmatpush1.bf16.msra.mxu0 %v4363_v62  ;;  %v4767_v7 = vpop.permute.xlu1 %4766  ;;  %v1004_v9 = vsel %vm655_vm2, %v4758_v53, %v4759_v1  ;;  %v1003_v41 = vsel %vm655_vm2, %v4658_v63, %v4758_v53 }
 0x144   : > { %v4769_v38 = vunpack.i.h.bf16 %v4767_v7  ;;  %v4768_v20 = vunpack.i.l.bf16 %v4767_v7  ;;  %v4772_v8 = vpop.permute.xlu0 %4771  ;;  %v4365_v52 = vpack.c.bf16 %v1006_v59, %v1004_v9  ;;  %v4367_v22 = vpack.c.bf16 %v1005_v2, %v1003_v41  ;;  %v1194_v41 = vld [vmem:[%s7728_s2 + $0x10] sm:$0xff] }
 0x145   : > { %v4774_v26 = vunpack.i.h.bf16 %v4772_v8  ;;  %v4773_v12 = vunpack.i.l.bf16 %v4772_v8 }
 0x146   : > { %4366 = vmatprep.subr.bf16.mxu0 %v4365_v52  ;;  %v1008_v51 = vsel %vm655_vm2, %v4768_v20, %v4769_v38  ;;  %v1007_v28 = vsel %vm655_vm2, %v4663_v56, %v4768_v20  ;;  %v5792_v38 = vld [vmem:[#allocation2] sm:$0xff] }
 0x147   : > { %4368 = vmatpush1.bf16.msra.mxu0 %v4367_v22  ;;  %v4782_v29 = vpop.permute.xlu1 %4781  ;;  %v1010_v30 = vsel %vm655_vm2, %v4773_v12, %v4774_v26  ;;  %v1009_v19 = vsel %vm655_vm2, %v4664_v46, %v4773_v12 }
 0x148   : > { %v4784_v14 = vunpack.i.h.bf16 %v4782_v29  ;;  %v4783_v16 = vunpack.i.l.bf16 %v4782_v29  ;;  %v4777_v13 = vpop.permute.xlu0 %4776  ;;  %v4369_v15 = vpack.c.bf16 %v1010_v30, %v1008_v51  ;;  %v4371_v21 = vpack.c.bf16 %v1009_v19, %v1007_v28 }
 0x149   : > { %v4779_v34 = vunpack.i.h.bf16 %v4777_v13  ;;  %v4778_v35 = vunpack.i.l.bf16 %v4777_v13 }
 0x14a   : > { %4370 = vmatprep.subr.bf16.mxu0 %v4369_v15  ;;  %v1171_v55 = vsel %vm480_vm1, %v4783_v16, %v4784_v14  ;;  %v1170_v0 = vsel %vm480_vm1, %v4724_v4, %v4783_v16 }
 0x14b   : > { %4372 = vmatpush1.bf16.msra.mxu0 %v4371_v21  ;;  %v4797_v37 = vpop.permute.xlu1 %4796  ;;  %v1169_v39 = vsel %vm480_vm1, %v4778_v35, %v4779_v34  ;;  %v1168_v45 = vsel %vm480_vm1, %v4723_v32, %v4778_v35  ;;  %v1464_v35 = vld [vmem:[%s7732_s6 + $0x8] sm:$0xff] }
 0x14c   : > { %v4799_v43 = vunpack.i.h.bf16 %v4797_v37  ;;  %v4798_v44 = vunpack.i.l.bf16 %v4797_v37  ;;  %v4787_v48 = vpop.permute.xlu0 %4786  ;;  %4374 = vmatprep.subr.bf16.mxu0 %v4373_v36  ;;  %v4381_v31 = vpack.c.bf16 %v1171_v55, %v1169_v39  ;;  %v4383_v33 = vpack.c.bf16 %v1170_v0, %v1168_v45  ;;  %v1465_v55 = vld [vmem:[%s7732_s6 + $0x10] sm:$0xff]  ;;  %v440_v45 = vld [vmem:[%s7729_s3] sm:$0xff] }
 0x14d   : > { %v4789_v54 = vunpack.i.h.bf16 %v4787_v48  ;;  %v4788_v42 = vunpack.i.l.bf16 %v4787_v48  ;;  %v5325_v36 = vmov 0   ;;  %v442_v48 = vld [vmem:[%s7730_s4] sm:$0xff] }
 0x14e   : > { %4382 = vmatprep.subr.bf16.mxu1 %v4381_v31  ;;  %v1175_v57 = vsel %vm480_vm1, %v4798_v44, %v4799_v43  ;;  %4805 = vset.pattern.permute.xlu0 %v5325_v36  ;;  %v443_v31 = vld [vmem:[%s7730_s4 + $0x8] sm:$0xff] }
 0x14f   : > { %4376 = vmatpush1.bf16.msra.mxu0 %v4375_v49  ;;  %4384 = vmatpush1.bf16.msra.mxu1 %v4383_v33  ;;  %v4802_v58 = vpop.permute.xlu1 %4801  ;;  %v1173_v60 = vsel %vm480_vm1, %v4788_v42, %v4789_v54 }
 0x150   : > { %v4804_v62 = vunpack.i.h.bf16 %v4802_v58  ;;  %v4803_v46 = vunpack.i.l.bf16 %v4802_v58  ;;  %v4792_v63 = vpop.permute.xlu0 %4791  ;;  %4378 = vmatprep.subr.bf16.mxu0 %v4377_v47  ;;  %v4385_v1 = vpack.c.bf16 %v1175_v57, %v1173_v60  ;;  %4806 = vset.pattern.permute.xlu1 %v5325_v36 }
 0x151   : > { %v4794_v53 = vunpack.i.h.bf16 %v4792_v63  ;;  %v4793_v56 = vunpack.i.l.bf16 %v4792_v63  ;;  %v1462_v63 = vld [vmem:[%s7731_s5 + $0x10] sm:$0xff] }
 0x152   : > { %4386 = vmatprep.subr.bf16.mxu1 %v4385_v1  ;;  %v1172_v59 = vsel %vm480_vm1, %v4803_v46, %v4788_v42  ;;  %v1174_v2 = vsel %vm480_vm1, %v4804_v62, %v4798_v44  ;;  %v1460_v62 = vld [vmem:[%s7731_s5] sm:$0xff]  ;;  %v1461_v46 = vld [vmem:[%s7731_s5 + $0x8] sm:$0xff] }
 0x153   : > { %v1080_v3 = vsel %vm1075_vm7, %v4793_v56, %v4728_v17  ;;  %v1082_v4 = vsel %vm1075_vm7, %v4794_v53, %v4733_v27  ;;  %v4387_v7 = vpack.c.bf16 %v1174_v2, %v1172_v59 }
 0x154   : > { %v4379_v9 = vpack.c.bf16 %v1082_v4, %v1080_v3 }
 0x155   : > { %4388 = vmatpush1.bf16.msra.mxu1 %v4387_v7 }
 0x156   : > { %4380 = vmatpush1.bf16.msra.mxu0 %v4379_v9 }
 0x158   : > { %4237 = vmatmul.mubr.msk.f32.vlgmr.msra.gmra.mrb[0].mxu1 %vm1267_vm8, %v1194_v41 }
 0x159   : > { %1336 = vmatmul.mubr.f32.vlgmr.msra.gmra.mrb[0].mxu0 %v1192_v10  ;;  %1619 = vmatprep.mubr.f32.mxu1 %v5792_v38 }
 0x15a   : > { %2918 = vmatprep.mubr.f32.mxu0 %v5792_v38 }
 0x22b   : > { %v1408_v20 = vpop.f32.mrb[0].mxu1 }
 0x22c   : > { %v1337_v8 = vpop.f32.mrb[0].mxu0  ;;  %v1410_v52 = vpop.f32.mrb[1].mxu1 }
 0x22d   : > { %v1409_v22 = vadd.f32 %v1408_v20, %v1337_v8  ;;  %v1339_v24 = vpop.f32.mrb[1].mxu0 }
 0x22e   : > { %v1411_v25 = vadd.f32 %v1410_v52, %v1339_v24 }
 0x22f   : > { %v1424_v26 = vmul.f32 %v1409_v22, %v1409_v22 }
 0x230   : > { %v1413_v12 = vadd.f32 %v1411_v25, %v1409_v22  ;;  %v1425_v18 = vmul.f32 %v1411_v25, %v1411_v25 }
 0x232   : > { %1414 = vadd.xlane.f32.xlu0 %v1413_v12  ;;  %v1426_v27 = vadd.f32 %v1425_v18, %v1424_v26 }
 0x234   : > { %1427 = vadd.xlane.f32.xlu1 %v1426_v27 }
 0x245   : > { %1542 = vperm.xlu1 %4806, %v1465_v55  }
 0x248   : > { %1537 = vperm.xlu0 %4805, %v1464_v35  }
 0x2bf   : > { %v1415_v51 = vpop.xlane.xlu0 %1414 }
 0x2c0   : > { %v1416_v28 = vrot.slane %v1415_v51, 4 }
 0x2c1   : > { %v1428_v11 = vpop.xlane.xlu1 %1427 }
 0x2c2   : > { %v1417_v17 = vadd.f32 %v1416_v28, %v1415_v51  ;;  %v1429_v29 = vrot.slane %v1428_v11, 4 }
 0x2c4   : > { %v1418_v30 = vrot.slane %v1417_v17, 2  ;;  %v1430_v19 = vadd.f32 %v1429_v29, %v1428_v11 }
 0x2c5   : > { %v5843_v7 = vpop.permute.xlu1 %1542 }
 0x2c6   : > { %v1419_v14 = vadd.f32 %v1418_v30, %v1417_v17  ;;  %v1431_v16 = vrot.slane %v1430_v19, 2  ;;  %7825 = vst [vmem:[#allocation12_spill] sm:$0xff] %v5843_v7 }
 0x2c7   : > { %v5839_v56 = vpop.permute.xlu0 %1537 }
 0x2c8   : > { %v1420_v13 = vrot.slane %v1419_v14, 1  ;;  %v1432_v15 = vadd.f32 %v1431_v16, %v1430_v19  ;;  %7824 = vst [vmem:[#allocation11_spill] sm:$0xff] %v5839_v56 }
 0x2ca   : > { %v1421_v21 = vadd.f32 %v1420_v13, %v1419_v14  ;;  %v1433_v32 = vrot.slane %v1432_v15, 1 }
 0x2cc   : > { %4535 = vpush %v1421_v21  ;;  %v1434_v34 = vadd.f32 %v1433_v32, %v1432_v15 }
 0x2ce   : > { %4537 = vpush %v1434_v34 }
 0x2fd   : > { %s4536_s26 = spop %4535 }
 0x2fe   : > { %s1423_s27 = smul.f32 0.00048828125, %s4536_s26  ;;  %s7951_s26 = smov 16  }
 0x2ff   : > { %s4538_s13 = spop %4537 }
 0x300   : > { %s1437_s28 = smul.f32 %s1423_s27, %s1423_s27  ;;  %v1439_v0 = vstv %s1423_s27 }
 0x301   : > { %s1436_s21 = smul.f32 0.00048828125, %s4538_s13  ;;  %v1440_v37 = vsub.f32 %v1409_v22, %v1439_v0  ;;  %v1441_v39 = vsub.f32 %v1411_v25, %v1439_v0 }
 0x303   : > { %s1438_s20 = ssub.f32 %s1436_s21, %s1437_s28  ;;  %s7948_s21 = smov 15  }
 0x305   : > { %s1442_s19 = sadd.f32 1e-05, %s1438_s20 }
 0x307   : > { %v1443_v23 = vstv %s1442_s19 }
 0x308   : > { %4842 = vrsqrt.f32 %v1443_v23 }
 0x312   : > { %v4843_v61 = vpop.eup %4842 }
 0x313   : > { %4539 = vpush %v4843_v61 }
 0x344   : > { %s4540_s14 = spop %4539 }
 0x345   : > { %v1446_v50 = vstv %s4540_s14  ;;  %s1459_s14 = sld [smem:[#allocation4]] }
 0x346   : > { %v1447_v43 = vmul.f32 %v1446_v50, %v1440_v37  ;;  %v1448_v44 = vmul.f32 %v1446_v50, %v1441_v39  ;;  %v1467_v50 = vld [vmem:[%s7733_s7 + $0x8] sm:$0xff] }
 0x348   : > { %v1449_v33 = vmul.f32 %v1447_v43, %v440_v45  ;;  %v1450_v54 = vmul.f32 %v1448_v44, %v441_v40  ;;  %v1466_v40 = vld [vmem:[%s7733_s7] sm:$0xff] }
 0x34a   : > { %v1451_v42 = vadd.f32 %v1449_v33, %v442_v48  ;;  %v1452_v49 = vadd.f32 %v1450_v54, %v443_v31  ;;  %v1469_v33 = vld [vmem:[%s7733_s7 + $0x18] sm:$0xff] }
 0x34c   : > { %vm1454_vm9 = vcmp.ge.f32.partialorder %v1452_v49, 0.0  ;;  %v1456_v47 = vmul.f32 0.3, %v1452_v49  ;;  %vm1453_vm10 = vcmp.ge.f32.partialorder %v1451_v42, 0.0  ;;  %v1455_v57 = vmul.f32 0.3, %v1451_v42 }
 0x34e   : > { %v5814_v58 = vsel %vm1454_vm9, %v1452_v49, %v1456_v47  ;;  %v5816_v60 = vsel %vm1453_vm10, %v1451_v42, %v1455_v57 }
 0x34f   : > { %7820 = vst [vmem:[#allocation7_spill] sm:$0xff] %v5814_v58  ;;  %7821 = vst [vmem:[#allocation8_spill] sm:$0xff] %v5816_v60  ;;  %1555 = vmatprep.subr.mxu1 %v5814_v58 }
 0x350   : > { %1556 = vmatpush1.msra.mxu1 %v5816_v60 }
 0x351   : > { %4238 = vmatmul.mubr.msk.f32.vlgmr.msra.gmra.mrb[2].mxu1 %vm1545_vm11, %v1460_v62  ;;  %v1470_v62 = vld [vmem:[%s7733_s7 + $0x20] sm:$0xff] }
 0x352   : > { %1625 = vmatprep.mubr.f32.mxu1 %v5792_v38 }
 0x355   : > { %4239 = vmatmul.mubr.msk.f32.gmra.mrb[4].mxu1 %vm1545_vm11, %v1461_v46  ;;  %v1471_v46 = vld [vmem:[%s7733_s7 + $0x28] sm:$0xff] }
 0x356   : > { %1631 = vmatprep.mubr.f32.mxu1 %v5792_v38 }
 0x359   : > { %4240 = vmatmul.mubr.msk.f32.gmra.mrb[6].mxu1 %vm1545_vm11, %v1462_v63 }
 0x35a   : > { %1862 = vmatprep.mubr.f32.mxu1 %v5792_v38 }
 0x424   : > { %v5835_v1 = vpop.f32.mrb[2].mxu1 }
 0x425   : > { %7822 = vst [vmem:[#allocation9_spill] sm:$0xff] %v5835_v1  ;;  %v5837_v53 = vpop.f32.mrb[3].mxu1 }
 0x426   : > { %7823 = vst [vmem:[#allocation10_spill] sm:$0xff] %v5837_v53 }
 0x428   : > { %v1627_v59 = vpop.f32.mrb[4].mxu1 }
 0x429   : > { %v1629_v2 = vpop.f32.mrb[5].mxu1  ;;  %v1628_v3 = vadd.f32 %v1627_v59, %v5839_v56 }
 0x42a   : > { %v1630_v4 = vadd.f32 %v1629_v2, %v5839_v56 }
 0x42b   : > { %1638 = vxpose.xlu1.b32.start.end [1/1] (short) %v1628_v3, 128 }
 0x42c   : > { %1670 = vxpose.xlu0.b32.start.end [1/1] (short) %v1630_v4, 128  ;;  %v1633_v9 = vpop.f32.mrb[6].mxu1 }
 0x42d   : > { %v1635_v41 = vpop.f32.mrb[7].mxu1  ;;  %v1634_v10 = vadd.f32 %v1633_v9, %v5843_v7  ;;  %v1472_v9 = vld [vmem:[%s7733_s7 + $0x30] sm:$0xff] }
 0x42e   : > { %v1636_v20 = vadd.f32 %v1635_v41, %v5843_v7  ;;  %v1473_v41 = vld [vmem:[%s7733_s7 + $0x38] sm:$0xff] }
 0x430   : > { %1798 = vmatprep.subr.mxu1 %v1636_v20 }
 0x431   : > { %1799 = vmatpush1.msra.mxu1 %v1634_v10 }
 0x4ab   : > { %v1654_v8 = vpop.trf.xlu1 }
 0x4ac   : > { %4241 = vmatmul.mubr.msk.f32.vlgmr.msra.gmra.mrb[8].mxu1 %vm1545_vm11, %v1654_v8  ;;  %v1686_v51 = vpop.trf.xlu0 }
 0x4ad   : > { %1868 = vmatprep.mubr.f32.mxu1 %v5792_v38 }
 0x4af   : > { %v1655_v52 = vpop.trf.xlu1 }
 0x4b0   : > { %4242 = vmatmul.mubr.msk.f32.gmra.mrb[10].mxu1 %vm1545_vm11, %v1655_v52  ;;  %v1687_v17 = vpop.trf.xlu0 }
 0x4b1   : > { %1874 = vmatprep.mubr.f32.mxu1 %v5792_v38 }
 0x4b3   : > { %v1656_v22 = vpop.trf.xlu1 }
 0x4b4   : > { %4243 = vmatmul.mubr.msk.f32.gmra.mrb[12].mxu1 %vm1545_vm11, %v1656_v22  ;;  %v1688_v30 = vpop.trf.xlu0 }
 0x4b5   : > { %1880 = vmatprep.mubr.f32.mxu1 %v5792_v38 }
 0x4b7   : > { %v1657_v24 = vpop.trf.xlu1 }
 0x4b8   : > { %4244 = vmatmul.mubr.msk.f32.gmra.mrb[14].mxu1 %vm1545_vm11, %v1657_v24  ;;  %v1689_v16 = vpop.trf.xlu0  ;;  %v1474_v24 = vld [vmem:[%s7733_s7 + $0x40] sm:$0xff] }
 0x4b9   : > { %1886 = vmatprep.mubr.f32.mxu1 %v5792_v38 }
 0x4bb   : > { %v1658_v25 = vpop.trf.xlu1 }
 0x4bc   : > { %4245 = vmatmul.mubr.msk.f32.gmra.mrb[16].mxu1 %vm1545_vm11, %v1658_v25  ;;  %v1690_v15 = vpop.trf.xlu0  ;;  %v1475_v25 = vld [vmem:[%s7733_s7 + $0x48] sm:$0xff] }
 0x4bd   : > { %1892 = vmatprep.mubr.f32.mxu1 %v5792_v38 }
 0x4bf   : > { %v1659_v26 = vpop.trf.xlu1 }
 0x4c0   : > { %4246 = vmatmul.mubr.msk.f32.gmra.mrb[18].mxu1 %vm1545_vm11, %v1659_v26  ;;  %v1691_v32 = vpop.trf.xlu0 }
 0x4c1   : > { %1898 = vmatprep.mubr.f32.mxu1 %v5792_v38 }
 0x4c3   : > { %v1660_v12 = vpop.trf.xlu1 }
 0x4c4   : > { %4247 = vmatmul.mubr.msk.f32.gmra.mrb[20].mxu1 %vm1545_vm11, %v1660_v12  ;;  %v1692_v34 = vpop.trf.xlu0 }
 0x4c5   : > { %1904 = vmatprep.mubr.f32.mxu1 %v5792_v38 }
 0x4c7   : > { %v1661_v18 = vpop.trf.xlu1 }
 0x4c8   : > { %4248 = vmatmul.mubr.msk.f32.gmra.mrb[22].mxu1 %vm1545_vm11, %v1661_v18  ;;  %v1693_v35 = vpop.trf.xlu0 }
 0x4c9   : > { %1910 = vmatprep.mubr.f32.mxu1 %v5792_v38 }
 0x4cb   : > { %v1662_v27 = vpop.trf.xlu1 }
 0x4cc   : > { %4249 = vmatmul.mubr.msk.f32.gmra.mrb[24].mxu1 %vm1545_vm11, %v1662_v27  ;;  %v1694_v36 = vpop.trf.xlu0 }
 0x4cd   : > { %1916 = vmatprep.mubr.f32.mxu1 %v5792_v38 }
 0x4cf   : > { %v1663_v28 = vpop.trf.xlu1 }
 0x4d0   : > { %4250 = vmatmul.mubr.msk.f32.gmra.mrb[26].mxu1 %vm1545_vm11, %v1663_v28  ;;  %v1695_v55 = vpop.trf.xlu0  ;;  %v1476_v28 = vld [vmem:[%s7733_s7 + $0x50] sm:$0xff] }
 0x4d1   : > { %1922 = vmatprep.mubr.f32.mxu1 %v5792_v38 }
 0x4d3   : > { %v1664_v11 = vpop.trf.xlu1 }
 0x4d4   : > { %4251 = vmatmul.mubr.msk.f32.gmra.mrb[28].mxu1 %vm1545_vm11, %v1664_v11  ;;  %v1696_v23 = vpop.trf.xlu0  ;;  %v1477_v11 = vld [vmem:[%s7733_s7 + $0x58] sm:$0xff] }
 0x4d5   : > { %1928 = vmatprep.mubr.f32.mxu1 %v5792_v38 }
 0x4d7   : > { %v1665_v29 = vpop.trf.xlu1 }
 0x4d8   : > { %4252 = vmatmul.mubr.msk.f32.gmra.mrb[30].mxu1 %vm1545_vm11, %v1665_v29  ;;  %v1697_v61 = vpop.trf.xlu0 }
 0x4d9   : > { %1934 = vmatprep.mubr.f32.mxu1 %v5792_v38 }
 0x4db   : > { %v1666_v19 = vpop.trf.xlu1 }
 0x4dc   : > { %4253 = vmatmul.mubr.msk.f32.gmra.mrb[32].mxu1 %vm1545_vm11, %v1666_v19  ;;  %v1698_v0 = vpop.trf.xlu0 }
 0x4dd   : > { %1940 = vmatprep.mubr.f32.mxu1 %v5792_v38 }
 0x4df   : > { %v1667_v14 = vpop.trf.xlu1 }
 0x4e0   : > { %4254 = vmatmul.mubr.msk.f32.gmra.mrb[34].mxu1 %vm1545_vm11, %v1667_v14  ;;  %v1699_v37 = vpop.trf.xlu0 }
 0x4e1   : > { %1946 = vmatprep.mubr.f32.mxu1 %v5792_v38 }
 0x4e3   : > { %v1668_v13 = vpop.trf.xlu1 }
 0x4e4   : > { %4255 = vmatmul.mubr.msk.f32.gmra.mrb[36].mxu1 %vm1545_vm11, %v1668_v13  ;;  %v1700_v39 = vpop.trf.xlu0  ;;  %v1479_v13 = vld [vmem:[%s7733_s7 + $0x68] sm:$0xff] }
 0x4e5   : > { %1952 = vmatprep.mubr.f32.mxu1 %v5792_v38 }
 0x4e7   : > { %v1669_v21 = vpop.trf.xlu1 }
 0x4e8   : > { %4256 = vmatmul.mubr.msk.f32.gmra.mrb[38].mxu1 %vm1545_vm11, %v1669_v21  ;;  %v1701_v45 = vpop.trf.xlu0 }
 0x4e9   : > { %1958 = vmatprep.mubr.f32.mxu1 %v5792_v38 }
 0x4ec   : > { %4257 = vmatmul.mubr.msk.f32.gmra.mrb[40].mxu1 %vm1545_vm11, %v1686_v51 }
 0x4ed   : > { %1964 = vmatprep.mubr.f32.mxu1 %v5792_v38 }
 0x4f0   : > { %4258 = vmatmul.mubr.msk.f32.gmra.mrb[42].mxu1 %vm1545_vm11, %v1687_v17 }
 0x4f1   : > { %1970 = vmatprep.mubr.f32.mxu1 %v5792_v38 }
 0x4f4   : > { %4259 = vmatmul.mubr.msk.f32.gmra.mrb[44].mxu1 %vm1545_vm11, %v1688_v30 }
 0x4f5   : > { %1976 = vmatprep.mubr.f32.mxu1 %v5792_v38 }
 0x4f8   : > { %4260 = vmatmul.mubr.msk.f32.gmra.mrb[46].mxu1 %vm1545_vm11, %v1689_v16  ;;  %v1478_v16 = vld [vmem:[%s7733_s7 + $0x60] sm:$0xff] }
 0x4f9   : > { %1982 = vmatprep.mubr.f32.mxu1 %v5792_v38 }
 0x4fc   : > { %4261 = vmatmul.mubr.msk.f32.gmra.mrb[48].mxu1 %vm1545_vm11, %v1690_v15 }
 0x4fd   : > { %1988 = vmatprep.mubr.f32.mxu1 %v5792_v38 }
 0x500   : > { %4262 = vmatmul.mubr.msk.f32.gmra.mrb[50].mxu1 %vm1545_vm11, %v1691_v32 }
 0x501   : > { %1994 = vmatprep.mubr.f32.mxu1 %v5792_v38 }
 0x504   : > { %4263 = vmatmul.mubr.msk.f32.gmra.mrb[52].mxu1 %vm1545_vm11, %v1692_v34 }
 0x505   : > { %2000 = vmatprep.mubr.f32.mxu1 %v5792_v38 }
 0x508   : > { %4264 = vmatmul.mubr.msk.f32.gmra.mrb[54].mxu1 %vm1545_vm11, %v1693_v35 }
 0x509   : > { %2006 = vmatprep.mubr.f32.mxu1 %v5792_v38 }
 0x50c   : > { %4265 = vmatmul.mubr.msk.f32.gmra.mrb[56].mxu1 %vm1545_vm11, %v1694_v36  ;;  %v1480_v36 = vld [vmem:[%s7733_s7 + $0x70] sm:$0xff] }
 0x50d   : > { %2012 = vmatprep.mubr.f32.mxu1 %v5792_v38 }
 0x510   : > { %4266 = vmatmul.mubr.msk.f32.gmra.mrb[58].mxu1 %vm1545_vm11, %v1695_v55  ;;  %v1481_v55 = vld [vmem:[%s7733_s7 + $0x78] sm:$0xff] }
 0x511   : > { %2018 = vmatprep.mubr.f32.mxu1 %v5792_v38 }
 0x514   : > { %4267 = vmatmul.mubr.msk.f32.gmra.mrb[60].mxu1 %vm1545_vm11, %v1696_v23 }
 0x515   : > { %2024 = vmatprep.mubr.f32.mxu1 %v5792_v38 }
 0x518   : > { %4268 = vmatmul.mubr.msk.f32.gmra.mrb[62].mxu1 %vm1545_vm11, %v1697_v61 }
 0x519   : > { %2030 = vmatprep.mubr.f32.mxu1 %v5792_v38 }
 0x51c   : > { %4269 = vmatmul.mubr.msk.f32.gmra.mrb[64].mxu1 %vm1545_vm11, %v1698_v0 }
 0x51d   : > { %2036 = vmatprep.mubr.f32.mxu1 %v5792_v38 }
 0x520   : > { %4270 = vmatmul.mubr.msk.f32.gmra.mrb[66].mxu1 %vm1545_vm11, %v1699_v37 }
 0x521   : > { %2042 = vmatprep.mubr.f32.mxu1 %v5792_v38 }
 0x524   : > { %4271 = vmatmul.mubr.msk.f32.gmra.mrb[68].mxu1 %vm1545_vm11, %v1700_v39 }
 0x525   : > { %2048 = vmatprep.mubr.f32.mxu1 %v5792_v38  ;;  %v1468_v38 = vld [vmem:[%s7733_s7 + $0x10] sm:$0xff] }
 0x528   : > { %4272 = vmatmul.mubr.msk.f32.gmra.mrb[70].mxu1 %vm1545_vm11, %v1701_v45  ;;  %v1482_v45 = vld [vmem:[%s7733_s7 + $0x80] sm:$0xff] }
 0x57f   : > { %v1864_v43 = vpop.f32.mrb[8].mxu1 }
 0x580   : > { %v5916_v44 = vadd.f32 %v1864_v43, %v1466_v40  ;;  %v1866_v48 = vpop.f32.mrb[9].mxu1  ;;  %v1483_v40 = vld [vmem:[%s7733_s7 + $0x88] sm:$0xff] }
 0x581   : > { %v5918_v31 = vadd.f32 %v1866_v48, %v1467_v50 }
 0x583   : > { %v1870_v54 = vpop.f32.mrb[10].mxu1  ;;  %v2055_v42 = vmax.f32 %v5916_v44, %v5918_v31 }
 0x584   : > { %v5928_v49 = vadd.f32 %v1870_v54, %v1468_v38  ;;  %v1872_v47 = vpop.f32.mrb[11].mxu1  ;;  %v1484_v54 = vld [vmem:[%s7733_s7 + $0x90] sm:$0xff] }
 0x585   : > { %v5930_v57 = vadd.f32 %v1872_v47, %v1469_v33  ;;  %2056 = vmax.xlane.f32.xlu1 %v2055_v42  ;;  %v1485_v42 = vld [vmem:[%s7733_s7 + $0x98] sm:$0xff] }
 0x587   : > { %v1876_v63 = vpop.f32.mrb[12].mxu1  ;;  %v2058_v59 = vmax.f32 %v5928_v49, %v5930_v57 }
 0x588   : > { %v5940_v2 = vadd.f32 %v1876_v63, %v1470_v62  ;;  %v1878_v3 = vpop.f32.mrb[13].mxu1 }
 0x589   : > { %v5942_v4 = vadd.f32 %v1878_v3, %v1471_v46  ;;  %2059 = vmax.xlane.f32.xlu0 %v2058_v59  ;;  %v1486_v3 = vld [vmem:[%s7733_s7 + $0xa0] sm:$0xff] }
 0x58b   : > { %v2061_v10 = vmax.f32 %v5940_v2, %v5942_v4  ;;  %v1882_v20 = vpop.f32.mrb[14].mxu1 }
 0x58c   : > { %v5952_v8 = vadd.f32 %v1882_v20, %v1472_v9  ;;  %v1884_v52 = vpop.f32.mrb[15].mxu1  ;;  %v1487_v9 = vld [vmem:[%s7733_s7 + $0xa8] sm:$0xff] }
 0x58d   : > { %v5954_v22 = vadd.f32 %v1884_v52, %v1473_v41  ;;  %2062 = vmax.xlane.f32.xlu1 %v2061_v10 }
 0x58f   : > { %v2064_v26 = vmax.f32 %v5952_v8, %v5954_v22  ;;  %v1888_v12 = vpop.f32.mrb[16].mxu1 }
 0x590   : > { %v5964_v18 = vadd.f32 %v1888_v12, %v1474_v24  ;;  %v1890_v27 = vpop.f32.mrb[17].mxu1 }
 0x591   : > { %v5966_v51 = vadd.f32 %v1890_v27, %v1475_v25  ;;  %2065 = vmax.xlane.f32.xlu1 %v2064_v26  ;;  %v1488_v25 = vld [vmem:[%s7733_s7 + $0xb0] sm:$0xff]  ;;  %v1489_v26 = vld [vmem:[%s7733_s7 + $0xb8] sm:$0xff] }
 0x593   : > { %v2067_v17 = vmax.f32 %v5964_v18, %v5966_v51  ;;  %v1894_v29 = vpop.f32.mrb[18].mxu1 }
 0x594   : > { %v5976_v30 = vadd.f32 %v1894_v29, %v1476_v28  ;;  %v1896_v19 = vpop.f32.mrb[19].mxu1  ;;  %v1490_v29 = vld [vmem:[%s7733_s7 + $0xc0] sm:$0xff] }
 0x595   : > { %v5978_v14 = vadd.f32 %v1896_v19, %v1477_v11  ;;  %2068 = vmax.xlane.f32.xlu1 %v2067_v17  ;;  %v1491_v19 = vld [vmem:[%s7733_s7 + $0xc8] sm:$0xff] }
 0x597   : > { %v2070_v15 = vmax.f32 %v5976_v30, %v5978_v14  ;;  %v1900_v21 = vpop.f32.mrb[20].mxu1 }
 0x598   : > { %v5988_v32 = vadd.f32 %v1900_v21, %v1478_v16  ;;  %v1902_v34 = vpop.f32.mrb[21].mxu1 }
 0x599   : > { %v5990_v35 = vadd.f32 %v1902_v34, %v1479_v13  ;;  %2071 = vmax.xlane.f32.xlu1 %v2070_v15 }
 0x59b   : > { %v2073_v23 = vmax.f32 %v5988_v32, %v5990_v35  ;;  %v1906_v61 = vpop.f32.mrb[22].mxu1 }
 0x59c   : > { %v6000_v0 = vadd.f32 %v1906_v61, %v1480_v36  ;;  %v1908_v37 = vpop.f32.mrb[23].mxu1  ;;  %v1492_v36 = vld [vmem:[%s7733_s7 + $0xd0] sm:$0xff] }
 0x59d   : > { %v6002_v39 = vadd.f32 %v1908_v37, %v1481_v55  ;;  %2074 = vmax.xlane.f32.xlu1 %v2073_v23  ;;  %v1493_v55 = vld [vmem:[%s7733_s7 + $0xd8] sm:$0xff] }
 0x59f   : > { %v2076_v50 = vmax.f32 %v6000_v0, %v6002_v39  ;;  %v1912_v43 = vpop.f32.mrb[24].mxu1 }
 0x5a0   : > { %v6012_v48 = vadd.f32 %v1912_v43, %v1482_v45  ;;  %v1914_v38 = vpop.f32.mrb[25].mxu1  ;;  %v1495_v43 = vld [vmem:[%s7733_s7 + $0xe8] sm:$0xff] }
 0x5a1   : > { %v6014_v33 = vadd.f32 %v1914_v38, %v1483_v40  ;;  %2077 = vmax.xlane.f32.xlu0 %v2076_v50  ;;  %v1494_v50 = vld [vmem:[%s7733_s7 + $0xe0] sm:$0xff] }
 0x5a3   : > { %v2079_v47 = vmax.f32 %v6012_v48, %v6014_v33  ;;  %v1918_v62 = vpop.f32.mrb[26].mxu1 }
 0x5a4   : > { %v6024_v46 = vadd.f32 %v1918_v62, %v1484_v54  ;;  %v1920_v63 = vpop.f32.mrb[27].mxu1 }
 0x5a5   : > { %v6026_v59 = vadd.f32 %v1920_v63, %v1485_v42  ;;  %2080 = vmax.xlane.f32.xlu1 %v2079_v47  ;;  %v1496_v63 = vld [vmem:[%s7733_s7 + $0xf0] sm:$0xff] }
 0x5a7   : > { %v2082_v41 = vmax.f32 %v6024_v46, %v6026_v59  ;;  %v1924_v10 = vpop.f32.mrb[28].mxu1 }
 0x5a8   : > { %v6036_v20 = vadd.f32 %v1924_v10, %v1486_v3  ;;  %v1926_v52 = vpop.f32.mrb[29].mxu1  ;;  %v1497_v3 = vld [vmem:[%s7733_s7 + $0xf8] sm:$0xff] }
 0x5a9   : > { %v6038_v24 = vadd.f32 %v1926_v52, %v1487_v9  ;;  %2083 = vmax.xlane.f32.xlu0 %v2082_v41 }
 0x5ab   : > { %v2085_v12 = vmax.f32 %v6036_v20, %v6038_v24  ;;  %v1930_v27 = vpop.f32.mrb[30].mxu1 }
 0x5ac   : > { %v6048_v28 = vadd.f32 %v1930_v27, %v1488_v25  ;;  %v1932_v11 = vpop.f32.mrb[31].mxu1 }
 0x5ad   : > { %v6050_v17 = vadd.f32 %v1932_v11, %v1489_v26  ;;  %2086 = vmax.xlane.f32.xlu1 %v2085_v12  ;;  %v1498_v26 = vld [vmem:[%s7733_s7 + $0x100] sm:$0xff]  ;;  %v1499_v12 = vld [vmem:[%s7733_s7 + $0x108] sm:$0xff] }
 0x5af   : > { %v2088_v16 = vmax.f32 %v6048_v28, %v6050_v17  ;;  %v1936_v13 = vpop.f32.mrb[32].mxu1 }
 0x5b0   : > { %v6060_v15 = vadd.f32 %v1936_v13, %v1490_v29  ;;  %v1938_v21 = vpop.f32.mrb[33].mxu1  ;;  %v1500_v13 = vld [vmem:[%s7733_s7 + $0x110] sm:$0xff] }
 0x5b1   : > { %v6062_v34 = vadd.f32 %v1938_v21, %v1491_v19  ;;  %2089 = vmax.xlane.f32.xlu0 %v2088_v16  ;;  %v1501_v21 = vld [vmem:[%s7733_s7 + $0x118] sm:$0xff] }
 0x5b3   : > { %v2091_v23 = vmax.f32 %v6060_v15, %v6062_v34  ;;  %v1942_v61 = vpop.f32.mrb[34].mxu1 }
 0x5b4   : > { %v6072_v37 = vadd.f32 %v1942_v61, %v1492_v36  ;;  %v1944_v45 = vpop.f32.mrb[35].mxu1 }
 0x5b5   : > { %v6074_v40 = vadd.f32 %v1944_v45, %v1493_v55  ;;  %2092 = vmax.xlane.f32.xlu1 %v2091_v23 }
 0x5b7   : > { %v2094_v38 = vmax.f32 %v6072_v37, %v6074_v40  ;;  %v1948_v54 = vpop.f32.mrb[36].mxu1 }
 0x5b8   : > { %v6084_v42 = vadd.f32 %v1948_v54, %v1494_v50  ;;  %v1950_v47 = vpop.f32.mrb[37].mxu1  ;;  %v1502_v50 = vld [vmem:[%s7733_s7 + $0x120] sm:$0xff] }
 0x5b9   : > { %v6086_v62 = vadd.f32 %v1950_v47, %v1495_v43  ;;  %2095 = vmax.xlane.f32.xlu0 %v2094_v38  ;;  %v1503_v43 = vld [vmem:[%s7733_s7 + $0x128] sm:$0xff] }
 0x5bb   : > { %v2097_v9 = vmax.f32 %v6084_v42, %v6086_v62  ;;  %v1954_v41 = vpop.f32.mrb[38].mxu1 }
 0x5bc   : > { %v6096_v10 = vadd.f32 %v1954_v41, %v1496_v63  ;;  %v1956_v52 = vpop.f32.mrb[39].mxu1  ;;  %v1505_v41 = vld [vmem:[%s7733_s7 + $0x138] sm:$0xff] }
 0x5bd   : > { %v6098_v25 = vadd.f32 %v1956_v52, %v1497_v3  ;;  %2098 = vmax.xlane.f32.xlu1 %v2097_v9  ;;  %v1504_v9 = vld [vmem:[%s7733_s7 + $0x130] sm:$0xff] }
 0x5bf   : > { %v2100_v27 = vmax.f32 %v6096_v10, %v6098_v25  ;;  %v1960_v11 = vpop.f32.mrb[40].mxu1 }
 0x5c0   : > { %v6108_v29 = vadd.f32 %v1960_v11, %v1498_v26  ;;  %v1962_v19 = vpop.f32.mrb[41].mxu1 }
 0x5c1   : > { %v6110_v16 = vadd.f32 %v1962_v19, %v1499_v12  ;;  %2101 = vmax.xlane.f32.xlu0 %v2100_v27  ;;  %v1506_v19 = vld [vmem:[%s7733_s7 + $0x140] sm:$0xff] }
 0x5c3   : > { %v2103_v36 = vmax.f32 %v6108_v29, %v6110_v16  ;;  %v1966_v55 = vpop.f32.mrb[42].mxu1 }
 0x5c4   : > { %v6120_v23 = vadd.f32 %v1966_v55, %v1500_v13  ;;  %v1968_v61 = vpop.f32.mrb[43].mxu1  ;;  %v1507_v13 = vld [vmem:[%s7733_s7 + $0x148] sm:$0xff] }
 0x5c5   : > { %v6122_v45 = vadd.f32 %v1968_v61, %v1501_v21  ;;  %2104 = vmax.xlane.f32.xlu1 %v2103_v36 }
 0x5c7   : > { %7826 = vst [vmem:[#allocation13_spill] sm:$0xff] %v6122_v45  ;;  %v2106_v38 = vmax.f32 %v6120_v23, %v6122_v45  ;;  %v1972_v54 = vpop.f32.mrb[44].mxu1 }
 0x5c8   : > { %v6132_v47 = vadd.f32 %v1972_v54, %v1502_v50  ;;  %v1974_v63 = vpop.f32.mrb[45].mxu1 }
 0x5c9   : > { %v6134_v3 = vadd.f32 %v1974_v63, %v1503_v43  ;;  %2107 = vmax.xlane.f32.xlu0 %v2106_v38  ;;  %v1508_v43 = vld [vmem:[%s7733_s7 + $0x150] sm:$0xff]  ;;  %v1509_v38 = vld [vmem:[%s7733_s7 + $0x158] sm:$0xff] }
 0x5ca   : > { %7827 = vst [vmem:[#allocation14_spill] sm:$0xff] %v6132_v47 }
 0x5cb   : > { %7828 = vst [vmem:[#allocation15_spill] sm:$0xff] %v6134_v3  ;;  %v2109_v52 = vmax.f32 %v6132_v47, %v6134_v3  ;;  %v1978_v26 = vpop.f32.mrb[46].mxu1 }
 0x5cc   : > { %v6144_v12 = vadd.f32 %v1978_v26, %v1504_v9  ;;  %v1980_v27 = vpop.f32.mrb[47].mxu1  ;;  %v1510_v26 = vld [vmem:[%s7733_s7 + $0x160] sm:$0xff] }
 0x5cd   : > { %v6146_v11 = vadd.f32 %v1980_v27, %v1505_v41  ;;  %2110 = vmax.xlane.f32.xlu1 %v2109_v52  ;;  %v1511_v27 = vld [vmem:[%s7733_s7 + $0x168] sm:$0xff] }
 0x5ce   : > { %7829 = vst [vmem:[#allocation16_spill] sm:$0xff] %v6144_v12 }
 0x5cf   : > { %7830 = vst [vmem:[#allocation17_spill] sm:$0xff] %v6146_v11  ;;  %v2112_v21 = vmax.f32 %v6144_v12, %v6146_v11  ;;  %v1984_v36 = vpop.f32.mrb[48].mxu1 }
 0x5d0   : > { %v6156_v55 = vadd.f32 %v1984_v36, %v1506_v19  ;;  %v1986_v61 = vpop.f32.mrb[49].mxu1 }
 0x5d1   : > { %v6158_v50 = vadd.f32 %v1986_v61, %v1507_v13  ;;  %2113 = vmax.xlane.f32.xlu0 %v2112_v21 }
 0x5d2   : > { %7831 = vst [vmem:[#allocation18_spill] sm:$0xff] %v6156_v55 }
 0x5d3   : > { %7832 = vst [vmem:[#allocation19_spill] sm:$0xff] %v6158_v50  ;;  %v2115_v54 = vmax.f32 %v6156_v55, %v6158_v50  ;;  %v1990_v63 = vpop.f32.mrb[50].mxu1 }
 0x5d4   : > { %v6168_v9 = vadd.f32 %v1990_v63, %v1508_v43  ;;  %v1992_v41 = vpop.f32.mrb[51].mxu1  ;;  %v1512_v43 = vld [vmem:[%s7733_s7 + $0x170] sm:$0xff] }
 0x5d5   : > { %v6170_v52 = vadd.f32 %v1992_v41, %v1509_v38  ;;  %2116 = vmax.xlane.f32.xlu1 %v2115_v54  ;;  %v1513_v38 = vld [vmem:[%s7733_s7 + $0x178] sm:$0xff] }
 0x5d6   : > { %7833 = vst [vmem:[#allocation20_spill] sm:$0xff] %v6168_v9 }
 0x5d7   : > { %7834 = vst [vmem:[#allocation21_spill] sm:$0xff] %v6170_v52  ;;  %v2118_v19 = vmax.f32 %v6168_v9, %v6170_v52  ;;  %v1996_v13 = vpop.f32.mrb[52].mxu1 }
 0x5d8   : > { %v6180_v21 = vadd.f32 %v1996_v13, %v1510_v26  ;;  %v1998_v36 = vpop.f32.mrb[53].mxu1 }
 0x5d9   : > { %v6182_v61 = vadd.f32 %v1998_v36, %v1511_v27  ;;  %2119 = vmax.xlane.f32.xlu0 %v2118_v19 }
 0x5da   : > { %7835 = vst [vmem:[#allocation22_spill] sm:$0xff] %v6180_v21 }
 0x5db   : > { %7836 = vst [vmem:[#allocation23_spill] sm:$0xff] %v6182_v61  ;;  %v2121_v54 = vmax.f32 %v6180_v21, %v6182_v61  ;;  %v2002_v63 = vpop.f32.mrb[54].mxu1 }
 0x5dc   : > { %v6192_v41 = vadd.f32 %v2002_v63, %v1512_v43  ;;  %v2004_v26 = vpop.f32.mrb[55].mxu1 }
 0x5dd   : > { %v6194_v13 = vadd.f32 %v2004_v26, %v1513_v38  ;;  %2122 = vmax.xlane.f32.xlu1 %v2121_v54 }
 0x5de   : > { %7837 = vst [vmem:[#allocation24_spill] sm:$0xff] %v6192_v41 }
 0x5df   : > { %7838 = vst [vmem:[#allocation25_spill] sm:$0xff] %v6194_v13  ;;  %v2124_v27 = vmax.f32 %v6192_v41, %v6194_v13  ;;  %v2008_v19 = vpop.f32.mrb[56].mxu1 }
 0x5e0   : > { %v2010_v36 = vpop.f32.mrb[57].mxu1 }
 0x5e1   : > { %2125 = vmax.xlane.f32.xlu0 %v2124_v27 }
 0x5e3   : > { %v2014_v6 = vpop.f32.mrb[58].mxu1 }
 0x5e4   : > { %v2016_v5 = vpop.f32.mrb[59].mxu1 }
 0x5e7   : > { %v6198_v7 = vpop.f32.mrb[60].mxu1 }
 0x5e8   : > { %v6200_v56 = vpop.f32.mrb[61].mxu1 }
 0x5eb   : > { %v6202_v60 = vpop.f32.mrb[62].mxu1 }
 0x5ec   : > { %v6204_v43 = vpop.f32.mrb[63].mxu1 }
 0x5ef   : > { %v6206_v63 = vpop.f32.mrb[64].mxu1 }
 0x5f0   : > { %v6208_v38 = vpop.f32.mrb[65].mxu1 }
 0x5f3   : > { %v6210_v54 = vpop.f32.mrb[66].mxu1 }
 0x5f4   : > { %v6212_v26 = vpop.f32.mrb[67].mxu1 }
 0x5f7   : > { %v6214_v58 = vpop.f32.mrb[68].mxu1 }
 0x5f8   : > { %v6216_v27 = vpop.f32.mrb[69].mxu1 }
 0x5fb   : > { %v6218_v1 = vpop.f32.mrb[70].mxu1 }
 0x5fc   : > { %v6220_v53 = vpop.f32.mrb[71].mxu1 }
 0x612   : > { %v2057_v13 = vpop.xlane.xlu1 %2056 }
 0x613   : > { %v2151_v41 = vsub.f32 %v5916_v44, %v2057_v13  ;;  %v2152_v61 = vsub.f32 %v5918_v31, %v2057_v13 }
 0x615   : > { %v2215_v21 = vmul.f32 1.442695, %v2151_v41  ;;  %v2217_v52 = vmul.f32 1.442695, %v2152_v61 }
 0x616   : > { %v2060_v9 = vpop.xlane.xlu0 %2059 }
 0x617   : > { %4844 = vpow2.f32 %v2215_v21  ;;  %v2153_v50 = vsub.f32 %v5928_v49, %v2060_v9  ;;  %v2154_v55 = vsub.f32 %v5930_v57, %v2060_v9  ;;  %v1514_v21 = vld [vmem:[%s7733_s7 + $0x180] sm:$0xff]  ;;  %v1515_v49 = vld [vmem:[%s7733_s7 + $0x188] sm:$0xff]  ;;  %v1516_v9 = vld [vmem:[%s7733_s7 + $0x190] sm:$0xff] }
 0x618   : > { %4846 = vpow2.f32 %v2217_v52 }
 0x619   : > { %v2219_v11 = vmul.f32 1.442695, %v2153_v50  ;;  %v2221_v12 = vmul.f32 1.442695, %v2154_v55 }
 0x61a   : > { %v2063_v3 = vpop.xlane.xlu1 %2062 }
 0x61b   : > { %4848 = vpow2.f32 %v2219_v11  ;;  %v2155_v47 = vsub.f32 %v5940_v2, %v2063_v3  ;;  %v2156_v45 = vsub.f32 %v5942_v4, %v2063_v3  ;;  %v6236_v2 = vadd.f32 %v2008_v19, %v1514_v21 }
 0x61c   : > { %4850 = vpow2.f32 %v2221_v12  ;;  %v6238_v4 = vadd.f32 %v2010_v36, %v1515_v49 }
 0x61d   : > { %v2223_v44 = vmul.f32 1.442695, %v2155_v47  ;;  %v2225_v31 = vmul.f32 1.442695, %v2156_v45 }
 0x61e   : > { %v2066_v57 = vpop.xlane.xlu1 %2065  ;;  %v2127_v41 = vmax.f32 %v6236_v2, %v6238_v4 }
 0x61f   : > { %4852 = vpow2.f32 %v2223_v44  ;;  %v2157_v55 = vsub.f32 %v5952_v8, %v2066_v57  ;;  %v2158_v11 = vsub.f32 %v5954_v22, %v2066_v57  ;;  %v1517_v8 = vld [vmem:[%s7733_s7 + $0x198] sm:$0xff]  ;;  %v6258_v44 = vadd.f32 %v2014_v6, %v1516_v9 }
 0x620   : > { %4854 = vpow2.f32 %v2225_v31  ;;  %v6260_v31 = vadd.f32 %v2016_v5, %v1517_v8 }
 0x621   : > { %v6240_v45 = vpop.eup %4844  ;;  %v2227_v47 = vmul.f32 1.442695, %v2157_v55  ;;  %v2229_v3 = vmul.f32 1.442695, %v2158_v11 }
 0x622   : > { %v6242_v12 = vpop.eup %4846  ;;  %v2069_v50 = vpop.xlane.xlu1 %2068 }
 0x623   : > { %4856 = vpow2.f32 %v2227_v47  ;;  %v2159_v22 = vsub.f32 %v5964_v18, %v2069_v50  ;;  %v2160_v52 = vsub.f32 %v5966_v51, %v2069_v50  ;;  %v2343_v61 = vadd.f32 %v6242_v12, %v6240_v45  ;;  %v1518_v18 = vld [vmem:[%s7733_s7 + $0x1a0] sm:$0xff]  ;;  %v1519_v51 = vld [vmem:[%s7733_s7 + $0x1a8] sm:$0xff] }
 0x624   : > { %4858 = vpow2.f32 %v2229_v3  ;;  %v6275_v6 = vadd.f32 %v6198_v7, %v1518_v18  ;;  %v6278_v11 = vadd.f32 %v6200_v56, %v1519_v51  ;;  %v2130_v3 = vmax.f32 %v6258_v44, %v6260_v31  ;;  %v1520_v7 = vld [vmem:[%s7733_s7 + $0x1b0] sm:$0xff]  ;;  %v1521_v56 = vld [vmem:[%s7733_s7 + $0x1b8] sm:$0xff]  ;;  %v1523_v51 = vld [vmem:[%s7733_s7 + $0x1c8] sm:$0xff] }
 0x625   : > { %v6256_v13 = vpop.eup %4848  ;;  %v2231_v19 = vmul.f32 1.442695, %v2159_v22  ;;  %v2233_v36 = vmul.f32 1.442695, %v2160_v52  ;;  %2344 = vadd.xlane.f32.xlu1 %v2343_v61  ;;  %v6301_v18 = vadd.f32 %v6202_v60, %v1520_v7 }
 0x626   : > { %v6268_v21 = vpop.eup %4850  ;;  %v2072_v49 = vpop.xlane.xlu1 %2071  ;;  %v2133_v61 = vmax.f32 %v6275_v6, %v6278_v11 }
 0x627   : > { %4860 = vpow2.f32 %v2231_v19  ;;  %v2161_v57 = vsub.f32 %v5976_v30, %v2072_v49  ;;  %v2162_v55 = vsub.f32 %v5978_v14, %v2072_v49  ;;  %v2346_v5 = vadd.f32 %v6268_v21, %v6256_v13 }
 0x628   : > { %4862 = vpow2.f32 %v2233_v36 }
 0x629   : > { %v6280_v47 = vpop.eup %4852  ;;  %v2235_v50 = vmul.f32 1.442695, %v2161_v57  ;;  %v2237_v9 = vmul.f32 1.442695, %v2162_v55  ;;  %2347 = vadd.xlane.f32.xlu0 %v2346_v5  ;;  %2128 = vmax.xlane.f32.xlu1 %v2127_v41 }
 0x62a   : > { %v6284_v30 = vpop.eup %4854  ;;  %v2075_v14 = vpop.xlane.xlu1 %2074 }
 0x62b   : > { %4864 = vpow2.f32 %v2235_v50  ;;  %v2163_v8 = vsub.f32 %v5988_v32, %v2075_v14  ;;  %v2164_v22 = vsub.f32 %v5990_v35, %v2075_v14  ;;  %v2349_v52 = vadd.f32 %v6284_v30, %v6280_v47  ;;  %v1522_v35 = vld [vmem:[%s7733_s7 + $0x1c0] sm:$0xff] }
 0x62c   : > { %4866 = vpow2.f32 %v2237_v9  ;;  %v6304_v32 = vadd.f32 %v6204_v43, %v1521_v56  ;;  %v6319_v5 = vadd.f32 %v6206_v63, %v1522_v35  ;;  %v1524_v63 = vld [vmem:[%s7733_s7 + $0x1d0] sm:$0xff] }
 0x62d   : > { %v6298_v41 = vpop.eup %4856  ;;  %v2239_v19 = vmul.f32 1.442695, %v2163_v8  ;;  %v2241_v36 = vmul.f32 1.442695, %v2164_v22  ;;  %2131 = vmax.xlane.f32.xlu0 %v2130_v3  ;;  %2350 = vadd.xlane.f32.xlu1 %v2349_v52  ;;  %v6322_v3 = vadd.f32 %v6208_v38, %v1523_v51  ;;  %v1525_v38 = vld [vmem:[%s7733_s7 + $0x1d8] sm:$0xff]  ;;  %v6345_v35 = vadd.f32 %v6210_v54, %v1524_v63  ;;  %v1527_v51 = vld [vmem:[%s7733_s7 + $0x1e8] sm:$0xff] }
 0x62e   : > { %v6312_v49 = vpop.eup %4858  ;;  %v2078_v57 = vpop.xlane.xlu0 %2077  ;;  %v2136_v7 = vmax.f32 %v6301_v18, %v6304_v32 }
 0x62f   : > { %4868 = vpow2.f32 %v2239_v19  ;;  %v2165_v55 = vsub.f32 %v6000_v0, %v2078_v57  ;;  %v2166_v60 = vsub.f32 %v6002_v39, %v2078_v57  ;;  %v2352_v43 = vadd.f32 %v6312_v49, %v6298_v41 }
 0x630   : > { %4870 = vpow2.f32 %v2241_v36  ;;  %v2139_v52 = vmax.f32 %v6319_v5, %v6322_v3 }
 0x631   : > { %v6324_v50 = vpop.eup %4860  ;;  %v2243_v9 = vmul.f32 1.442695, %v2165_v55  ;;  %v2245_v14 = vmul.f32 1.442695, %v2166_v60  ;;  %2134 = vmax.xlane.f32.xlu1 %v2133_v61  ;;  %2353 = vadd.xlane.f32.xlu0 %v2352_v43 }
 0x632   : > { %v6328_v0 = vpop.eup %4862  ;;  %v2081_v39 = vpop.xlane.xlu1 %2080 }
 0x633   : > { %4872 = vpow2.f32 %v2243_v9  ;;  %v2167_v56 = vsub.f32 %v6012_v48, %v2081_v39  ;;  %v2168_v8 = vsub.f32 %v6014_v33, %v2081_v39  ;;  %v2355_v22 = vadd.f32 %v6328_v0, %v6324_v50  ;;  %v1526_v33 = vld [vmem:[%s7733_s7 + $0x1e0] sm:$0xff] }
 0x634   : > { %4874 = vpow2.f32 %v2245_v14  ;;  %v6348_v48 = vadd.f32 %v6212_v26, %v1525_v38  ;;  %v6363_v43 = vadd.f32 %v6214_v58, %v1526_v33  ;;  %v6366_v9 = vadd.f32 %v6216_v27, %v1527_v51  ;;  %v1528_v58 = vld [vmem:[%s7733_s7 + $0x1f0] sm:$0xff]  ;;  %v1529_v27 = vld [vmem:[%s7733_s7 + $0x1f8] sm:$0xff] }
 0x635   : > { %v6342_v61 = vpop.eup %4864  ;;  %v2247_v19 = vmul.f32 1.442695, %v2167_v56  ;;  %v2249_v36 = vmul.f32 1.442695, %v2168_v8  ;;  %2137 = vmax.xlane.f32.xlu0 %v2136_v7  ;;  %2356 = vadd.xlane.f32.xlu1 %v2355_v22  ;;  %v6389_v33 = vadd.f32 %v6218_v1, %v1528_v58 }
 0x636   : > { %v6356_v57 = vpop.eup %4866  ;;  %v2084_v55 = vpop.xlane.xlu0 %2083  ;;  %v2142_v63 = vmax.f32 %v6345_v35, %v6348_v48  ;;  %v2145_v22 = vmax.f32 %v6363_v43, %v6366_v9 }
 0x637   : > { %4876 = vpow2.f32 %v2247_v19  ;;  %v2169_v60 = vsub.f32 %v6024_v46, %v2084_v55  ;;  %v2170_v54 = vsub.f32 %v6026_v59, %v2084_v55  ;;  %v2358_v26 = vadd.f32 %v6356_v57, %v6342_v61 }
 0x638   : > { %4878 = vpow2.f32 %v2249_v36 }
 0x639   : > { %v6368_v14 = vpop.eup %4868  ;;  %v2251_v7 = vmul.f32 1.442695, %v2169_v60  ;;  %v2253_v39 = vmul.f32 1.442695, %v2170_v54  ;;  %2140 = vmax.xlane.f32.xlu1 %v2139_v52  ;;  %2359 = vadd.xlane.f32.xlu0 %v2358_v26 }
 0x63a   : > { %v6372_v46 = vpop.eup %4870  ;;  %v2087_v59 = vpop.xlane.xlu1 %2086 }
 0x63b   : > { %4880 = vpow2.f32 %v2251_v7  ;;  %v2171_v38 = vsub.f32 %v6036_v20, %v2087_v59  ;;  %v2172_v56 = vsub.f32 %v6038_v24, %v2087_v59  ;;  %v2361_v8 = vadd.f32 %v6372_v46, %v6368_v14 }
 0x63c   : > { %4882 = vpow2.f32 %v2253_v39  ;;  %v6392_v20 = vadd.f32 %v6220_v53, %v1529_v27 }
 0x63d   : > { %v6386_v52 = vpop.eup %4872  ;;  %v2255_v19 = vmul.f32 1.442695, %v2171_v38  ;;  %v2257_v36 = vmul.f32 1.442695, %v2172_v56  ;;  %2143 = vmax.xlane.f32.xlu0 %v2142_v63  ;;  %2362 = vadd.xlane.f32.xlu1 %v2361_v8 }
 0x63e   : > { %v6394_v24 = vpop.eup %4874  ;;  %v2090_v51 = vpop.xlane.xlu0 %2089  ;;  %v2148_v53 = vmax.f32 %v6389_v33, %v6392_v20 }
 0x63f   : > { %4884 = vpow2.f32 %v2255_v19  ;;  %v2173_v55 = vsub.f32 %v6048_v28, %v2090_v51  ;;  %v2174_v60 = vsub.f32 %v6050_v17, %v2090_v51  ;;  %v2364_v54 = vadd.f32 %v6394_v24, %v6386_v52 }
 0x640   : > { %4886 = vpow2.f32 %v2257_v36 }
 0x641   : > { %v6400_v26 = vpop.eup %4876  ;;  %v2259_v7 = vmul.f32 1.442695, %v2173_v55  ;;  %v2261_v1 = vmul.f32 1.442695, %v2174_v60  ;;  %2365 = vadd.xlane.f32.xlu0 %v2364_v54  ;;  %2146 = vmax.xlane.f32.xlu1 %v2145_v22 }
 0x642   : > { %v6404_v39 = vpop.eup %4878  ;;  %v2093_v63 = vpop.xlane.xlu1 %2092 }
 0x643   : > { %4888 = vpow2.f32 %v2259_v7  ;;  %v2175_v28 = vsub.f32 %v6060_v15, %v2093_v63  ;;  %v2176_v17 = vsub.f32 %v6062_v34, %v2093_v63  ;;  %v2367_v59 = vadd.f32 %v6404_v39, %v6400_v26 }
 0x644   : > { %4890 = vpow2.f32 %v2261_v1 }
 0x645   : > { %v6410_v58 = vpop.eup %4880  ;;  %v2263_v27 = vmul.f32 1.442695, %v2175_v28  ;;  %v2265_v38 = vmul.f32 1.442695, %v2176_v17  ;;  %2149 = vmax.xlane.f32.xlu0 %v2148_v53  ;;  %2368 = vadd.xlane.f32.xlu1 %v2367_v59 }
 0x646   : > { %v6412_v56 = vpop.eup %4882  ;;  %v2096_v8 = vpop.xlane.xlu0 %2095 }
 0x647   : > { %4892 = vpow2.f32 %v2263_v27  ;;  %v2177_v22 = vsub.f32 %v6072_v37, %v2096_v8  ;;  %v2178_v15 = vsub.f32 %v6074_v40, %v2096_v8  ;;  %v2370_v34 = vadd.f32 %v6412_v56, %v6410_v58 }
 0x648   : > { %4894 = vpow2.f32 %v2265_v38 }
 0x649   : > { %v6418_v19 = vpop.eup %4884  ;;  %v2267_v36 = vmul.f32 1.442695, %v2177_v22  ;;  %v2269_v51 = vmul.f32 1.442695, %v2178_v15  ;;  %2371 = vadd.xlane.f32.xlu0 %v2370_v34 }
 0x64a   : > { %v6420_v55 = vpop.eup %4886  ;;  %v2099_v60 = vpop.xlane.xlu1 %2098 }
 0x64b   : > { %4896 = vpow2.f32 %v2267_v36  ;;  %v2179_v54 = vsub.f32 %v6084_v42, %v2099_v60  ;;  %v2180_v7 = vsub.f32 %v6086_v62, %v2099_v60  ;;  %v2373_v37 = vadd.f32 %v6420_v55, %v6418_v19 }
 0x64c   : > { %4898 = vpow2.f32 %v2269_v51 }
 0x64d   : > { %v6426_v40 = vpop.eup %4888  ;;  %v2271_v1 = vmul.f32 1.442695, %v2179_v54  ;;  %v2273_v53 = vmul.f32 1.442695, %v2180_v7  ;;  %2374 = vadd.xlane.f32.xlu1 %v2373_v37  ;;  %v7839_v37 = vld [vmem:[#allocation13_spill] sm:$0xff] }
 0x64e   : > { %v6428_v63 = vpop.eup %4890  ;;  %v2102_v28 = vpop.xlane.xlu0 %2101 }
 0x64f   : > { %4900 = vpow2.f32 %v2271_v1  ;;  %v2181_v17 = vsub.f32 %v6096_v10, %v2102_v28  ;;  %v2182_v59 = vsub.f32 %v6098_v25, %v2102_v28  ;;  %v2376_v42 = vadd.f32 %v6428_v63, %v6426_v40 }
 0x650   : > { %4902 = vpow2.f32 %v2273_v53 }
 0x651   : > { %v6434_v62 = vpop.eup %4892  ;;  %v2275_v27 = vmul.f32 1.442695, %v2181_v17  ;;  %v2277_v38 = vmul.f32 1.442695, %v2182_v59  ;;  %2377 = vadd.xlane.f32.xlu0 %v2376_v42  ;;  %v7841_v42 = vld [vmem:[#allocation14_spill] sm:$0xff] }
 0x652   : > { %v6436_v8 = vpop.eup %4894  ;;  %v2105_v22 = vpop.xlane.xlu1 %2104 }
 0x653   : > { %4904 = vpow2.f32 %v2275_v27  ;;  %v2183_v15 = vsub.f32 %v6108_v29, %v2105_v22  ;;  %v2184_v34 = vsub.f32 %v6110_v16, %v2105_v22  ;;  %v2379_v10 = vadd.f32 %v6436_v8, %v6434_v62 }
 0x654   : > { %4906 = vpow2.f32 %v2277_v38  ;;  %v7842_v38 = vld [vmem:[#allocation15_spill] sm:$0xff] }
 0x655   : > { %v6442_v25 = vpop.eup %4896  ;;  %v2279_v36 = vmul.f32 1.442695, %v2183_v15  ;;  %v2281_v51 = vmul.f32 1.442695, %v2184_v34  ;;  %2380 = vadd.xlane.f32.xlu1 %v2379_v10 }
 0x656   : > { %v6444_v60 = vpop.eup %4898  ;;  %v2108_v54 = vpop.xlane.xlu0 %2107 }
 0x657   : > { %4908 = vpow2.f32 %v2279_v36  ;;  %v2185_v7 = vsub.f32 %v6120_v23, %v2108_v54  ;;  %v2186_v1 = vsub.f32 %v7839_v37, %v2108_v54  ;;  %v2382_v29 = vadd.f32 %v6444_v60, %v6442_v25  ;;  %v7844_v54 = vld [vmem:[#allocation16_spill] sm:$0xff]  ;;  %v7845_v37 = vld [vmem:[#allocation17_spill] sm:$0xff] }
 0x658   : > { %4910 = vpow2.f32 %v2281_v51 }
 0x659   : > { %v6450_v16 = vpop.eup %4900  ;;  %v2283_v53 = vmul.f32 1.442695, %v2185_v7  ;;  %v2285_v28 = vmul.f32 1.442695, %v2186_v1  ;;  %2383 = vadd.xlane.f32.xlu0 %v2382_v29 }
 0x65a   : > { %7840 = vst [vmem:[#allocation13_spill] sm:$0xff] %v6450_v16  ;;  %v6452_v17 = vpop.eup %4902  ;;  %v2111_v59 = vpop.xlane.xlu1 %2110 }
 0x65b   : > { %4912 = vpow2.f32 %v2283_v53  ;;  %v2187_v27 = vsub.f32 %v7841_v42, %v2111_v59  ;;  %v2188_v22 = vsub.f32 %v7842_v38, %v2111_v59  ;;  %v2385_v23 = vadd.f32 %v6452_v17, %v6450_v16  ;;  %v7848_v38 = vld [vmem:[#allocation18_spill] sm:$0xff] }
 0x65c   : > { %4914 = vpow2.f32 %v2285_v28 }
 0x65d   : > { %v6458_v15 = vpop.eup %4904  ;;  %v2287_v34 = vmul.f32 1.442695, %v2187_v27  ;;  %v2289_v10 = vmul.f32 1.442695, %v2188_v22  ;;  %2386 = vadd.xlane.f32.xlu1 %v2385_v23  ;;  %v7849_v23 = vld [vmem:[#allocation19_spill] sm:$0xff] }
 0x65e   : > { %7843 = vst [vmem:[#allocation14_spill] sm:$0xff] %v6458_v15  ;;  %v6460_v36 = vpop.eup %4906  ;;  %v2114_v51 = vpop.xlane.xlu0 %2113 }
 0x65f   : > { %4916 = vpow2.f32 %v2287_v34  ;;  %v2189_v7 = vsub.f32 %v7844_v54, %v2114_v51  ;;  %v2190_v1 = vsub.f32 %v7845_v37, %v2114_v51  ;;  %v2388_v29 = vadd.f32 %v6460_v36, %v6458_v15 }
 0x660   : > { %4918 = vpow2.f32 %v2289_v10 }
 0x661   : > { %v6466_v53 = vpop.eup %4908  ;;  %v2291_v28 = vmul.f32 1.442695, %v2189_v7  ;;  %v2293_v59 = vmul.f32 1.442695, %v2190_v1  ;;  %2389 = vadd.xlane.f32.xlu0 %v2388_v29  ;;  %v7852_v29 = vld [vmem:[#allocation20_spill] sm:$0xff] }
 0x662   : > { %7846 = vst [vmem:[#allocation15_spill] sm:$0xff] %v6466_v53  ;;  %v6468_v42 = vpop.eup %4910  ;;  %v2117_v27 = vpop.xlane.xlu1 %2116 }
 0x663   : > { %7847 = vst [vmem:[#allocation16_spill] sm:$0xff] %v6468_v42  ;;  %4920 = vpow2.f32 %v2291_v28  ;;  %v2191_v22 = vsub.f32 %v7848_v38, %v2117_v27  ;;  %v2192_v34 = vsub.f32 %v7849_v23, %v2117_v27  ;;  %v2391_v51 = vadd.f32 %v6468_v42, %v6466_v53  ;;  %v7853_v28 = vld [vmem:[#allocation21_spill] sm:$0xff] }
 0x664   : > { %4922 = vpow2.f32 %v2293_v59 }
 0x665   : > { %v6474_v54 = vpop.eup %4912  ;;  %v2295_v10 = vmul.f32 1.442695, %v2191_v22  ;;  %v2297_v37 = vmul.f32 1.442695, %v2192_v34  ;;  %2392 = vadd.xlane.f32.xlu1 %v2391_v51  ;;  %v7854_v51 = vld [vmem:[#allocation22_spill] sm:$0xff] }
 0x666   : > { %7850 = vst [vmem:[#allocation17_spill] sm:$0xff] %v6474_v54  ;;  %v6476_v7 = vpop.eup %4914  ;;  %v2120_v1 = vpop.xlane.xlu0 %2119 }
 0x667   : > { %7851 = vst [vmem:[#allocation18_spill] sm:$0xff] %v6476_v7  ;;  %4924 = vpow2.f32 %v2295_v10  ;;  %v2193_v16 = vsub.f32 %v7852_v29, %v2120_v1  ;;  %v2194_v15 = vsub.f32 %v7853_v28, %v2120_v1  ;;  %v2394_v27 = vadd.f32 %v6476_v7, %v6474_v54  ;;  %v7855_v10 = vld [vmem:[#allocation23_spill] sm:$0xff] }
 0x668   : > { %4926 = vpow2.f32 %v2297_v37 }
 0x669   : > { %v6482_v38 = vpop.eup %4916  ;;  %v2299_v59 = vmul.f32 1.442695, %v2193_v16  ;;  %v2301_v23 = vmul.f32 1.442695, %v2194_v15  ;;  %2395 = vadd.xlane.f32.xlu0 %v2394_v27  ;;  %v7856_v27 = vld [vmem:[#allocation24_spill] sm:$0xff] }
 0x66a   : > { %v6484_v22 = vpop.eup %4918  ;;  %v2123_v34 = vpop.xlane.xlu1 %2122 }
 0x66b   : > { %4928 = vpow2.f32 %v2299_v59  ;;  %v2195_v53 = vsub.f32 %v7854_v51, %v2123_v34  ;;  %v2196_v42 = vsub.f32 %v7855_v10, %v2123_v34  ;;  %v2397_v1 = vadd.f32 %v6484_v22, %v6482_v38  ;;  %v7857_v59 = vld [vmem:[#allocation25_spill] sm:$0xff] }
 0x66c   : > { %4930 = vpow2.f32 %v2301_v23 }
 0x66d   : > { %v6490_v29 = vpop.eup %4920  ;;  %v2303_v37 = vmul.f32 1.442695, %v2195_v53  ;;  %v2305_v28 = vmul.f32 1.442695, %v2196_v42  ;;  %2398 = vadd.xlane.f32.xlu1 %v2397_v1 }
 0x66e   : > { %v6492_v16 = vpop.eup %4922  ;;  %v2126_v15 = vpop.xlane.xlu0 %2125 }
 0x66f   : > { %4932 = vpow2.f32 %v2303_v37  ;;  %v2197_v54 = vsub.f32 %v7856_v27, %v2126_v15  ;;  %v2198_v7 = vsub.f32 %v7857_v59, %v2126_v15  ;;  %v2400_v34 = vadd.f32 %v6492_v16, %v6490_v29 }
 0x670   : > { %4934 = vpow2.f32 %v2305_v28 }
 0x671   : > { %v6498_v51 = vpop.eup %4924  ;;  %v2307_v23 = vmul.f32 1.442695, %v2197_v54  ;;  %v2309_v10 = vmul.f32 1.442695, %v2198_v7  ;;  %2401 = vadd.xlane.f32.xlu0 %v2400_v34 }
 0x672   : > { %7858 = vst [vmem:[#allocation19_spill] sm:$0xff] %v6498_v51  ;;  %v6500_v53 = vpop.eup %4926 }
 0x673   : > { %7859 = vst [vmem:[#allocation20_spill] sm:$0xff] %v6500_v53  ;;  %4936 = vpow2.f32 %v2307_v23  ;;  %v2403_v42 = vadd.f32 %v6500_v53, %v6498_v51 }
 0x674   : > { %4938 = vpow2.f32 %v2309_v10 }
 0x675   : > { %v6504_v1 = vpop.eup %4928  ;;  %2404 = vadd.xlane.f32.xlu1 %v2403_v42 }
 0x676   : > { %7860 = vst [vmem:[#allocation21_spill] sm:$0xff] %v6504_v1  ;;  %v6506_v37 = vpop.eup %4930 }
 0x677   : > { %7861 = vst [vmem:[#allocation22_spill] sm:$0xff] %v6506_v37  ;;  %v2406_v28 = vadd.f32 %v6506_v37, %v6504_v1 }
 0x679   : > { %v6510_v15 = vpop.eup %4932  ;;  %2407 = vadd.xlane.f32.xlu0 %v2406_v28 }
 0x67a   : > { %7862 = vst [vmem:[#allocation23_spill] sm:$0xff] %v6510_v15  ;;  %v6512_v54 = vpop.eup %4934 }
 0x67b   : > { %7863 = vst [vmem:[#allocation24_spill] sm:$0xff] %v6512_v54  ;;  %v2409_v7 = vadd.f32 %v6512_v54, %v6510_v15 }
 0x67d   : > { %v6516_v27 = vpop.eup %4936  ;;  %2410 = vadd.xlane.f32.xlu1 %v2409_v7 }
 0x67e   : > { %7864 = vst [vmem:[#allocation25_spill] sm:$0xff] %v6516_v27  ;;  %v6518_v59 = vpop.eup %4938 }
 0x67f   : > { %7865 = vst [vmem:[#allocation26_spill] sm:$0xff] %v6518_v59  ;;  %v2412_v34 = vadd.f32 %v6518_v59, %v6516_v27 }
 0x681   : > { %2413 = vadd.xlane.f32.xlu0 %v2412_v34 }
 0x6b2   : > { %v2345_v23 = vpop.xlane.xlu1 %2344 }
 0x6b3   : > { %4940 = vrcp.f32 %v2345_v23 }
 0x6b6   : > { %v2348_v10 = vpop.xlane.xlu0 %2347  ;;  %v2129_v42 = vpop.xlane.xlu1 %2128 }
 0x6b7   : > { %4942 = vrcp.f32 %v2348_v10  ;;  %v2199_v28 = vsub.f32 %v6236_v2, %v2129_v42  ;;  %v2200_v51 = vsub.f32 %v6238_v4, %v2129_v42 }
 0x6b9   : > { %v2311_v1 = vmul.f32 1.442695, %v2199_v28  ;;  %v2313_v15 = vmul.f32 1.442695, %v2200_v51 }
 0x6ba   : > { %v2132_v54 = vpop.xlane.xlu0 %2131  ;;  %v2351_v37 = vpop.xlane.xlu1 %2350 }
 0x6bb   : > { %4944 = vpow2.f32 %v2311_v1  ;;  %v2201_v7 = vsub.f32 %v6258_v44, %v2132_v54  ;;  %v2202_v53 = vsub.f32 %v6260_v31, %v2132_v54 }
 0x6bc   : > { %4946 = vpow2.f32 %v2313_v15 }
 0x6bd   : > { %v2315_v34 = vmul.f32 1.442695, %v2201_v7  ;;  %v2317_v27 = vmul.f32 1.442695, %v2202_v53  ;;  %4948 = vrcp.f32 %v2351_v37  ;;  %v4941_v10 = vpop.eup %4940 }
 0x6be   : > { %v2354_v23 = vpop.xlane.xlu0 %2353  ;;  %v2135_v59 = vpop.xlane.xlu1 %2134  ;;  %v2472_v31 = vmul.f32 %v4941_v10, %v6242_v12  ;;  %v2471_v37 = vmul.f32 %v4941_v10, %v6240_v45 }
 0x6bf   : > { %4950 = vpow2.f32 %v2315_v34  ;;  %v2203_v2 = vsub.f32 %v6275_v6, %v2135_v59  ;;  %v2204_v4 = vsub.f32 %v6278_v11, %v2135_v59 }
 0x6c0   : > { %4952 = vpow2.f32 %v2317_v27 }
 0x6c1   : > { %v4943_v51 = vpop.eup %4942  ;;  %4954 = vrcp.f32 %v2354_v23  ;;  %v2319_v1 = vmul.f32 1.442695, %v2203_v2  ;;  %v2321_v42 = vmul.f32 1.442695, %v2204_v4 }
 0x6c2   : > { %v2138_v44 = vpop.xlane.xlu0 %2137  ;;  %v2357_v28 = vpop.xlane.xlu1 %2356  ;;  %v2474_v53 = vmul.f32 %v4943_v51, %v6268_v21  ;;  %v2473_v15 = vmul.f32 %v4943_v51, %v6256_v13 }
 0x6c3   : > { %4956 = vpow2.f32 %v2319_v1  ;;  %v2205_v6 = vsub.f32 %v6301_v18, %v2138_v44  ;;  %v2206_v11 = vsub.f32 %v6304_v32, %v2138_v44 }
 0x6c4   : > { %4958 = vpow2.f32 %v2321_v42  ;;  %v4389_v54 = vpack.c.bf16 %v2474_v53, %v2472_v31  ;;  %v4391_v27 = vpack.c.bf16 %v2473_v15, %v2471_v37 }
 0x6c5   : > { %v6534_v59 = vpop.eup %4944  ;;  %v2323_v7 = vmul.f32 1.442695, %v2205_v6  ;;  %v2325_v34 = vmul.f32 1.442695, %v2206_v11  ;;  %4960 = vrcp.f32 %v2357_v28 }
 0x6c6   : > { %v6536_v12 = vpop.eup %4946  ;;  %v2360_v21 = vpop.xlane.xlu0 %2359  ;;  %4390 = vmatprep.subr.bf16.mxu1 %v4389_v54 }
 0x6c7   : > { %v2141_v45 = vpop.xlane.xlu1 %2140  ;;  %v4949_v23 = vpop.eup %4948  ;;  %4962 = vpow2.f32 %v2323_v7  ;;  %4392 = vmatpush1.bf16.xpose.msra.mxu1 %v4391_v27  ;;  %v2415_v32 = vadd.f32 %v6536_v12, %v6534_v59 }
 0x6c8   : > { %v2207_v13 = vsub.f32 %v6319_v5, %v2141_v45  ;;  %v2208_v18 = vsub.f32 %v6322_v3, %v2141_v45  ;;  %4964 = vpow2.f32 %v2325_v34  ;;  %v2476_v44 = vmul.f32 %v4949_v23, %v6284_v30 }
 0x6c9   : > { %v6542_v10 = vpop.eup %4950  ;;  %4966 = vrcp.f32 %v2360_v21  ;;  %2416 = vadd.xlane.f32.xlu1 %v2415_v32  ;;  %v2475_v37 = vmul.f32 %v4949_v23, %v6280_v47 }
 0x6ca   : > { %v2327_v2 = vmul.f32 1.442695, %v2207_v13  ;;  %v2329_v4 = vmul.f32 1.442695, %v2208_v18  ;;  %v6544_v51 = vpop.eup %4952  ;;  %v2144_v1 = vpop.xlane.xlu0 %2143 }
 0x6cb   : > { %v2363_v42 = vpop.xlane.xlu1 %2362  ;;  %v4955_v5 = vpop.eup %4954  ;;  %v2209_v3 = vsub.f32 %v6345_v35, %v2144_v1  ;;  %v2210_v28 = vsub.f32 %v6348_v48, %v2144_v1  ;;  %v2418_v31 = vadd.f32 %v6544_v51, %v6542_v10 }
 0x6cc   : > { %4968 = vpow2.f32 %v2327_v2  ;;  %v2478_v53 = vmul.f32 %v4955_v5, %v6312_v49  ;;  %v2477_v15 = vmul.f32 %v4955_v5, %v6298_v41 }
 0x6cd   : > { %4970 = vpow2.f32 %v2329_v4  ;;  %v6554_v6 = vpop.eup %4956  ;;  %v2331_v11 = vmul.f32 1.442695, %v2209_v3  ;;  %v2333_v30 = vmul.f32 1.442695, %v2210_v28  ;;  %2419 = vadd.xlane.f32.xlu0 %v2418_v31 }
 0x6ce   : > { %v6556_v54 = vpop.eup %4958  ;;  %4972 = vrcp.f32 %v2363_v42  ;;  %v2366_v35 = vpop.xlane.xlu0 %2365  ;;  %v4393_v48 = vpack.c.bf16 %v2478_v53, %v2476_v44  ;;  %v4395_v7 = vpack.c.bf16 %v2477_v15, %v2475_v37 }
 0x6cf   : > { %v2147_v27 = vpop.xlane.xlu1 %2146  ;;  %v4961_v34 = vpop.eup %4960  ;;  %4974 = vpow2.f32 %v2331_v11  ;;  %v2421_v41 = vadd.f32 %v6556_v54, %v6554_v6 }
 0x6d0   : > { %v2211_v49 = vsub.f32 %v6363_v43, %v2147_v27  ;;  %v2212_v47 = vsub.f32 %v6366_v9, %v2147_v27  ;;  %4976 = vpow2.f32 %v2333_v30  ;;  %4394 = vmatprep.subr.bf16.mxu1 %v4393_v48  ;;  %v2480_v32 = vmul.f32 %v4961_v34, %v6328_v0 }
 0x6d1   : > { %v6562_v21 = vpop.eup %4962  ;;  %4978 = vrcp.f32 %v2366_v35  ;;  %4396 = vmatpush1.bf16.xpose.msra.mxu1 %v4395_v7  ;;  %2422 = vadd.xlane.f32.xlu1 %v2421_v41  ;;  %v2479_v44 = vmul.f32 %v4961_v34, %v6324_v50 }
 0x6d2   : > { %v2335_v45 = vmul.f32 1.442695, %v2211_v49  ;;  %v2337_v23 = vmul.f32 1.442695, %v2212_v47  ;;  %v6564_v13 = vpop.eup %4964  ;;  %v2150_v18 = vpop.xlane.xlu0 %2149 }
 0x6d3   : > { %v4967_v43 = vpop.eup %4966  ;;  %v2213_v9 = vsub.f32 %v6389_v33, %v2150_v18  ;;  %v2214_v2 = vsub.f32 %v6392_v20, %v2150_v18  ;;  %v2369_v4 = vpop.xlane.xlu1 %2368  ;;  %v2424_v1 = vadd.f32 %v6564_v13, %v6562_v21 }
 0x6d4   : > { %4980 = vpow2.f32 %v2335_v45  ;;  %v2482_v42 = vmul.f32 %v4967_v43, %v6356_v57  ;;  %v2481_v5 = vmul.f32 %v4967_v43, %v6342_v61 }
 0x6d5   : > { %4982 = vpow2.f32 %v2337_v23  ;;  %v2339_v0 = vmul.f32 1.442695, %v2213_v9  ;;  %v2341_v28 = vmul.f32 1.442695, %v2214_v2  ;;  %2425 = vadd.xlane.f32.xlu0 %v2424_v1 }
 0x6d6   : > { %v6574_v3 = vpop.eup %4968  ;;  %4984 = vrcp.f32 %v2369_v4  ;;  %v2372_v33 = vpop.xlane.xlu0 %2371  ;;  %v4397_v20 = vpack.c.bf16 %v2482_v42, %v2480_v32  ;;  %v4399_v53 = vpack.c.bf16 %v2481_v5, %v2479_v44 }
 0x6d7   : > { %v6576_v31 = vpop.eup %4970  ;;  %4986 = vpow2.f32 %v2339_v0 }
 0x6d8   : > { %v2427_v37 = vadd.f32 %v6576_v31, %v6574_v3  ;;  %v4973_v57 = vpop.eup %4972  ;;  %4988 = vpow2.f32 %v2341_v28  ;;  %4398 = vmatprep.subr.bf16.mxu1 %v4397_v20 }
 0x6d9   : > { %v6580_v50 = vpop.eup %4974  ;;  %4990 = vrcp.f32 %v2372_v33  ;;  %4400 = vmatpush1.bf16.xpose.msra.mxu1 %v4399_v53  ;;  %v2484_v35 = vmul.f32 %v4973_v57, %v6372_v46  ;;  %v2483_v27 = vmul.f32 %v4973_v57, %v6368_v14  ;;  %v1463_v57 = vld [vmem:[%s7732_s6] sm:$0xff] }
 0x6da   : > { %2428 = vadd.xlane.f32.xlu1 %v2427_v37  ;;  %v6582_v61 = vpop.eup %4976  ;;  %v2375_v15 = vpop.xlane.xlu1 %2374 }
 0x6db   : > { %v4979_v11 = vpop.eup %4978  ;;  %v2430_v30 = vadd.f32 %v6582_v61, %v6580_v50  ;;  %4992 = vrcp.f32 %v2375_v15 }
 0x6dc   : > { %v2486_v48 = vmul.f32 %v4979_v11, %v6394_v24  ;;  %v2485_v7 = vmul.f32 %v4979_v11, %v6386_v52 }
 0x6dd   : > { %2431 = vadd.xlane.f32.xlu0 %v2430_v30 }
 0x6de   : > { %v6590_v34 = vpop.eup %4980  ;;  %v2378_v47 = vpop.xlane.xlu0 %2377  ;;  %v4401_v41 = vpack.c.bf16 %v2486_v48, %v2484_v35  ;;  %v4403_v45 = vpack.c.bf16 %v2485_v7, %v2483_v27 }
 0x6df   : > { %v6592_v49 = vpop.eup %4982  ;;  %4994 = vrcp.f32 %v2378_v47 }
 0x6e0   : > { %v2433_v23 = vadd.f32 %v6592_v49, %v6590_v34  ;;  %v4985_v46 = vpop.eup %4984  ;;  %4402 = vmatprep.subr.bf16.mxu1 %v4401_v41 }
 0x6e1   : > { %v6596_v24 = vpop.eup %4986  ;;  %4404 = vmatpush1.bf16.xpose.msra.mxu1 %v4403_v45  ;;  %v2488_v43 = vmul.f32 %v4985_v46, %v6404_v39  ;;  %v2487_v2 = vmul.f32 %v4985_v46, %v6400_v26  ;;  %v7866_v45 = vld [vmem:[#allocation14_spill] sm:$0xff] }
 0x6e2   : > { %2434 = vadd.xlane.f32.xlu1 %v2433_v23  ;;  %v6598_v14 = vpop.eup %4988  ;;  %v2381_v52 = vpop.xlane.xlu1 %2380  ;;  %v7867_v23 = vld [vmem:[#allocation13_spill] sm:$0xff] }
 0x6e3   : > { %v4991_v18 = vpop.eup %4990  ;;  %v2436_v32 = vadd.f32 %v6598_v14, %v6596_v24  ;;  %4996 = vrcp.f32 %v2381_v52 }
 0x6e4   : > { %v2490_v9 = vmul.f32 %v4991_v18, %v6412_v56  ;;  %v2489_v4 = vmul.f32 %v4991_v18, %v6410_v58 }
 0x6e5   : > { %2437 = vadd.xlane.f32.xlu0 %v2436_v32  ;;  %v4993_v5 = vpop.eup %4992 }
 0x6e6   : > { %v2384_v1 = vpop.xlane.xlu0 %2383  ;;  %v4405_v42 = vpack.c.bf16 %v2490_v9, %v2488_v43  ;;  %v4407_v44 = vpack.c.bf16 %v2489_v4, %v2487_v2  ;;  %v2492_v33 = vmul.f32 %v4993_v5, %v6420_v55  ;;  %v2491_v26 = vmul.f32 %v4993_v5, %v6418_v19  ;;  %v7868_v9 = vld [vmem:[#allocation16_spill] sm:$0xff]  ;;  %v7869_v4 = vld [vmem:[#allocation18_spill] sm:$0xff] }
 0x6e7   : > { %4998 = vrcp.f32 %v2384_v1  ;;  %v7870_v1 = vld [vmem:[#allocation17_spill] sm:$0xff] }
 0x6e8   : > { %4406 = vmatprep.subr.bf16.mxu1 %v4405_v42  ;;  %v7871_v42 = vld [vmem:[#allocation15_spill] sm:$0xff] }
 0x6e9   : > { %v4995_v0 = vpop.eup %4994  ;;  %4408 = vmatpush1.bf16.xpose.msra.mxu1 %v4407_v44 }
 0x6ea   : > { %v2387_v28 = vpop.xlane.xlu1 %2386  ;;  %v2494_v39 = vmul.f32 %v4995_v0, %v6428_v63  ;;  %v2493_v56 = vmul.f32 %v4995_v0, %v6426_v40 }
 0x6eb   : > { %5000 = vrcp.f32 %v2387_v28 }
 0x6ec   : > { %v4409_v58 = vpack.c.bf16 %v2494_v39, %v2492_v33  ;;  %v4411_v20 = vpack.c.bf16 %v2493_v56, %v2491_v26 }
 0x6ed   : > { %v4997_v37 = vpop.eup %4996 }
 0x6ee   : > { %v2390_v53 = vpop.xlane.xlu0 %2389  ;;  %4410 = vmatprep.subr.bf16.mxu1 %v4409_v58  ;;  %v2496_v63 = vmul.f32 %v4997_v37, %v6436_v8  ;;  %v2495_v11 = vmul.f32 %v4997_v37, %v6434_v62 }
 0x6ef   : > { %5002 = vrcp.f32 %v2390_v53 }
 0x6f1   : > { %v4999_v15 = vpop.eup %4998  ;;  %4412 = vmatpush1.bf16.xpose.msra.mxu1 %v4411_v20 }
 0x6f2   : > { %v2393_v55 = vpop.xlane.xlu1 %2392  ;;  %v2498_v40 = vmul.f32 %v4999_v15, %v6444_v60  ;;  %v2497_v19 = vmul.f32 %v4999_v15, %v6442_v25 }
 0x6f3   : > { %1532 = vperm.xlu1 %4806, %v1463_v57   ;;  %5004 = vrcp.f32 %v2393_v55 }
 0x6f4   : > { %v4413_v30 = vpack.c.bf16 %v2498_v40, %v2496_v63  ;;  %v4415_v35 = vpack.c.bf16 %v2497_v19, %v2495_v11  ;;  %v7872_v40 = vld [vmem:[#allocation20_spill] sm:$0xff]  ;;  %v7873_v11 = vld [vmem:[#allocation22_spill] sm:$0xff] }
 0x6f5   : > { %v5001_v27 = vpop.eup %5000 }
 0x6f6   : > { %v2396_v48 = vpop.xlane.xlu0 %2395  ;;  %4414 = vmatprep.subr.bf16.mxu1 %v4413_v30  ;;  %v2500_v41 = vmul.f32 %v5001_v27, %v6452_v17  ;;  %v2499_v25 = vmul.f32 %v5001_v27, %v7867_v23 }
 0x6f7   : > { %5006 = vrcp.f32 %v2396_v48 }
 0x6f9   : > { %v5003_v7 = vpop.eup %5002  ;;  %4416 = vmatpush1.bf16.xpose.msra.mxu1 %v4415_v35 }
 0x6fa   : > { %v2399_v47 = vpop.xlane.xlu1 %2398  ;;  %v2502_v8 = vmul.f32 %v5003_v7, %v6460_v36  ;;  %v2501_v60 = vmul.f32 %v5003_v7, %v7866_v45 }
 0x6fb   : > { %5008 = vrcp.f32 %v2399_v47  ;;  %v7876_v47 = vld [vmem:[#allocation24_spill] sm:$0xff] }
 0x6fc   : > { %v4417_v46 = vpack.c.bf16 %v2502_v8, %v2500_v41  ;;  %v4419_v62 = vpack.c.bf16 %v2501_v60, %v2499_v25  ;;  %v7877_v8 = vld [vmem:[#allocation26_spill] sm:$0xff]  ;;  %v7878_v60 = vld [vmem:[#allocation25_spill] sm:$0xff]  ;;  %v7879_v25 = vld [vmem:[#allocation23_spill] sm:$0xff] }
 0x6fd   : > { %v5005_v18 = vpop.eup %5004 }
 0x6fe   : > { %v2402_v52 = vpop.xlane.xlu0 %2401  ;;  %4418 = vmatprep.subr.bf16.mxu1 %v4417_v46  ;;  %v2504_v2 = vmul.f32 %v5005_v18, %v7868_v9  ;;  %v2503_v44 = vmul.f32 %v5005_v18, %v7871_v42 }
 0x6ff   : > { %5010 = vrcp.f32 %v2402_v52 }
 0x701   : > { %v5007_v32 = vpop.eup %5006  ;;  %4420 = vmatpush1.bf16.xpose.msra.mxu1 %v4419_v62 }
 0x702   : > { %v2405_v43 = vpop.xlane.xlu1 %2404  ;;  %v2506_v17 = vmul.f32 %v5007_v32, %v7869_v4  ;;  %v2505_v36 = vmul.f32 %v5007_v32, %v7870_v1 }
 0x703   : > { %5012 = vrcp.f32 %v2405_v43 }
 0x704   : > { %v4421_v5 = vpack.c.bf16 %v2506_v17, %v2504_v2  ;;  %v4423_v0 = vpack.c.bf16 %v2505_v36, %v2503_v44 }
 0x705   : > { %v5009_v33 = vpop.eup %5008 }
 0x706   : > { %v2408_v28 = vpop.xlane.xlu0 %2407  ;;  %4422 = vmatprep.subr.bf16.mxu1 %v4421_v5  ;;  %v2508_v26 = vmul.f32 %v5009_v33, %v6484_v22  ;;  %v2507_v53 = vmul.f32 %v5009_v33, %v6482_v38  ;;  %v7874_v22 = vld [vmem:[#allocation21_spill] sm:$0xff] }
 0x707   : > { %5014 = vrcp.f32 %v2408_v28 }
 0x709   : > { %v5011_v39 = vpop.eup %5010  ;;  %4424 = vmatpush1.bf16.xpose.msra.mxu1 %v4423_v0 }
 0x70a   : > { %v2411_v56 = vpop.xlane.xlu1 %2410  ;;  %v2510_v58 = vmul.f32 %v5011_v39, %v6492_v16  ;;  %v2509_v20 = vmul.f32 %v5011_v39, %v6490_v29  ;;  %v7875_v16 = vld [vmem:[#allocation19_spill] sm:$0xff] }
 0x70b   : > { %5016 = vrcp.f32 %v2411_v56 }
 0x70c   : > { %v4425_v37 = vpack.c.bf16 %v2510_v58, %v2508_v26  ;;  %v4427_v57 = vpack.c.bf16 %v2509_v20, %v2507_v53 }
 0x70d   : > { %v5013_v55 = vpop.eup %5012 }
 0x70e   : > { %v2414_v15 = vpop.xlane.xlu0 %2413  ;;  %4426 = vmatprep.subr.bf16.mxu1 %v4425_v37  ;;  %v2512_v19 = vmul.f32 %v5013_v55, %v7872_v40  ;;  %v2511_v48 = vmul.f32 %v5013_v55, %v7875_v16 }
 0x70f   : > { %5018 = vrcp.f32 %v2414_v15 }
 0x711   : > { %v5015_v63 = vpop.eup %5014  ;;  %4428 = vmatpush1.bf16.xpose.msra.mxu1 %v4427_v57  ;;  %v7881_v57 = vld [vmem:[#allocation10_spill] sm:$0xff] }
 0x712   : > { %v2514_v30 = vmul.f32 %v5015_v63, %v7873_v11  ;;  %v2513_v35 = vmul.f32 %v5015_v63, %v7874_v22 }
 0x714   : > { %v4429_v29 = vpack.c.bf16 %v2514_v30, %v2512_v19  ;;  %v4431_v27 = vpack.c.bf16 %v2513_v35, %v2511_v48  ;;  %v6659_v48 = vld [vmem:[#allocation2] sm:$0xff] }
 0x715   : > { %v5017_v38 = vpop.eup %5016 }
 0x716   : > { %4430 = vmatprep.subr.bf16.mxu1 %v4429_v29  ;;  %v2516_v41 = vmul.f32 %v5017_v38, %v7876_v47  ;;  %v2515_v46 = vmul.f32 %v5017_v38, %v7879_v25 }
 0x719   : > { %v5019_v7 = vpop.eup %5018  ;;  %4432 = vmatpush1.bf16.xpose.msra.mxu1 %v4431_v27  ;;  %v7884_v27 = vld [vmem:[#allocation7_spill] sm:$0xff] }
 0x71a   : > { %v2518_v45 = vmul.f32 %v5019_v7, %v7877_v8  ;;  %v2517_v23 = vmul.f32 %v5019_v7, %v7878_v60  ;;  %v7886_v7 = vld [vmem:[#allocation8_spill] sm:$0xff]  ;;  %v5233_v8 = vld [vmem:[%s7731_s5 + $0x8] sm:$0xff] }
 0x71c   : > { %v4433_v62 = vpack.c.bf16 %v2518_v45, %v2516_v41  ;;  %v4435_v52 = vpack.c.bf16 %v2517_v23, %v2515_v46  ;;  %v5232_v41 = vld [vmem:[%s7731_s5] sm:$0xff]  ;;  %v5234_v45 = vld [vmem:[%s7731_s5 + $0x10] sm:$0xff] }
 0x71d   : > { %v7889_v46 = vld [vmem:[#allocation11_spill] sm:$0xff] }
 0x71e   : > { %4434 = vmatprep.subr.bf16.mxu1 %v4433_v62 }
 0x721   : > { %4436 = vmatpush1.bf16.xpose.msra.mxu1 %v4435_v52 }
 0x756   : > { %v2417_v18 = vpop.xlane.xlu1 %2416 }
 0x757   : > { %5020 = vrcp.f32 %v2417_v18 }
 0x75a   : > { %v2420_v32 = vpop.xlane.xlu0 %2419 }
 0x75b   : > { %5022 = vrcp.f32 %v2420_v32 }
 0x75e   : > { %v2423_v43 = vpop.xlane.xlu1 %2422 }
 0x75f   : > { %5024 = vrcp.f32 %v2423_v43 }
 0x761   : > { %v5021_v2 = vpop.eup %5020 }
 0x762   : > { %v2426_v9 = vpop.xlane.xlu0 %2425  ;;  %v2520_v1 = vmul.f32 %v5021_v2, %v6536_v12  ;;  %v2519_v42 = vmul.f32 %v5021_v2, %v6534_v59 }
 0x763   : > { %5026 = vrcp.f32 %v2426_v9  ;;  %v7890_v9 = vld [vmem:[#allocation12_spill] sm:$0xff] }
 0x765   : > { %v5023_v4 = vpop.eup %5022 }
 0x766   : > { %v2522_v36 = vmul.f32 %v5023_v4, %v6544_v51  ;;  %v2521_v44 = vmul.f32 %v5023_v4, %v6542_v10 }
 0x767   : > { %v2429_v17 = vpop.xlane.xlu1 %2428 }
 0x768   : > { %v4437_v5 = vpack.c.bf16 %v2522_v36, %v2520_v1  ;;  %v4439_v0 = vpack.c.bf16 %v2521_v44, %v2519_v42  ;;  %5028 = vrcp.f32 %v2429_v17 }
 0x769   : > { %v5025_v33 = vpop.eup %5024 }
 0x76a   : > { %v2432_v28 = vpop.xlane.xlu0 %2431  ;;  %4438 = vmatprep.subr.bf16.mxu1 %v4437_v5  ;;  %v2524_v26 = vmul.f32 %v5025_v33, %v6556_v54  ;;  %v2523_v51 = vmul.f32 %v5025_v33, %v6554_v6 }
 0x76b   : > { %5030 = vrcp.f32 %v2432_v28  ;;  %4440 = vmatpush1.bf16.xpose.msra.mxu1 %v4439_v0 }
 0x76d   : > { %v5027_v39 = vpop.eup %5026 }
 0x76e   : > { %v2526_v12 = vmul.f32 %v5027_v39, %v6564_v13  ;;  %v2525_v59 = vmul.f32 %v5027_v39, %v6562_v21 }
 0x76f   : > { %v2435_v56 = vpop.xlane.xlu1 %2434 }
 0x770   : > { %v4441_v58 = vpack.c.bf16 %v2526_v12, %v2524_v26  ;;  %v4443_v10 = vpack.c.bf16 %v2525_v59, %v2523_v51  ;;  %5032 = vrcp.f32 %v2435_v56 }
 0x772   : > { %v2438_v20 = vpop.xlane.xlu0 %2437  ;;  %4442 = vmatprep.subr.bf16.mxu1 %v4441_v58  ;;  %v5029_v37 = vpop.eup %5028 }
 0x773   : > { %v6645_v53 = vpop.permute.xlu1 %1532  ;;  %5034 = vrcp.f32 %v2438_v20  ;;  %4444 = vmatpush1.bf16.xpose.msra.mxu1 %v4443_v10  ;;  %v2528_v13 = vmul.f32 %v5029_v37, %v6576_v31  ;;  %v2527_v21 = vmul.f32 %v5029_v37, %v6574_v3  ;;  %v7882_v3 = vld [vmem:[#allocation9_spill] sm:$0xff] }
 0x774   : > { %7880 = vst [vmem:[#allocation14_spill] sm:$0xff] %v6645_v53  ;;  %v1624_v15 = vadd.f32 %v7881_v57, %v6645_v53 }
 0x775   : > { %v5031_v54 = vpop.eup %5030 }
 0x776   : > { %2599 = vmatprep.mubr.f32.mxu1 %v1624_v15  ;;  %v2530_v6 = vmul.f32 %v5031_v54, %v6582_v61  ;;  %v2529_v55 = vmul.f32 %v5031_v54, %v6580_v50  ;;  %v1622_v50 = vadd.f32 %v7882_v3, %v6645_v53 }
 0x778   : > { %v4445_v63 = vpack.c.bf16 %v2530_v6, %v2528_v13  ;;  %v4447_v40 = vpack.c.bf16 %v2529_v55, %v2527_v21 }
 0x77a   : > { %4446 = vmatprep.subr.bf16.mxu1 %v4445_v63  ;;  %v5033_v19 = vpop.eup %5032 }
 0x77b   : > { %4448 = vmatpush1.bf16.xpose.msra.mxu1 %v4447_v40  ;;  %v2532_v30 = vmul.f32 %v5033_v19, %v6592_v49  ;;  %v2531_v35 = vmul.f32 %v5033_v19, %v6590_v34  ;;  %v6662_v49 = vstv %s1459_s14 }
 0x77c   : > { %7883 = vst [vmem:[#allocation13_spill] sm:$0xff] %v6662_v49 }
 0x77d   : > { %v5035_v11 = vpop.eup %5034 }
 0x77e   : > { %v2534_v22 = vmul.f32 %v5035_v11, %v6598_v14  ;;  %v2533_v31 = vmul.f32 %v5035_v11, %v6596_v24 }
 0x780   : > { %v4449_v16 = vpack.c.bf16 %v2534_v22, %v2532_v30  ;;  %v4451_v61 = vpack.c.bf16 %v2533_v31, %v2531_v35 }
 0x782   : > { %4450 = vmatprep.subr.bf16.mxu1 %v4449_v16  ;;  %v5235_v16 = vld [vmem:[%s7733_s7] sm:$0xff] }
 0x783   : > { %4452 = vmatpush1.bf16.xpose.msra.mxu1 %v4451_v61 }
 0x78a   : > { %2600 = vmatmul.mubr.f32.vlgmr.msra.gmra.mrb[72].mxu1 %v1622_v50  ;;  %v5236_v50 = vld [vmem:[%s7733_s7 + $0x8] sm:$0xff] }
 0x78b   : > { %2675 = vmatprep.mubr.f32.mxu1 %v6659_v48 }
 0x85d   : > { %v2601_v14 = vpop.f32.mrb[72].mxu1 }
 0x85e   : > { %v2607_v34 = vmul.f32 %v6662_v49, %v2601_v14  ;;  %v2603_v29 = vpop.f32.mrb[73].mxu1 }
 0x85f   : > { %v2608_v24 = vmul.f32 %v6662_v49, %v2603_v29  ;;  %v5237_v29 = vld [vmem:[%s7733_s7 + $0x10] sm:$0xff] }
 0x860   : > { %v6670_v47 = vadd.f32 %v2607_v34, %v7886_v7  ;;  %v5238_v7 = vld [vmem:[%s7733_s7 + $0x18] sm:$0xff] }
 0x861   : > { %v6667_v38 = vadd.f32 %v2608_v24, %v7884_v27 }
 0x862   : > { %7887 = vst [vmem:[#allocation18_spill] sm:$0xff] %v6670_v47 }
 0x863   : > { %7885 = vst [vmem:[#allocation16_spill] sm:$0xff] %v6667_v38  ;;  %2611 = vmatprep.subr.mxu1 %v6667_v38 }
 0x864   : > { %2612 = vmatpush1.msra.mxu1 %v6670_v47 }
 0x865   : > { %4273 = vmatmul.mubr.msk.f32.vlgmr.msra.gmra.mrb[74].mxu1 %vm1545_vm11, %v5232_v41 }
 0x866   : > { %2681 = vmatprep.mubr.f32.mxu1 %v6659_v48 }
 0x869   : > { %4274 = vmatmul.mubr.msk.f32.gmra.mrb[76].mxu1 %vm1545_vm11, %v5233_v8 }
 0x86a   : > { %2687 = vmatprep.mubr.f32.mxu1 %v6659_v48 }
 0x86d   : > { %4275 = vmatmul.mubr.msk.f32.gmra.mrb[78].mxu1 %vm1545_vm11, %v5234_v45 }
 0x86e   : > { %4017 = vmatprep.mubr.f32.mxu1 %v6659_v48 }
 0x938   : > { %v6689_v60 = vpop.f32.mrb[74].mxu1 }
 0x939   : > { %7888 = vst [vmem:[#allocation17_spill] sm:$0xff] %v6689_v60  ;;  %v6691_v23 = vpop.f32.mrb[75].mxu1 }
 0x93a   : > { %v2680_v35 = vadd.f32 %v6691_v23, %v6645_v53  ;;  %v5239_v23 = vld [vmem:[%s7733_s7 + $0x20] sm:$0xff] }
 0x93c   : > { %v2683_v25 = vpop.f32.mrb[76].mxu1 }
 0x93d   : > { %v2684_v62 = vadd.f32 %v2683_v25, %v7889_v46  ;;  %v2685_v52 = vpop.f32.mrb[77].mxu1 }
 0x93e   : > { %v2686_v18 = vadd.f32 %v2685_v52, %v7889_v46 }
 0x93f   : > { %2694 = vxpose.xlu0.b32.start.end [1/1] (short) %v2684_v62, 128  ;;  %v5240_v62 = vld [vmem:[%s7733_s7 + $0x28] sm:$0xff] }
 0x940   : > { %v2689_v32 = vpop.f32.mrb[78].mxu1  ;;  %2726 = vxpose.xlu1.b32.start.end [1/1] (short) %v2686_v18, 128 }
 0x941   : > { %v2691_v43 = vpop.f32.mrb[79].mxu1  ;;  %v2690_v4 = vadd.f32 %v2689_v32, %v7890_v9 }
 0x942   : > { %v2692_v2 = vadd.f32 %v2691_v43, %v7890_v9  ;;  %v5241_v43 = vld [vmem:[%s7733_s7 + $0x30] sm:$0xff] }
 0x944   : > { %2854 = vmatprep.subr.mxu0 %v2692_v2 }
 0x945   : > { %2855 = vmatpush1.msra.mxu0 %v2690_v4  ;;  %v5242_v4 = vld [vmem:[%s7733_s7 + $0x38] sm:$0xff] }
 0x9bf   : > { %v2710_v17 = vpop.trf.xlu0 }
 0x9c0   : > { %4276 = vmatmul.mubr.msk.f32.vlgmr.msra.gmra.mrb[2].mxu0 %vm1545_vm11, %v2710_v17  ;;  %v2742_v39 = vpop.trf.xlu1 }
 0x9c1   : > { %2924 = vmatprep.mubr.f32.mxu0 %v6659_v48 }
 0x9c3   : > { %v2711_v1 = vpop.trf.xlu0 }
 0x9c4   : > { %4277 = vmatmul.mubr.msk.f32.gmra.mrb[4].mxu0 %vm1545_vm11, %v2711_v1  ;;  %v2743_v26 = vpop.trf.xlu1 }
 0x9c5   : > { %2930 = vmatprep.mubr.f32.mxu0 %v6659_v48 }
 0x9c7   : > { %v2712_v36 = vpop.trf.xlu0 }
 0x9c8   : > { %4278 = vmatmul.mubr.msk.f32.gmra.mrb[6].mxu0 %vm1545_vm11, %v2712_v36  ;;  %v2744_v59 = vpop.trf.xlu1 }
 0x9c9   : > { %2936 = vmatprep.mubr.f32.mxu0 %v6659_v48 }
 0x9cb   : > { %v2713_v42 = vpop.trf.xlu0 }
 0x9cc   : > { %4279 = vmatmul.mubr.msk.f32.gmra.mrb[8].mxu0 %vm1545_vm11, %v2713_v42  ;;  %v2745_v10 = vpop.trf.xlu1  ;;  %v5243_v42 = vld [vmem:[%s7733_s7 + $0x40] sm:$0xff] }
 0x9cd   : > { %2942 = vmatprep.mubr.f32.mxu0 %v6659_v48 }
 0x9cf   : > { %v2714_v44 = vpop.trf.xlu0 }
 0x9d0   : > { %4280 = vmatmul.mubr.msk.f32.gmra.mrb[10].mxu0 %vm1545_vm11, %v2714_v44  ;;  %v2746_v57 = vpop.trf.xlu1 }
 0x9d1   : > { %2948 = vmatprep.mubr.f32.mxu0 %v6659_v48 }
 0x9d3   : > { %v2715_v5 = vpop.trf.xlu0 }
 0x9d4   : > { %4281 = vmatmul.mubr.msk.f32.gmra.mrb[12].mxu0 %vm1545_vm11, %v2715_v5  ;;  %v2747_v54 = vpop.trf.xlu1 }
 0x9d5   : > { %2954 = vmatprep.mubr.f32.mxu0 %v6659_v48 }
 0x9d7   : > { %v2716_v0 = vpop.trf.xlu0 }
 0x9d8   : > { %4282 = vmatmul.mubr.msk.f32.gmra.mrb[14].mxu0 %vm1545_vm11, %v2716_v0  ;;  %v2748_v13 = vpop.trf.xlu1  ;;  %v5244_v0 = vld [vmem:[%s7733_s7 + $0x48] sm:$0xff] }
 0x9d9   : > { %2960 = vmatprep.mubr.f32.mxu0 %v6659_v48 }
 0x9db   : > { %v2717_v28 = vpop.trf.xlu0 }
 0x9dc   : > { %4283 = vmatmul.mubr.msk.f32.gmra.mrb[16].mxu0 %vm1545_vm11, %v2717_v28  ;;  %v2749_v6 = vpop.trf.xlu1 }
 0x9dd   : > { %2966 = vmatprep.mubr.f32.mxu0 %v6659_v48 }
 0x9df   : > { %v2718_v33 = vpop.trf.xlu0 }
 0x9e0   : > { %4284 = vmatmul.mubr.msk.f32.gmra.mrb[18].mxu0 %vm1545_vm11, %v2718_v33  ;;  %v2750_v21 = vpop.trf.xlu1 }
 0x9e1   : > { %2972 = vmatprep.mubr.f32.mxu0 %v6659_v48 }
 0x9e3   : > { %v2719_v56 = vpop.trf.xlu0 }
 0x9e4   : > { %4285 = vmatmul.mubr.msk.f32.gmra.mrb[20].mxu0 %vm1545_vm11, %v2719_v56  ;;  %v2751_v55 = vpop.trf.xlu1  ;;  %v5245_v56 = vld [vmem:[%s7733_s7 + $0x50] sm:$0xff] }
 0x9e5   : > { %2978 = vmatprep.mubr.f32.mxu0 %v6659_v48 }
 0x9e7   : > { %v2720_v12 = vpop.trf.xlu0 }
 0x9e8   : > { %4286 = vmatmul.mubr.msk.f32.gmra.mrb[22].mxu0 %vm1545_vm11, %v2720_v12  ;;  %v2752_v63 = vpop.trf.xlu1 }
 0x9e9   : > { %2984 = vmatprep.mubr.f32.mxu0 %v6659_v48 }
 0x9eb   : > { %v2721_v51 = vpop.trf.xlu0 }
 0x9ec   : > { %4287 = vmatmul.mubr.msk.f32.gmra.mrb[24].mxu0 %vm1545_vm11, %v2721_v51  ;;  %v2753_v40 = vpop.trf.xlu1  ;;  %v5246_v51 = vld [vmem:[%s7733_s7 + $0x58] sm:$0xff] }
 0x9ed   : > { %2990 = vmatprep.mubr.f32.mxu0 %v6659_v48 }
 0x9ef   : > { %v2722_v58 = vpop.trf.xlu0 }
 0x9f0   : > { %4288 = vmatmul.mubr.msk.f32.gmra.mrb[26].mxu0 %vm1545_vm11, %v2722_v58  ;;  %v2754_v19 = vpop.trf.xlu1 }
 0x9f1   : > { %2996 = vmatprep.mubr.f32.mxu0 %v6659_v48 }
 0x9f3   : > { %v2723_v20 = vpop.trf.xlu0 }
 0x9f4   : > { %4289 = vmatmul.mubr.msk.f32.gmra.mrb[28].mxu0 %vm1545_vm11, %v2723_v20  ;;  %v2755_v11 = vpop.trf.xlu1  ;;  %v5247_v20 = vld [vmem:[%s7733_s7 + $0x60] sm:$0xff] }
 0x9f5   : > { %3002 = vmatprep.mubr.f32.mxu0 %v6659_v48 }
 0x9f7   : > { %v2724_v37 = vpop.trf.xlu0 }
 0x9f8   : > { %4290 = vmatmul.mubr.msk.f32.gmra.mrb[30].mxu0 %vm1545_vm11, %v2724_v37  ;;  %v2756_v30 = vpop.trf.xlu1 }
 0x9f9   : > { %3008 = vmatprep.mubr.f32.mxu0 %v6659_v48 }
 0x9fb   : > { %v2725_v15 = vpop.trf.xlu0 }
 0x9fc   : > { %4291 = vmatmul.mubr.msk.f32.gmra.mrb[32].mxu0 %vm1545_vm11, %v2725_v15  ;;  %v2757_v22 = vpop.trf.xlu1  ;;  %v5248_v15 = vld [vmem:[%s7733_s7 + $0x68] sm:$0xff] }
 0x9fd   : > { %3014 = vmatprep.mubr.f32.mxu0 %v6659_v48 }
 0xa00   : > { %4292 = vmatmul.mubr.msk.f32.gmra.mrb[34].mxu0 %vm1545_vm11, %v2742_v39 }
 0xa01   : > { %3020 = vmatprep.mubr.f32.mxu0 %v6659_v48 }
 0xa04   : > { %4293 = vmatmul.mubr.msk.f32.gmra.mrb[36].mxu0 %vm1545_vm11, %v2743_v26 }
 0xa05   : > { %3026 = vmatprep.mubr.f32.mxu0 %v6659_v48 }
 0xa08   : > { %4294 = vmatmul.mubr.msk.f32.gmra.mrb[38].mxu0 %vm1545_vm11, %v2744_v59 }
 0xa09   : > { %3032 = vmatprep.mubr.f32.mxu0 %v6659_v48 }
 0xa0c   : > { %4295 = vmatmul.mubr.msk.f32.gmra.mrb[40].mxu0 %vm1545_vm11, %v2745_v10 }
 0xa0d   : > { %3038 = vmatprep.mubr.f32.mxu0 %v6659_v48 }
 0xa10   : > { %4296 = vmatmul.mubr.msk.f32.gmra.mrb[42].mxu0 %vm1545_vm11, %v2746_v57 }
 0xa11   : > { %3044 = vmatprep.mubr.f32.mxu0 %v6659_v48 }
 0xa14   : > { %4297 = vmatmul.mubr.msk.f32.gmra.mrb[44].mxu0 %vm1545_vm11, %v2747_v54 }
 0xa15   : > { %3050 = vmatprep.mubr.f32.mxu0 %v6659_v48 }
 0xa18   : > { %4298 = vmatmul.mubr.msk.f32.gmra.mrb[46].mxu0 %vm1545_vm11, %v2748_v13 }
 0xa19   : > { %3056 = vmatprep.mubr.f32.mxu0 %v6659_v48 }
 0xa1c   : > { %4299 = vmatmul.mubr.msk.f32.gmra.mrb[48].mxu0 %vm1545_vm11, %v2749_v6 }
 0xa1d   : > { %3062 = vmatprep.mubr.f32.mxu0 %v6659_v48 }
 0xa20   : > { %4300 = vmatmul.mubr.msk.f32.gmra.mrb[50].mxu0 %vm1545_vm11, %v2750_v21  ;;  %v5249_v21 = vld [vmem:[%s7733_s7 + $0x70] sm:$0xff] }
 0xa21   : > { %3068 = vmatprep.mubr.f32.mxu0 %v6659_v48 }
 0xa24   : > { %4301 = vmatmul.mubr.msk.f32.gmra.mrb[52].mxu0 %vm1545_vm11, %v2751_v55 }
 0xa25   : > { %3074 = vmatprep.mubr.f32.mxu0 %v6659_v48 }
 0xa28   : > { %4302 = vmatmul.mubr.msk.f32.gmra.mrb[54].mxu0 %vm1545_vm11, %v2752_v63 }
 0xa29   : > { %3080 = vmatprep.mubr.f32.mxu0 %v6659_v48 }
 0xa2c   : > { %4303 = vmatmul.mubr.msk.f32.gmra.mrb[56].mxu0 %vm1545_vm11, %v2753_v40  ;;  %v5250_v40 = vld [vmem:[%s7733_s7 + $0x78] sm:$0xff] }
 0xa2d   : > { %3086 = vmatprep.mubr.f32.mxu0 %v6659_v48 }
 0xa30   : > { %4304 = vmatmul.mubr.msk.f32.gmra.mrb[58].mxu0 %vm1545_vm11, %v2754_v19 }
 0xa31   : > { %3092 = vmatprep.mubr.f32.mxu0 %v6659_v48 }
 0xa34   : > { %4305 = vmatmul.mubr.msk.f32.gmra.mrb[60].mxu0 %vm1545_vm11, %v2755_v11 }
 0xa35   : > { %3098 = vmatprep.mubr.f32.mxu0 %v6659_v48 }
 0xa38   : > { %4306 = vmatmul.mubr.msk.f32.gmra.mrb[62].mxu0 %vm1545_vm11, %v2756_v30 }
 0xa39   : > { %3104 = vmatprep.mubr.f32.mxu0 %v6659_v48 }
 0xa3c   : > { %4307 = vmatmul.mubr.msk.f32.gmra.mrb[64].mxu0 %vm1545_vm11, %v2757_v22  ;;  %v5251_v22 = vld [vmem:[%s7733_s7 + $0x80] sm:$0xff] }
 0xa3d   : > { %3655 = vmatprep.mubr.f32.mxu0 %v2680_v35 }
 0xa93   : > { %v2920_v31 = vpop.f32.mrb[2].mxu0 }
 0xa94   : > { %v6765_v61 = vadd.f32 %v5235_v16, %v2920_v31  ;;  %v2922_v3 = vpop.f32.mrb[3].mxu0  ;;  %v5252_v16 = vld [vmem:[%s7733_s7 + $0x88] sm:$0xff] }
 0xa95   : > { %v6770_v14 = vadd.f32 %v5236_v50, %v2922_v3 }
 0xa97   : > { %v3111_v48 = vmax.f32 %v6765_v61, %v6770_v14  ;;  %v2926_v34 = vpop.f32.mrb[4].mxu0 }
 0xa98   : > { %v6777_v24 = vadd.f32 %v5237_v29, %v2926_v34  ;;  %v2928_v27 = vpop.f32.mrb[5].mxu0  ;;  %v5253_v34 = vld [vmem:[%s7733_s7 + $0x90] sm:$0xff] }
 0xa99   : > { %v6782_v41 = vadd.f32 %v5238_v7, %v2928_v27  ;;  %3112 = vmax.xlane.f32.xlu0 %v3111_v48  ;;  %v5254_v7 = vld [vmem:[%s7733_s7 + $0x98] sm:$0xff] }
 0xa9b   : > { %v3114_v8 = vmax.f32 %v6777_v24, %v6782_v41  ;;  %v2932_v45 = vpop.f32.mrb[6].mxu0 }
 0xa9c   : > { %v6789_v25 = vadd.f32 %v5239_v23, %v2932_v45  ;;  %v2934_v46 = vpop.f32.mrb[7].mxu0 }
 0xa9d   : > { %v6794_v52 = vadd.f32 %v5240_v62, %v2934_v46  ;;  %3115 = vmax.xlane.f32.xlu1 %v3114_v8  ;;  %v5255_v46 = vld [vmem:[%s7733_s7 + $0xa0] sm:$0xff] }
 0xa9f   : > { %v3117_v18 = vmax.f32 %v6789_v25, %v6794_v52  ;;  %v2938_v32 = vpop.f32.mrb[8].mxu0 }
 0xaa0   : > { %v6801_v9 = vadd.f32 %v5241_v43, %v2938_v32  ;;  %v2940_v2 = vpop.f32.mrb[9].mxu0  ;;  %v5256_v32 = vld [vmem:[%s7733_s7 + $0xa8] sm:$0xff] }
 0xaa1   : > { %v6806_v17 = vadd.f32 %v5242_v4, %v2940_v2  ;;  %3118 = vmax.xlane.f32.xlu0 %v3117_v18 }
 0xaa3   : > { %v3120_v1 = vmax.f32 %v6801_v9, %v6806_v17  ;;  %v2944_v36 = vpop.f32.mrb[10].mxu0 }
 0xaa4   : > { %v6813_v44 = vadd.f32 %v5243_v42, %v2944_v36  ;;  %v2946_v5 = vpop.f32.mrb[11].mxu0 }
 0xaa5   : > { %v6818_v28 = vadd.f32 %v5244_v0, %v2946_v5  ;;  %3121 = vmax.xlane.f32.xlu0 %v3120_v1  ;;  %v5257_v1 = vld [vmem:[%s7733_s7 + $0xb0] sm:$0xff]  ;;  %v5258_v5 = vld [vmem:[%s7733_s7 + $0xb8] sm:$0xff] }
 0xaa7   : > { %v3123_v33 = vmax.f32 %v6813_v44, %v6818_v28  ;;  %v2950_v39 = vpop.f32.mrb[12].mxu0 }
 0xaa8   : > { %v6825_v26 = vadd.f32 %v5245_v56, %v2950_v39  ;;  %v2952_v12 = vpop.f32.mrb[13].mxu0  ;;  %v5259_v56 = vld [vmem:[%s7733_s7 + $0xc0] sm:$0xff] }
 0xaa9   : > { %v6830_v59 = vadd.f32 %v5246_v51, %v2952_v12  ;;  %3124 = vmax.xlane.f32.xlu1 %v3123_v33 }
 0xaab   : > { %v3126_v58 = vmax.f32 %v6825_v26, %v6830_v59  ;;  %v2956_v10 = vpop.f32.mrb[14].mxu0 }
 0xaac   : > { %v6837_v37 = vadd.f32 %v5247_v20, %v2956_v10  ;;  %v2958_v57 = vpop.f32.mrb[15].mxu0 }
 0xaad   : > { %v6842_v54 = vadd.f32 %v5248_v15, %v2958_v57  ;;  %3127 = vmax.xlane.f32.xlu0 %v3126_v58  ;;  %v5260_v58 = vld [vmem:[%s7733_s7 + $0xc8] sm:$0xff]  ;;  %v5261_v15 = vld [vmem:[%s7733_s7 + $0xd0] sm:$0xff] }
 0xaaf   : > { %v3129_v13 = vmax.f32 %v6837_v37, %v6842_v54  ;;  %v2962_v6 = vpop.f32.mrb[16].mxu0 }
 0xab0   : > { %v6849_v55 = vadd.f32 %v5249_v21, %v2962_v6  ;;  %v2964_v63 = vpop.f32.mrb[17].mxu0  ;;  %v5262_v21 = vld [vmem:[%s7733_s7 + $0xd8] sm:$0xff] }
 0xab1   : > { %v6854_v19 = vadd.f32 %v5250_v40, %v2964_v63  ;;  %3130 = vmax.xlane.f32.xlu1 %v3129_v13 }
 0xab3   : > { %v3132_v11 = vmax.f32 %v6849_v55, %v6854_v19  ;;  %v2968_v30 = vpop.f32.mrb[18].mxu0 }
 0xab4   : > { %v6861_v35 = vadd.f32 %v5251_v22, %v2968_v30  ;;  %v2970_v31 = vpop.f32.mrb[19].mxu0  ;;  %v5263_v30 = vld [vmem:[%s7733_s7 + $0xe0] sm:$0xff] }
 0xab5   : > { %v6866_v3 = vadd.f32 %v5252_v16, %v2970_v31  ;;  %3133 = vmax.xlane.f32.xlu0 %v3132_v11  ;;  %v5264_v16 = vld [vmem:[%s7733_s7 + $0xe8] sm:$0xff] }
 0xab7   : > { %v3135_v50 = vmax.f32 %v6861_v35, %v6866_v3  ;;  %v2974_v48 = vpop.f32.mrb[20].mxu0 }
 0xab8   : > { %v6873_v29 = vadd.f32 %v5253_v34, %v2974_v48  ;;  %v2976_v27 = vpop.f32.mrb[21].mxu0 }
 0xab9   : > { %v6878_v8 = vadd.f32 %v5254_v7, %v2976_v27  ;;  %3136 = vmax.xlane.f32.xlu1 %v3135_v50  ;;  %v5265_v27 = vld [vmem:[%s7733_s7 + $0xf0] sm:$0xff] }
 0xabb   : > { %v3138_v45 = vmax.f32 %v6873_v29, %v6878_v8  ;;  %v2980_v23 = vpop.f32.mrb[22].mxu0 }
 0xabc   : > { %v6885_v62 = vadd.f32 %v5255_v46, %v2980_v23  ;;  %v2982_v18 = vpop.f32.mrb[23].mxu0  ;;  %v5266_v23 = vld [vmem:[%s7733_s7 + $0xf8] sm:$0xff] }
 0xabd   : > { %v6890_v43 = vadd.f32 %v5256_v32, %v2982_v18  ;;  %3139 = vmax.xlane.f32.xlu0 %v3138_v45 }
 0xabf   : > { %v3141_v2 = vmax.f32 %v6885_v62, %v6890_v43  ;;  %v2986_v4 = vpop.f32.mrb[24].mxu0 }
 0xac0   : > { %v6897_v36 = vadd.f32 %v5257_v1, %v2986_v4  ;;  %v2988_v42 = vpop.f32.mrb[25].mxu0 }
 0xac1   : > { %v6902_v0 = vadd.f32 %v5258_v5, %v2988_v42  ;;  %3142 = vmax.xlane.f32.xlu1 %v3141_v2  ;;  %v5267_v2 = vld [vmem:[%s7733_s7 + $0x100] sm:$0xff]  ;;  %v5268_v42 = vld [vmem:[%s7733_s7 + $0x108] sm:$0xff] }
 0xac3   : > { %v3144_v33 = vmax.f32 %v6897_v36, %v6902_v0  ;;  %v2992_v39 = vpop.f32.mrb[26].mxu0 }
 0xac4   : > { %v6909_v12 = vadd.f32 %v5259_v56, %v2992_v39  ;;  %v2994_v51 = vpop.f32.mrb[27].mxu0  ;;  %v5269_v56 = vld [vmem:[%s7733_s7 + $0x110] sm:$0xff] }
 0xac5   : > { %v6914_v10 = vadd.f32 %v5260_v58, %v2994_v51  ;;  %3145 = vmax.xlane.f32.xlu0 %v3144_v33 }
 0xac7   : > { %v3147_v20 = vmax.f32 %v6909_v12, %v6914_v10  ;;  %v2998_v57 = vpop.f32.mrb[28].mxu0 }
 0xac8   : > { %v6921_v13 = vadd.f32 %v5261_v15, %v2998_v57  ;;  %v3000_v6 = vpop.f32.mrb[29].mxu0 }
 0xac9   : > { %v6926_v63 = vadd.f32 %v5262_v21, %v3000_v6  ;;  %3148 = vmax.xlane.f32.xlu1 %v3147_v20  ;;  %v5270_v20 = vld [vmem:[%s7733_s7 + $0x118] sm:$0xff]  ;;  %v5271_v21 = vld [vmem:[%s7733_s7 + $0x120] sm:$0xff] }
 0xacb   : > { %v3150_v40 = vmax.f32 %v6921_v13, %v6926_v63  ;;  %v3004_v11 = vpop.f32.mrb[30].mxu0 }
 0xacc   : > { %v6933_v22 = vadd.f32 %v5263_v30, %v3004_v11  ;;  %v3006_v31 = vpop.f32.mrb[31].mxu0  ;;  %v5272_v30 = vld [vmem:[%s7733_s7 + $0x128] sm:$0xff] }
 0xacd   : > { %v6938_v50 = vadd.f32 %v5264_v16, %v3006_v31  ;;  %3151 = vmax.xlane.f32.xlu0 %v3150_v40 }
 0xacf   : > { %v3153_v48 = vmax.f32 %v6933_v22, %v6938_v50  ;;  %v3010_v34 = vpop.f32.mrb[32].mxu0 }
 0xad0   : > { %v6945_v7 = vadd.f32 %v5265_v27, %v3010_v34  ;;  %v3012_v45 = vpop.f32.mrb[33].mxu0  ;;  %v5273_v34 = vld [vmem:[%s7733_s7 + $0x130] sm:$0xff] }
 0xad1   : > { %v6950_v46 = vadd.f32 %v5266_v23, %v3012_v45  ;;  %3154 = vmax.xlane.f32.xlu1 %v3153_v48  ;;  %v5274_v23 = vld [vmem:[%s7733_s7 + $0x138] sm:$0xff] }
 0xad3   : > { %v3156_v18 = vmax.f32 %v6945_v7, %v6950_v46  ;;  %v3016_v32 = vpop.f32.mrb[34].mxu0 }
 0xad4   : > { %v6957_v4 = vadd.f32 %v5267_v2, %v3016_v32  ;;  %v3018_v1 = vpop.f32.mrb[35].mxu0 }
 0xad5   : > { %v6962_v5 = vadd.f32 %v5268_v42, %v3018_v1  ;;  %3157 = vmax.xlane.f32.xlu0 %v3156_v18  ;;  %v5275_v1 = vld [vmem:[%s7733_s7 + $0x140] sm:$0xff] }
 0xad7   : > { %v3159_v33 = vmax.f32 %v6957_v4, %v6962_v5  ;;  %v3022_v39 = vpop.f32.mrb[36].mxu0 }
 0xad8   : > { %v6969_v51 = vadd.f32 %v5269_v56, %v3022_v39  ;;  %v3024_v58 = vpop.f32.mrb[37].mxu0  ;;  %v5276_v39 = vld [vmem:[%s7733_s7 + $0x148] sm:$0xff] }
 0xad9   : > { %v6974_v57 = vadd.f32 %v5270_v20, %v3024_v58  ;;  %3160 = vmax.xlane.f32.xlu1 %v3159_v33 }
 0xadb   : > { %7891 = vst [vmem:[#allocation15_spill] sm:$0xff] %v6974_v57  ;;  %v3162_v15 = vmax.f32 %v6969_v51, %v6974_v57  ;;  %v3028_v6 = vpop.f32.mrb[38].mxu0 }
 0xadc   : > { %v6981_v40 = vadd.f32 %v5271_v21, %v3028_v6  ;;  %v3030_v11 = vpop.f32.mrb[39].mxu0 }
 0xadd   : > { %v6986_v31 = vadd.f32 %v5272_v30, %v3030_v11  ;;  %3163 = vmax.xlane.f32.xlu0 %v3162_v15  ;;  %v5277_v15 = vld [vmem:[%s7733_s7 + $0x150] sm:$0xff]  ;;  %v5278_v11 = vld [vmem:[%s7733_s7 + $0x158] sm:$0xff] }
 0xade   : > { %7892 = vst [vmem:[#allocation20_spill] sm:$0xff] %v6981_v40 }
 0xadf   : > { %7893 = vst [vmem:[#allocation22_spill] sm:$0xff] %v6986_v31  ;;  %v3165_v16 = vmax.f32 %v6981_v40, %v6986_v31  ;;  %v3034_v48 = vpop.f32.mrb[40].mxu0 }
 0xae0   : > { %v6993_v27 = vadd.f32 %v5273_v34, %v3034_v48  ;;  %v3036_v45 = vpop.f32.mrb[41].mxu0  ;;  %v5279_v34 = vld [vmem:[%s7733_s7 + $0x160] sm:$0xff] }
 0xae1   : > { %v6998_v18 = vadd.f32 %v5274_v23, %v3036_v45  ;;  %3166 = vmax.xlane.f32.xlu1 %v3165_v16 }
 0xae2   : > { %7894 = vst [vmem:[#allocation21_spill] sm:$0xff] %v6993_v27 }
 0xae3   : > { %7895 = vst [vmem:[#allocation19_spill] sm:$0xff] %v6998_v18  ;;  %v3168_v32 = vmax.f32 %v6993_v27, %v6998_v18  ;;  %v3040_v2 = vpop.f32.mrb[42].mxu0 }
 0xae4   : > { %v7005_v42 = vadd.f32 %v5275_v1, %v3040_v2  ;;  %v3042_v33 = vpop.f32.mrb[43].mxu0 }
 0xae5   : > { %v7010_v56 = vadd.f32 %v5276_v39, %v3042_v33  ;;  %3169 = vmax.xlane.f32.xlu0 %v3168_v32  ;;  %v5280_v32 = vld [vmem:[%s7733_s7 + $0x168] sm:$0xff]  ;;  %v5281_v39 = vld [vmem:[%s7733_s7 + $0x170] sm:$0xff] }
 0xae6   : > { %7896 = vst [vmem:[#allocation24_spill] sm:$0xff] %v7005_v42 }
 0xae7   : > { %7897 = vst [vmem:[#allocation26_spill] sm:$0xff] %v7010_v56  ;;  %v3171_v58 = vmax.f32 %v7005_v42, %v7010_v56  ;;  %v3046_v20 = vpop.f32.mrb[44].mxu0 }
 0xae8   : > { %v7017_v6 = vadd.f32 %v5277_v15, %v3046_v20  ;;  %v3048_v21 = vpop.f32.mrb[45].mxu0  ;;  %v5282_v15 = vld [vmem:[%s7733_s7 + $0x178] sm:$0xff] }
 0xae9   : > { %v7022_v30 = vadd.f32 %v5278_v11, %v3048_v21  ;;  %3172 = vmax.xlane.f32.xlu1 %v3171_v58 }
 0xaea   : > { %7898 = vst [vmem:[#allocation25_spill] sm:$0xff] %v7017_v6 }
 0xaeb   : > { %7899 = vst [vmem:[#allocation23_spill] sm:$0xff] %v7022_v30  ;;  %v3174_v16 = vmax.f32 %v7017_v6, %v7022_v30  ;;  %v3052_v48 = vpop.f32.mrb[46].mxu0 }
 0xaec   : > { %v7029_v45 = vadd.f32 %v5279_v34, %v3052_v48  ;;  %v3054_v23 = vpop.f32.mrb[47].mxu0 }
 0xaed   : > { %v7034_v2 = vadd.f32 %v5280_v32, %v3054_v23  ;;  %3175 = vmax.xlane.f32.xlu0 %v3174_v16 }
 0xaee   : > { %7900 = vst [vmem:[#allocation10_spill] sm:$0xff] %v7029_v45 }
 0xaef   : > { %7901 = vst [vmem:[#allocation9_spill] sm:$0xff] %v7034_v2  ;;  %v3177_v1 = vmax.f32 %v7029_v45, %v7034_v2  ;;  %v3058_v33 = vpop.f32.mrb[48].mxu0 }
 0xaf0   : > { %v7041_v58 = vadd.f32 %v5281_v39, %v3058_v33  ;;  %v3060_v20 = vpop.f32.mrb[49].mxu0 }
 0xaf1   : > { %v7046_v21 = vadd.f32 %v5282_v15, %v3060_v20  ;;  %3178 = vmax.xlane.f32.xlu1 %v3177_v1 }
 0xaf2   : > { %7902 = vst [vmem:[#allocation7_spill] sm:$0xff] %v7041_v58 }
 0xaf3   : > { %7903 = vst [vmem:[#allocation8_spill] sm:$0xff] %v7046_v21  ;;  %v3180_v11 = vmax.f32 %v7041_v58, %v7046_v21  ;;  %v3064_v16 = vpop.f32.mrb[50].mxu0 }
 0xaf4   : > { %v3066_v48 = vpop.f32.mrb[51].mxu0 }
 0xaf5   : > { %3181 = vmax.xlane.f32.xlu0 %v3180_v11 }
 0xaf7   : > { %v3070_v34 = vpop.f32.mrb[52].mxu0 }
 0xaf8   : > { %v3072_v23 = vpop.f32.mrb[53].mxu0 }
 0xafb   : > { %v7050_v32 = vpop.f32.mrb[54].mxu0 }
 0xafc   : > { %v7052_v33 = vpop.f32.mrb[55].mxu0 }
 0xaff   : > { %v7054_v39 = vpop.f32.mrb[56].mxu0 }
 0xb00   : > { %v7056_v38 = vpop.f32.mrb[57].mxu0 }
 0xb03   : > { %v7058_v47 = vpop.f32.mrb[58].mxu0 }
 0xb04   : > { %v7060_v20 = vpop.f32.mrb[59].mxu0 }
 0xb07   : > { %v7062_v1 = vpop.f32.mrb[60].mxu0 }
 0xb08   : > { %v7064_v15 = vpop.f32.mrb[61].mxu0 }
 0xb0b   : > { %v7066_v49 = vpop.f32.mrb[62].mxu0 }
 0xb0c   : > { %v7068_v11 = vpop.f32.mrb[63].mxu0 }
 0xb0f   : > { %v7070_v60 = vpop.f32.mrb[64].mxu0 }
 0xb10   : > { %v7072_v53 = vpop.f32.mrb[65].mxu0 }
 0xb26   : > { %v3113_v21 = vpop.xlane.xlu0 %3112 }
 0xb27   : > { %v3207_v58 = vsub.f32 %v6765_v61, %v3113_v21  ;;  %v3208_v2 = vsub.f32 %v6770_v14, %v3113_v21 }
 0xb29   : > { %v3271_v45 = vmul.f32 1.442695, %v3207_v58  ;;  %v3273_v30 = vmul.f32 1.442695, %v3208_v2 }
 0xb2a   : > { %v3116_v6 = vpop.xlane.xlu1 %3115 }
 0xb2b   : > { %5036 = vpow2.f32 %v3271_v45  ;;  %v3209_v56 = vsub.f32 %v6777_v24, %v3116_v6  ;;  %v3210_v42 = vsub.f32 %v6782_v41, %v3116_v6  ;;  %v5283_v41 = vld [vmem:[%s7733_s7 + $0x180] sm:$0xff] }
 0xb2c   : > { %5038 = vpow2.f32 %v3273_v30 }
 0xb2d   : > { %v3275_v18 = vmul.f32 1.442695, %v3209_v56  ;;  %v3277_v27 = vmul.f32 1.442695, %v3210_v42  ;;  %v7085_v42 = vadd.f32 %v5283_v41, %v3064_v16  ;;  %v5285_v16 = vld [vmem:[%s7733_s7 + $0x190] sm:$0xff] }
 0xb2e   : > { %v3119_v31 = vpop.xlane.xlu0 %3118 }
 0xb2f   : > { %5040 = vpow2.f32 %v3275_v18  ;;  %v3211_v40 = vsub.f32 %v6789_v25, %v3119_v31  ;;  %v3212_v57 = vsub.f32 %v6794_v52, %v3119_v31  ;;  %v5284_v25 = vld [vmem:[%s7733_s7 + $0x188] sm:$0xff] }
 0xb30   : > { %5042 = vpow2.f32 %v3277_v27  ;;  %v7090_v52 = vadd.f32 %v5284_v25, %v3066_v48  ;;  %v7107_v48 = vadd.f32 %v5285_v16, %v3070_v34  ;;  %v5287_v34 = vld [vmem:[%s7733_s7 + $0x1a0] sm:$0xff] }
 0xb31   : > { %v3279_v61 = vmul.f32 1.442695, %v3211_v40  ;;  %v3281_v14 = vmul.f32 1.442695, %v3212_v57  ;;  %v7124_v41 = vadd.f32 %v5287_v34, %v7050_v32 }
 0xb32   : > { %v3122_v58 = vpop.xlane.xlu0 %3121  ;;  %v3183_v6 = vmax.f32 %v7085_v42, %v7090_v52 }
 0xb33   : > { %5044 = vpow2.f32 %v3279_v61  ;;  %v3213_v45 = vsub.f32 %v6801_v9, %v3122_v58  ;;  %v3214_v24 = vsub.f32 %v6806_v17, %v3122_v58 }
 0xb34   : > { %5046 = vpow2.f32 %v3281_v14 }
 0xb35   : > { %v7092_v57 = vpop.eup %5036  ;;  %v3283_v40 = vmul.f32 1.442695, %v3213_v45  ;;  %v3285_v31 = vmul.f32 1.442695, %v3214_v24 }
 0xb36   : > { %v7094_v9 = vpop.eup %5038  ;;  %v3125_v17 = vpop.xlane.xlu1 %3124 }
 0xb37   : > { %5048 = vpow2.f32 %v3283_v40  ;;  %v3215_v27 = vsub.f32 %v6813_v44, %v3125_v17  ;;  %v3216_v18 = vsub.f32 %v6818_v28, %v3125_v17  ;;  %v3399_v56 = vadd.f32 %v7094_v9, %v7092_v57  ;;  %v5286_v44 = vld [vmem:[%s7733_s7 + $0x198] sm:$0xff] }
 0xb38   : > { %5050 = vpow2.f32 %v3285_v31  ;;  %v7112_v28 = vadd.f32 %v5286_v44, %v3072_v23  ;;  %v5288_v23 = vld [vmem:[%s7733_s7 + $0x1a8] sm:$0xff] }
 0xb39   : > { %v7102_v30 = vpop.eup %5040  ;;  %v3287_v2 = vmul.f32 1.442695, %v3215_v27  ;;  %v3289_v21 = vmul.f32 1.442695, %v3216_v18  ;;  %3400 = vadd.xlane.f32.xlu1 %v3399_v56  ;;  %v7130_v25 = vadd.f32 %v5288_v23, %v7052_v33 }
 0xb3a   : > { %v7114_v61 = vpop.eup %5042  ;;  %v3128_v14 = vpop.xlane.xlu0 %3127  ;;  %v3186_v31 = vmax.f32 %v7107_v48, %v7112_v28 }
 0xb3b   : > { %5052 = vpow2.f32 %v3287_v2  ;;  %v3217_v58 = vsub.f32 %v6825_v26, %v3128_v14  ;;  %v3218_v45 = vsub.f32 %v6830_v59, %v3128_v14  ;;  %v3402_v24 = vadd.f32 %v7114_v61, %v7102_v30 }
 0xb3c   : > { %5054 = vpow2.f32 %v3289_v21  ;;  %v3189_v56 = vmax.f32 %v7124_v41, %v7130_v25 }
 0xb3d   : > { %v7132_v26 = vpop.eup %5044  ;;  %v3291_v59 = vmul.f32 1.442695, %v3217_v58  ;;  %v3293_v40 = vmul.f32 1.442695, %v3218_v45  ;;  %3403 = vadd.xlane.f32.xlu0 %v3402_v24  ;;  %3184 = vmax.xlane.f32.xlu1 %v3183_v6  ;;  %v5289_v6 = vld [vmem:[%s7733_s7 + $0x1b0] sm:$0xff] }
 0xb3e   : > { %v7136_v17 = vpop.eup %5046  ;;  %v3131_v32 = vpop.xlane.xlu1 %3130 }
 0xb3f   : > { %5056 = vpow2.f32 %v3291_v59  ;;  %v3219_v27 = vsub.f32 %v6837_v37, %v3131_v32  ;;  %v3220_v18 = vsub.f32 %v6842_v54, %v3131_v32  ;;  %v3405_v33 = vadd.f32 %v7136_v17, %v7132_v26  ;;  %v5290_v54 = vld [vmem:[%s7733_s7 + $0x1b8] sm:$0xff] }
 0xb40   : > { %5058 = vpow2.f32 %v3293_v40  ;;  %v7150_v37 = vadd.f32 %v5289_v6, %v7054_v39  ;;  %v7156_v44 = vadd.f32 %v5290_v54, %v7056_v38  ;;  %v5291_v39 = vld [vmem:[%s7733_s7 + $0x1c0] sm:$0xff]  ;;  %v5292_v38 = vld [vmem:[%s7733_s7 + $0x1c8] sm:$0xff]  ;;  %v5293_v6 = vld [vmem:[%s7733_s7 + $0x1d0] sm:$0xff] }
 0xb41   : > { %v7144_v2 = vpop.eup %5048  ;;  %v3295_v21 = vmul.f32 1.442695, %v3219_v27  ;;  %v3297_v16 = vmul.f32 1.442695, %v3220_v18  ;;  %3187 = vmax.xlane.f32.xlu0 %v3186_v31  ;;  %3406 = vadd.xlane.f32.xlu1 %v3405_v33  ;;  %v7168_v23 = vadd.f32 %v5291_v39, %v7058_v47  ;;  %v7174_v59 = vadd.f32 %v5292_v38, %v7060_v20 }
 0xb42   : > { %v7158_v14 = vpop.eup %5050  ;;  %v3134_v58 = vpop.xlane.xlu0 %3133  ;;  %v3192_v31 = vmax.f32 %v7150_v37, %v7156_v44 }
 0xb43   : > { %5060 = vpow2.f32 %v3295_v21  ;;  %v3221_v45 = vsub.f32 %v6849_v55, %v3134_v58  ;;  %v3222_v24 = vsub.f32 %v6854_v19, %v3134_v58  ;;  %v3408_v34 = vadd.f32 %v7158_v14, %v7144_v2 }
 0xb44   : > { %5062 = vpow2.f32 %v3297_v16  ;;  %v3195_v33 = vmax.f32 %v7168_v23, %v7174_v59 }
 0xb45   : > { %v7176_v55 = vpop.eup %5052  ;;  %v3299_v19 = vmul.f32 1.442695, %v3221_v45  ;;  %v3301_v40 = vmul.f32 1.442695, %v3222_v24  ;;  %3190 = vmax.xlane.f32.xlu1 %v3189_v56  ;;  %3409 = vadd.xlane.f32.xlu0 %v3408_v34 }
 0xb46   : > { %v7180_v32 = vpop.eup %5054  ;;  %v3137_v47 = vpop.xlane.xlu1 %3136 }
 0xb47   : > { %5064 = vpow2.f32 %v3299_v19  ;;  %v3223_v27 = vsub.f32 %v6861_v35, %v3137_v47  ;;  %v3224_v18 = vsub.f32 %v6866_v3, %v3137_v47  ;;  %v3411_v20 = vadd.f32 %v7180_v32, %v7176_v55  ;;  %v5294_v3 = vld [vmem:[%s7733_s7 + $0x1d8] sm:$0xff] }
 0xb48   : > { %5066 = vpow2.f32 %v3301_v40  ;;  %v7194_v35 = vadd.f32 %v5293_v6, %v7062_v1  ;;  %v7200_v54 = vadd.f32 %v5294_v3, %v7064_v15  ;;  %v5295_v1 = vld [vmem:[%s7733_s7 + $0x1e0] sm:$0xff]  ;;  %v5296_v15 = vld [vmem:[%s7733_s7 + $0x1e8] sm:$0xff]  ;;  %v5297_v6 = vld [vmem:[%s7733_s7 + $0x1f0] sm:$0xff] }
 0xb49   : > { %v7188_v21 = vpop.eup %5056  ;;  %v3303_v16 = vmul.f32 1.442695, %v3223_v27  ;;  %v3305_v56 = vmul.f32 1.442695, %v3224_v18  ;;  %3412 = vadd.xlane.f32.xlu1 %v3411_v20  ;;  %3193 = vmax.xlane.f32.xlu0 %v3192_v31  ;;  %v7212_v38 = vadd.f32 %v5295_v1, %v7066_v49  ;;  %v7218_v19 = vadd.f32 %v5296_v15, %v7068_v11 }
 0xb4a   : > { %v7202_v58 = vpop.eup %5058  ;;  %v3140_v45 = vpop.xlane.xlu0 %3139  ;;  %v3198_v31 = vmax.f32 %v7194_v35, %v7200_v54 }
 0xb4b   : > { %5068 = vpow2.f32 %v3303_v16  ;;  %v3225_v24 = vsub.f32 %v6873_v29, %v3140_v45  ;;  %v3226_v34 = vsub.f32 %v6878_v8, %v3140_v45  ;;  %v3414_v39 = vadd.f32 %v7202_v58, %v7188_v21 }
 0xb4c   : > { %5070 = vpow2.f32 %v3305_v56  ;;  %v3201_v20 = vmax.f32 %v7212_v38, %v7218_v19 }
 0xb4d   : > { %v7220_v29 = vpop.eup %5060  ;;  %v3307_v8 = vmul.f32 1.442695, %v3225_v24  ;;  %v3309_v40 = vmul.f32 1.442695, %v3226_v34  ;;  %3196 = vmax.xlane.f32.xlu1 %v3195_v33  ;;  %3415 = vadd.xlane.f32.xlu0 %v3414_v39 }
 0xb4e   : > { %v7224_v47 = vpop.eup %5062  ;;  %v3143_v49 = vpop.xlane.xlu1 %3142 }
 0xb4f   : > { %5072 = vpow2.f32 %v3307_v8  ;;  %v3227_v27 = vsub.f32 %v6885_v62, %v3143_v49  ;;  %v3228_v18 = vsub.f32 %v6890_v43, %v3143_v49  ;;  %v3417_v11 = vadd.f32 %v7224_v47, %v7220_v29  ;;  %v5298_v43 = vld [vmem:[%s7733_s7 + $0x1f8] sm:$0xff] }
 0xb50   : > { %5074 = vpow2.f32 %v3309_v40  ;;  %v7238_v62 = vadd.f32 %v5297_v6, %v7070_v60  ;;  %v7244_v3 = vadd.f32 %v5298_v43, %v7072_v53 }
 0xb51   : > { %v7232_v16 = vpop.eup %5064  ;;  %v3311_v56 = vmul.f32 1.442695, %v3227_v27  ;;  %v3313_v33 = vmul.f32 1.442695, %v3228_v18  ;;  %3418 = vadd.xlane.f32.xlu1 %v3417_v11  ;;  %3199 = vmax.xlane.f32.xlu0 %v3198_v31 }
 0xb52   : > { %v7246_v45 = vpop.eup %5066  ;;  %v3146_v24 = vpop.xlane.xlu0 %3145  ;;  %v3204_v53 = vmax.f32 %v7238_v62, %v7244_v3 }
 0xb53   : > { %5076 = vpow2.f32 %v3311_v56  ;;  %v3229_v34 = vsub.f32 %v6897_v36, %v3146_v24  ;;  %v3230_v39 = vsub.f32 %v6902_v0, %v3146_v24  ;;  %v3420_v1 = vadd.f32 %v7246_v45, %v7232_v16 }
 0xb54   : > { %5078 = vpow2.f32 %v3313_v33 }
 0xb55   : > { %v7252_v60 = vpop.eup %5068  ;;  %v3315_v15 = vmul.f32 1.442695, %v3229_v34  ;;  %v3317_v8 = vmul.f32 1.442695, %v3230_v39  ;;  %3202 = vmax.xlane.f32.xlu1 %v3201_v20  ;;  %3421 = vadd.xlane.f32.xlu0 %v3420_v1 }
 0xb56   : > { %v7256_v40 = vpop.eup %5070  ;;  %v3149_v31 = vpop.xlane.xlu1 %3148 }
 0xb57   : > { %5080 = vpow2.f32 %v3315_v15  ;;  %v3231_v36 = vsub.f32 %v6909_v12, %v3149_v31  ;;  %v3232_v0 = vsub.f32 %v6914_v10, %v3149_v31  ;;  %v3423_v49 = vadd.f32 %v7256_v40, %v7252_v60 }
 0xb58   : > { %5082 = vpow2.f32 %v3317_v8 }
 0xb59   : > { %v7262_v27 = vpop.eup %5072  ;;  %v3319_v18 = vmul.f32 1.442695, %v3231_v36  ;;  %v3321_v11 = vmul.f32 1.442695, %v3232_v0  ;;  %3424 = vadd.xlane.f32.xlu1 %v3423_v49  ;;  %3205 = vmax.xlane.f32.xlu0 %v3204_v53 }
 0xb5a   : > { %v7264_v20 = vpop.eup %5074  ;;  %v3152_v56 = vpop.xlane.xlu0 %3151 }
 0xb5b   : > { %5084 = vpow2.f32 %v3319_v18  ;;  %v3233_v33 = vsub.f32 %v6921_v13, %v3152_v56  ;;  %v3234_v12 = vsub.f32 %v6926_v63, %v3152_v56  ;;  %v3426_v10 = vadd.f32 %v7264_v20, %v7262_v27 }
 0xb5c   : > { %5086 = vpow2.f32 %v3321_v11 }
 0xb5d   : > { %v7270_v6 = vpop.eup %5076  ;;  %v3323_v43 = vmul.f32 1.442695, %v3233_v33  ;;  %v3325_v24 = vmul.f32 1.442695, %v3234_v12  ;;  %3427 = vadd.xlane.f32.xlu0 %v3426_v10 }
 0xb5e   : > { %v7272_v34 = vpop.eup %5078  ;;  %v3155_v39 = vpop.xlane.xlu1 %3154 }
 0xb5f   : > { %5088 = vpow2.f32 %v3323_v43  ;;  %v3235_v1 = vsub.f32 %v6933_v22, %v3155_v39  ;;  %v3236_v15 = vsub.f32 %v6938_v50, %v3155_v39  ;;  %v3429_v13 = vadd.f32 %v7272_v34, %v7270_v6 }
 0xb60   : > { %5090 = vpow2.f32 %v3325_v24 }
 0xb61   : > { %v7278_v63 = vpop.eup %5080  ;;  %v3327_v8 = vmul.f32 1.442695, %v3235_v1  ;;  %v3329_v53 = vmul.f32 1.442695, %v3236_v15  ;;  %3430 = vadd.xlane.f32.xlu1 %v3429_v13  ;;  %v7904_v13 = vld [vmem:[#allocation15_spill] sm:$0xff] }
 0xb62   : > { %v7280_v31 = vpop.eup %5082  ;;  %v3158_v36 = vpop.xlane.xlu0 %3157 }
 0xb63   : > { %5092 = vpow2.f32 %v3327_v8  ;;  %v3237_v0 = vsub.f32 %v6945_v7, %v3158_v36  ;;  %v3238_v49 = vsub.f32 %v6950_v46, %v3158_v36  ;;  %v3432_v22 = vadd.f32 %v7280_v31, %v7278_v63 }
 0xb64   : > { %5094 = vpow2.f32 %v3329_v53 }
 0xb65   : > { %v7286_v50 = vpop.eup %5084  ;;  %v3331_v18 = vmul.f32 1.442695, %v3237_v0  ;;  %v3333_v11 = vmul.f32 1.442695, %v3238_v49  ;;  %3433 = vadd.xlane.f32.xlu0 %v3432_v22  ;;  %v7906_v22 = vld [vmem:[#allocation20_spill] sm:$0xff] }
 0xb66   : > { %v7288_v56 = vpop.eup %5086  ;;  %v3161_v33 = vpop.xlane.xlu1 %3160 }
 0xb67   : > { %5096 = vpow2.f32 %v3331_v18  ;;  %v3239_v12 = vsub.f32 %v6957_v4, %v3161_v33  ;;  %v3240_v10 = vsub.f32 %v6962_v5, %v3161_v33  ;;  %v3435_v7 = vadd.f32 %v7288_v56, %v7286_v50 }
 0xb68   : > { %5098 = vpow2.f32 %v3333_v11  ;;  %v7907_v11 = vld [vmem:[#allocation22_spill] sm:$0xff] }
 0xb69   : > { %v7294_v46 = vpop.eup %5088  ;;  %v3335_v43 = vmul.f32 1.442695, %v3239_v12  ;;  %v3337_v24 = vmul.f32 1.442695, %v3240_v10  ;;  %3436 = vadd.xlane.f32.xlu1 %v3435_v7 }
 0xb6a   : > { %v7296_v39 = vpop.eup %5090  ;;  %v3164_v1 = vpop.xlane.xlu0 %3163 }
 0xb6b   : > { %5100 = vpow2.f32 %v3335_v43  ;;  %v3241_v15 = vsub.f32 %v6969_v51, %v3164_v1  ;;  %v3242_v8 = vsub.f32 %v7904_v13, %v3164_v1  ;;  %v3438_v4 = vadd.f32 %v7296_v39, %v7294_v46  ;;  %v7909_v1 = vld [vmem:[#allocation21_spill] sm:$0xff]  ;;  %v7910_v13 = vld [vmem:[#allocation19_spill] sm:$0xff] }
 0xb6c   : > { %5102 = vpow2.f32 %v3337_v24 }
 0xb6d   : > { %v7302_v5 = vpop.eup %5092  ;;  %v3339_v53 = vmul.f32 1.442695, %v3241_v15  ;;  %v3341_v36 = vmul.f32 1.442695, %v3242_v8  ;;  %3439 = vadd.xlane.f32.xlu0 %v3438_v4 }
 0xb6e   : > { %7905 = vst [vmem:[#allocation11_spill] sm:$0xff] %v7302_v5  ;;  %v7304_v0 = vpop.eup %5094  ;;  %v3167_v49 = vpop.xlane.xlu1 %3166 }
 0xb6f   : > { %5104 = vpow2.f32 %v3339_v53  ;;  %v3243_v18 = vsub.f32 %v7906_v22, %v3167_v49  ;;  %v3244_v33 = vsub.f32 %v7907_v11, %v3167_v49  ;;  %v3441_v51 = vadd.f32 %v7304_v0, %v7302_v5  ;;  %v7913_v11 = vld [vmem:[#allocation24_spill] sm:$0xff] }
 0xb70   : > { %5106 = vpow2.f32 %v3341_v36 }
 0xb71   : > { %v7310_v12 = vpop.eup %5096  ;;  %v3343_v10 = vmul.f32 1.442695, %v3243_v18  ;;  %v3345_v7 = vmul.f32 1.442695, %v3244_v33  ;;  %3442 = vadd.xlane.f32.xlu1 %v3441_v51  ;;  %v7914_v51 = vld [vmem:[#allocation26_spill] sm:$0xff] }
 0xb72   : > { %7908 = vst [vmem:[#allocation12_spill] sm:$0xff] %v7310_v12  ;;  %v7312_v43 = vpop.eup %5098  ;;  %v3170_v24 = vpop.xlane.xlu0 %3169 }
 0xb73   : > { %5108 = vpow2.f32 %v3343_v10  ;;  %v3245_v15 = vsub.f32 %v7909_v1, %v3170_v24  ;;  %v3246_v8 = vsub.f32 %v7910_v13, %v3170_v24  ;;  %v3444_v4 = vadd.f32 %v7312_v43, %v7310_v12 }
 0xb74   : > { %5110 = vpow2.f32 %v3345_v7 }
 0xb75   : > { %v7318_v53 = vpop.eup %5100  ;;  %v3347_v36 = vmul.f32 1.442695, %v3245_v15  ;;  %v3349_v49 = vmul.f32 1.442695, %v3246_v8  ;;  %3445 = vadd.xlane.f32.xlu0 %v3444_v4  ;;  %v7917_v4 = vld [vmem:[#allocation25_spill] sm:$0xff] }
 0xb76   : > { %7911 = vst [vmem:[#allocation15_spill] sm:$0xff] %v7318_v53  ;;  %v7320_v22 = vpop.eup %5102  ;;  %v3173_v18 = vpop.xlane.xlu1 %3172 }
 0xb77   : > { %7912 = vst [vmem:[#allocation20_spill] sm:$0xff] %v7320_v22  ;;  %5112 = vpow2.f32 %v3347_v36  ;;  %v3247_v33 = vsub.f32 %v7913_v11, %v3173_v18  ;;  %v3248_v10 = vsub.f32 %v7914_v51, %v3173_v18  ;;  %v3447_v24 = vadd.f32 %v7320_v22, %v7318_v53  ;;  %v7918_v36 = vld [vmem:[#allocation23_spill] sm:$0xff] }
 0xb78   : > { %5114 = vpow2.f32 %v3349_v49 }
 0xb79   : > { %v7326_v1 = vpop.eup %5104  ;;  %v3351_v7 = vmul.f32 1.442695, %v3247_v33  ;;  %v3353_v13 = vmul.f32 1.442695, %v3248_v10  ;;  %3448 = vadd.xlane.f32.xlu1 %v3447_v24  ;;  %v7920_v24 = vld [vmem:[#allocation10_spill] sm:$0xff] }
 0xb7a   : > { %7915 = vst [vmem:[#allocation22_spill] sm:$0xff] %v7326_v1  ;;  %v7328_v15 = vpop.eup %5106  ;;  %v3176_v8 = vpop.xlane.xlu0 %3175 }
 0xb7b   : > { %7916 = vst [vmem:[#allocation21_spill] sm:$0xff] %v7328_v15  ;;  %5116 = vpow2.f32 %v3351_v7  ;;  %v3249_v5 = vsub.f32 %v7917_v4, %v3176_v8  ;;  %v3250_v12 = vsub.f32 %v7918_v36, %v3176_v8  ;;  %v3450_v18 = vadd.f32 %v7328_v15, %v7326_v1  ;;  %v7921_v7 = vld [vmem:[#allocation9_spill] sm:$0xff] }
 0xb7c   : > { %5118 = vpow2.f32 %v3353_v13 }
 0xb7d   : > { %v7334_v11 = vpop.eup %5108  ;;  %v3355_v49 = vmul.f32 1.442695, %v3249_v5  ;;  %v3357_v51 = vmul.f32 1.442695, %v3250_v12  ;;  %3451 = vadd.xlane.f32.xlu0 %v3450_v18  ;;  %v7922_v18 = vld [vmem:[#allocation7_spill] sm:$0xff] }
 0xb7e   : > { %7919 = vst [vmem:[#allocation19_spill] sm:$0xff] %v7334_v11  ;;  %v7336_v33 = vpop.eup %5110  ;;  %v3179_v10 = vpop.xlane.xlu1 %3178 }
 0xb7f   : > { %5120 = vpow2.f32 %v3355_v49  ;;  %v3251_v53 = vsub.f32 %v7920_v24, %v3179_v10  ;;  %v3252_v22 = vsub.f32 %v7921_v7, %v3179_v10  ;;  %v3453_v8 = vadd.f32 %v7336_v33, %v7334_v11  ;;  %v7923_v49 = vld [vmem:[#allocation8_spill] sm:$0xff] }
 0xb80   : > { %5122 = vpow2.f32 %v3357_v51 }
 0xb81   : > { %v7342_v4 = vpop.eup %5112  ;;  %v3359_v13 = vmul.f32 1.442695, %v3251_v53  ;;  %v3361_v36 = vmul.f32 1.442695, %v3252_v22  ;;  %3454 = vadd.xlane.f32.xlu1 %v3453_v8 }
 0xb82   : > { %v7344_v5 = vpop.eup %5114  ;;  %v3182_v12 = vpop.xlane.xlu0 %3181 }
 0xb83   : > { %5124 = vpow2.f32 %v3359_v13  ;;  %v3253_v1 = vsub.f32 %v7922_v18, %v3182_v12  ;;  %v3254_v15 = vsub.f32 %v7923_v49, %v3182_v12  ;;  %v3456_v10 = vadd.f32 %v7344_v5, %v7342_v4 }
 0xb84   : > { %5126 = vpow2.f32 %v3361_v36 }
 0xb85   : > { %v7350_v24 = vpop.eup %5116  ;;  %v3363_v51 = vmul.f32 1.442695, %v3253_v1  ;;  %v3365_v7 = vmul.f32 1.442695, %v3254_v15  ;;  %3457 = vadd.xlane.f32.xlu0 %v3456_v10 }
 0xb86   : > { %7924 = vst [vmem:[#allocation24_spill] sm:$0xff] %v7350_v24  ;;  %v7352_v53 = vpop.eup %5118 }
 0xb87   : > { %7925 = vst [vmem:[#allocation26_spill] sm:$0xff] %v7352_v53  ;;  %5128 = vpow2.f32 %v3363_v51  ;;  %v3459_v22 = vadd.f32 %v7352_v53, %v7350_v24 }
 0xb88   : > { %5130 = vpow2.f32 %v3365_v7 }
 0xb89   : > { %v7356_v8 = vpop.eup %5120  ;;  %3460 = vadd.xlane.f32.xlu1 %v3459_v22 }
 0xb8a   : > { %7926 = vst [vmem:[#allocation25_spill] sm:$0xff] %v7356_v8  ;;  %v7358_v13 = vpop.eup %5122 }
 0xb8b   : > { %7927 = vst [vmem:[#allocation23_spill] sm:$0xff] %v7358_v13  ;;  %v3462_v36 = vadd.f32 %v7358_v13, %v7356_v8 }
 0xb8d   : > { %v7362_v12 = vpop.eup %5124  ;;  %3463 = vadd.xlane.f32.xlu0 %v3462_v36 }
 0xb8e   : > { %7928 = vst [vmem:[#allocation10_spill] sm:$0xff] %v7362_v12  ;;  %v7364_v1 = vpop.eup %5126 }
 0xb8f   : > { %7929 = vst [vmem:[#allocation9_spill] sm:$0xff] %v7364_v1  ;;  %v3465_v15 = vadd.f32 %v7364_v1, %v7362_v12 }
 0xb91   : > { %v7368_v18 = vpop.eup %5128  ;;  %3466 = vadd.xlane.f32.xlu1 %v3465_v15 }
 0xb92   : > { %7930 = vst [vmem:[#allocation7_spill] sm:$0xff] %v7368_v18  ;;  %v7370_v49 = vpop.eup %5130 }
 0xb93   : > { %7931 = vst [vmem:[#allocation8_spill] sm:$0xff] %v7370_v49  ;;  %v3468_v10 = vadd.f32 %v7370_v49, %v7368_v18 }
 0xb95   : > { %3469 = vadd.xlane.f32.xlu0 %v3468_v10 }
 0xbc6   : > { %v3401_v51 = vpop.xlane.xlu1 %3400 }
 0xbc7   : > { %5132 = vrcp.f32 %v3401_v51 }
 0xbca   : > { %v3185_v7 = vpop.xlane.xlu1 %3184  ;;  %v3404_v22 = vpop.xlane.xlu0 %3403 }
 0xbcb   : > { %v3255_v36 = vsub.f32 %v7085_v42, %v3185_v7  ;;  %v3256_v24 = vsub.f32 %v7090_v52, %v3185_v7  ;;  %5134 = vrcp.f32 %v3404_v22 }
 0xbcd   : > { %v3367_v8 = vmul.f32 1.442695, %v3255_v36  ;;  %v3369_v12 = vmul.f32 1.442695, %v3256_v24 }
 0xbce   : > { %v3407_v1 = vpop.xlane.xlu1 %3406  ;;  %v3188_v13 = vpop.xlane.xlu0 %3187 }
 0xbcf   : > { %5136 = vpow2.f32 %v3367_v8  ;;  %v3257_v15 = vsub.f32 %v7107_v48, %v3188_v13  ;;  %v3258_v53 = vsub.f32 %v7112_v28, %v3188_v13 }
 0xbd0   : > { %5138 = vpow2.f32 %v3369_v12 }
 0xbd1   : > { %5140 = vrcp.f32 %v3407_v1  ;;  %v3371_v10 = vmul.f32 1.442695, %v3257_v15  ;;  %v3373_v51 = vmul.f32 1.442695, %v3258_v53  ;;  %v5133_v11 = vpop.eup %5132 }
 0xbd2   : > { %v3191_v18 = vpop.xlane.xlu1 %3190  ;;  %v3410_v49 = vpop.xlane.xlu0 %3409  ;;  %v3528_v28 = vmul.f32 %v5133_v11, %v7094_v9  ;;  %v3527_v53 = vmul.f32 %v5133_v11, %v7092_v57 }
 0xbd3   : > { %5142 = vpow2.f32 %v3371_v10  ;;  %v3259_v42 = vsub.f32 %v7124_v41, %v3191_v18  ;;  %v3260_v52 = vsub.f32 %v7130_v25, %v3191_v18 }
 0xbd4   : > { %5144 = vpow2.f32 %v3373_v51 }
 0xbd5   : > { %v5135_v24 = vpop.eup %5134  ;;  %v3375_v7 = vmul.f32 1.442695, %v3259_v42  ;;  %v3377_v8 = vmul.f32 1.442695, %v3260_v52  ;;  %5146 = vrcp.f32 %v3410_v49 }
 0xbd6   : > { %v3413_v48 = vpop.xlane.xlu1 %3412  ;;  %v3194_v22 = vpop.xlane.xlu0 %3193  ;;  %v3530_v13 = vmul.f32 %v5135_v24, %v7114_v61  ;;  %v3529_v12 = vmul.f32 %v5135_v24, %v7102_v30 }
 0xbd7   : > { %5148 = vpow2.f32 %v3375_v7  ;;  %v3261_v41 = vsub.f32 %v7150_v37, %v3194_v22  ;;  %v3262_v25 = vsub.f32 %v7156_v44, %v3194_v22 }
 0xbd8   : > { %5150 = vpow2.f32 %v3377_v8  ;;  %v4453_v1 = vpack.c.bf16 %v3530_v13, %v3528_v28  ;;  %v4455_v18 = vpack.c.bf16 %v3529_v12, %v3527_v53 }
 0xbd9   : > { %v7386_v36 = vpop.eup %5136  ;;  %5152 = vrcp.f32 %v3413_v48  ;;  %v3379_v49 = vmul.f32 1.442695, %v3261_v41  ;;  %v3381_v15 = vmul.f32 1.442695, %v3262_v25 }
 0xbda   : > { %v7388_v9 = vpop.eup %5138  ;;  %v3197_v61 = vpop.xlane.xlu1 %3196  ;;  %4454 = vmatprep.subr.bf16.mxu0 %v4453_v1 }
 0xbdb   : > { %v3416_v57 = vpop.xlane.xlu0 %3415  ;;  %v5141_v11 = vpop.eup %5140  ;;  %5154 = vpow2.f32 %v3379_v49  ;;  %v3263_v30 = vsub.f32 %v7168_v23, %v3197_v61  ;;  %v3264_v37 = vsub.f32 %v7174_v59, %v3197_v61  ;;  %4456 = vmatpush1.bf16.xpose.msra.mxu0 %v4455_v18  ;;  %v3471_v44 = vadd.f32 %v7388_v9, %v7386_v36 }
 0xbdc   : > { %5156 = vpow2.f32 %v3381_v15  ;;  %v3532_v8 = vmul.f32 %v5141_v11, %v7136_v17  ;;  %v3531_v13 = vmul.f32 %v5141_v11, %v7132_v26 }
 0xbdd   : > { %v7394_v10 = vpop.eup %5142  ;;  %v3383_v51 = vmul.f32 1.442695, %v3263_v30  ;;  %v3385_v42 = vmul.f32 1.442695, %v3264_v37  ;;  %5158 = vrcp.f32 %v3416_v57  ;;  %3472 = vadd.xlane.f32.xlu1 %v3471_v44 }
 0xbde   : > { %v7396_v52 = vpop.eup %5144  ;;  %v3419_v24 = vpop.xlane.xlu1 %3418 }
 0xbdf   : > { %v3200_v7 = vpop.xlane.xlu0 %3199  ;;  %v5147_v23 = vpop.eup %5146  ;;  %5160 = vpow2.f32 %v3383_v51  ;;  %v3474_v22 = vadd.f32 %v7396_v52, %v7394_v10 }
 0xbe0   : > { %v3265_v59 = vsub.f32 %v7194_v35, %v3200_v7  ;;  %v3266_v48 = vsub.f32 %v7200_v54, %v3200_v7  ;;  %5162 = vpow2.f32 %v3385_v42  ;;  %v3534_v28 = vmul.f32 %v5147_v23, %v7158_v14 }
 0xbe1   : > { %v3533_v53 = vmul.f32 %v5147_v23, %v7144_v2  ;;  %v7406_v12 = vpop.eup %5148  ;;  %3475 = vadd.xlane.f32.xlu0 %v3474_v22  ;;  %5164 = vrcp.f32 %v3419_v24 }
 0xbe2   : > { %v3387_v41 = vmul.f32 1.442695, %v3265_v59  ;;  %v3389_v17 = vmul.f32 1.442695, %v3266_v48  ;;  %v7408_v25 = vpop.eup %5150  ;;  %v3203_v35 = vpop.xlane.xlu1 %3202  ;;  %v4457_v54 = vpack.c.bf16 %v3534_v28, %v3532_v8 }
 0xbe3   : > { %v3422_v1 = vpop.xlane.xlu0 %3421  ;;  %v4459_v18 = vpack.c.bf16 %v3533_v53, %v3531_v13  ;;  %v5153_v49 = vpop.eup %5152  ;;  %v3267_v14 = vsub.f32 %v7212_v38, %v3203_v35  ;;  %v3268_v26 = vsub.f32 %v7218_v19, %v3203_v35  ;;  %v3477_v2 = vadd.f32 %v7408_v25, %v7406_v12 }
 0xbe4   : > { %5166 = vpow2.f32 %v3387_v41  ;;  %4458 = vmatprep.subr.bf16.mxu0 %v4457_v54  ;;  %v3536_v37 = vmul.f32 %v5153_v49, %v7180_v32  ;;  %v3535_v7 = vmul.f32 %v5153_v49, %v7176_v55 }
 0xbe5   : > { %5168 = vpow2.f32 %v3389_v17  ;;  %v7414_v15 = vpop.eup %5154  ;;  %v3391_v61 = vmul.f32 1.442695, %v3267_v14  ;;  %v3393_v57 = vmul.f32 1.442695, %v3268_v26  ;;  %4460 = vmatpush1.bf16.xpose.msra.mxu0 %v4459_v18  ;;  %3478 = vadd.xlane.f32.xlu1 %v3477_v2 }
 0xbe6   : > { %5170 = vrcp.f32 %v3422_v1  ;;  %v7416_v11 = vpop.eup %5156  ;;  %v3425_v19 = vpop.xlane.xlu1 %3424 }
 0xbe7   : > { %v3206_v30 = vpop.xlane.xlu0 %3205  ;;  %v5159_v38 = vpop.eup %5158  ;;  %5172 = vpow2.f32 %v3391_v61  ;;  %v3480_v42 = vadd.f32 %v7416_v11, %v7414_v15 }
 0xbe8   : > { %v3269_v44 = vsub.f32 %v7238_v62, %v3206_v30  ;;  %v3270_v51 = vsub.f32 %v7244_v3, %v3206_v30  ;;  %5174 = vpow2.f32 %v3393_v57  ;;  %v3538_v24 = vmul.f32 %v5159_v38, %v7202_v58 }
 0xbe9   : > { %v3537_v8 = vmul.f32 %v5159_v38, %v7188_v21  ;;  %v7426_v23 = vpop.eup %5160  ;;  %3481 = vadd.xlane.f32.xlu0 %v3480_v42  ;;  %5176 = vrcp.f32 %v3425_v19 }
 0xbea   : > { %v3395_v32 = vmul.f32 1.442695, %v3269_v44  ;;  %v3397_v59 = vmul.f32 1.442695, %v3270_v51  ;;  %v7428_v48 = vpop.eup %5162  ;;  %v4461_v62 = vpack.c.bf16 %v3538_v24, %v3536_v37 }
 0xbeb   : > { %v3428_v3 = vpop.xlane.xlu0 %3427  ;;  %v4463_v22 = vpack.c.bf16 %v3537_v8, %v3535_v7  ;;  %v3483_v28 = vadd.f32 %v7428_v48, %v7426_v23  ;;  %v5165_v58 = vpop.eup %5164 }
 0xbec   : > { %5178 = vpow2.f32 %v3395_v32  ;;  %4462 = vmatprep.subr.bf16.mxu0 %v4461_v62  ;;  %v3540_v17 = vmul.f32 %v5165_v58, %v7224_v47  ;;  %v3539_v54 = vmul.f32 %v5165_v58, %v7220_v29 }
 0xbed   : > { %5180 = vpow2.f32 %v3397_v59  ;;  %4464 = vmatpush1.bf16.xpose.msra.mxu0 %v4463_v22  ;;  %3484 = vadd.xlane.f32.xlu1 %v3483_v28 }
 0xbee   : > { %v7432_v55 = vpop.eup %5166  ;;  %5182 = vrcp.f32 %v3428_v3  ;;  %v3431_v13 = vpop.xlane.xlu1 %3430 }
 0xbef   : > { %v7434_v21 = vpop.eup %5168  ;;  %5184 = vrcp.f32 %v3431_v13 }
 0xbf0   : > { %v5171_v53 = vpop.eup %5170  ;;  %v3486_v41 = vadd.f32 %v7434_v21, %v7432_v55 }
 0xbf1   : > { %v3542_v35 = vmul.f32 %v5171_v53, %v7246_v45  ;;  %v3541_v1 = vmul.f32 %v5171_v53, %v7232_v16  ;;  %v7442_v18 = vpop.eup %5172 }
 0xbf2   : > { %3487 = vadd.xlane.f32.xlu0 %v3486_v41  ;;  %v7444_v49 = vpop.eup %5174  ;;  %v3434_v26 = vpop.xlane.xlu0 %3433 }
 0xbf3   : > { %v4465_v14 = vpack.c.bf16 %v3542_v35, %v3540_v17  ;;  %v4467_v2 = vpack.c.bf16 %v3541_v1, %v3539_v54  ;;  %5186 = vrcp.f32 %v3434_v26  ;;  %v3489_v61 = vadd.f32 %v7444_v49, %v7442_v18  ;;  %v5177_v47 = vpop.eup %5176  ;;  %v7933_v26 = vld [vmem:[#allocation11_spill] sm:$0xff] }
 0xbf4   : > { %v3544_v37 = vmul.f32 %v5177_v47, %v7256_v40  ;;  %v3543_v19 = vmul.f32 %v5177_v47, %v7252_v60 }
 0xbf5   : > { %4466 = vmatprep.subr.bf16.mxu0 %v4465_v14  ;;  %3490 = vadd.xlane.f32.xlu1 %v3489_v61  ;;  %v7932_v14 = vld [vmem:[#allocation12_spill] sm:$0xff] }
 0xbf6   : > { %v7448_v45 = vpop.eup %5178  ;;  %4468 = vmatpush1.bf16.xpose.msra.mxu0 %v4467_v2  ;;  %v3437_v16 = vpop.xlane.xlu1 %3436 }
 0xbf7   : > { %v7450_v29 = vpop.eup %5180  ;;  %5188 = vrcp.f32 %v3437_v16 }
 0xbf8   : > { %v5183_v57 = vpop.eup %5182  ;;  %v3492_v30 = vadd.f32 %v7450_v29, %v7448_v45 }
 0xbf9   : > { %v3546_v38 = vmul.f32 %v5183_v57, %v7264_v20  ;;  %v3545_v44 = vmul.f32 %v5183_v57, %v7262_v27  ;;  %v5185_v7 = vpop.eup %5184 }
 0xbfa   : > { %3493 = vadd.xlane.f32.xlu0 %v3492_v30  ;;  %v3440_v42 = vpop.xlane.xlu0 %3439  ;;  %v3548_v59 = vmul.f32 %v5185_v7, %v7272_v34  ;;  %v3547_v60 = vmul.f32 %v5185_v7, %v7270_v6  ;;  %v7934_v30 = vld [vmem:[#allocation20_spill] sm:$0xff] }
 0xbfb   : > { %v4469_v51 = vpack.c.bf16 %v3546_v38, %v3544_v37  ;;  %v4471_v24 = vpack.c.bf16 %v3545_v44, %v3543_v19  ;;  %5190 = vrcp.f32 %v3440_v42  ;;  %v7935_v38 = vld [vmem:[#allocation21_spill] sm:$0xff]  ;;  %v7936_v19 = vld [vmem:[#allocation22_spill] sm:$0xff]  ;;  %v7937_v44 = vld [vmem:[#allocation15_spill] sm:$0xff] }
 0xbfd   : > { %4470 = vmatprep.subr.bf16.mxu0 %v4469_v51  ;;  %v5187_v8 = vpop.eup %5186 }
 0xbfe   : > { %4472 = vmatpush1.bf16.xpose.msra.mxu0 %v4471_v24  ;;  %v3443_v32 = vpop.xlane.xlu1 %3442  ;;  %v3550_v40 = vmul.f32 %v5187_v8, %v7280_v31  ;;  %v3549_v20 = vmul.f32 %v5187_v8, %v7278_v63 }
 0xbff   : > { %5192 = vrcp.f32 %v3443_v32 }
 0xc00   : > { %v4473_v27 = vpack.c.bf16 %v3550_v40, %v3548_v59  ;;  %v4475_v62 = vpack.c.bf16 %v3549_v20, %v3547_v60 }
 0xc01   : > { %v5189_v22 = vpop.eup %5188 }
 0xc02   : > { %4474 = vmatprep.subr.bf16.mxu0 %v4473_v27  ;;  %v3446_v3 = vpop.xlane.xlu0 %3445  ;;  %v3552_v13 = vmul.f32 %v5189_v22, %v7288_v56  ;;  %v3551_v63 = vmul.f32 %v5189_v22, %v7286_v50  ;;  %v3684_v27 = vld [vmem:[%s7727_s1] ss:$2 sm:$0x3] }
 0xc03   : > { %5194 = vrcp.f32 %v3446_v3  ;;  %v7938_v3 = vld [vmem:[#allocation19_spill] sm:$0xff] }
 0xc05   : > { %v5191_v28 = vpop.eup %5190 }
 0xc06   : > { %4476 = vmatpush1.bf16.xpose.msra.mxu0 %v4475_v62  ;;  %v3449_v58 = vpop.xlane.xlu1 %3448  ;;  %v3554_v34 = vmul.f32 %v5191_v28, %v7296_v39  ;;  %v3553_v31 = vmul.f32 %v5191_v28, %v7294_v46  ;;  %v4308_v62 = vld [vmem:[%s7727_s1 + $0x1] ss:$2 sm:$0x3] }
 0xc07   : > { %5196 = vrcp.f32 %v3449_v58  ;;  %v7939_v28 = vld [vmem:[#allocation5_spill] sm:$0xff] }
 0xc08   : > { %v4477_v53 = vpack.c.bf16 %v3554_v34, %v3552_v13  ;;  %v4479_v6 = vpack.c.bf16 %v3553_v31, %v3551_v63  ;;  %v3693_v58 = vrot.slane %v3684_v27, %v7939_v28  ;;  %v7940_v34 = vld [vmem:[#allocation6_spill] sm:$0xff] }
 0xc09   : > { %v5193_v17 = vpop.eup %5192  ;;  %v3697_v31 = vrot.slane %v3684_v27, %v7940_v34 }
 0xc0a   : > { %4478 = vmatprep.subr.bf16.mxu0 %v4477_v53  ;;  %v3452_v41 = vpop.xlane.xlu0 %3451  ;;  %v3556_v1 = vmul.f32 %v5193_v17, %v7304_v0  ;;  %v3555_v46 = vmul.f32 %v5193_v17, %v7933_v26  ;;  %3698 = vrot.lane.b32.xlu1 %v3693_v58, %s5318_s30 }
 0xc0b   : > { %5198 = vrcp.f32 %v3452_v41  ;;  %v7941_v41 = vld [vmem:[#allocation26_spill] sm:$0xff] }
 0xc0d   : > { %v5195_v35 = vpop.eup %5194 }
 0xc0e   : > { %4480 = vmatpush1.bf16.xpose.msra.mxu0 %v4479_v6  ;;  %v3455_v54 = vpop.xlane.xlu1 %3454  ;;  %v3558_v56 = vmul.f32 %v5195_v35, %v7312_v43  ;;  %v3557_v39 = vmul.f32 %v5195_v35, %v7932_v14  ;;  %v3753_v6 = vrot.slane %v4308_v62, %v7940_v34  ;;  %v7942_v35 = vld [vmem:[#allocation23_spill] sm:$0xff]  ;;  %v7944_v14 = vld [vmem:[#allocation24_spill] sm:$0xff] }
 0xc0f   : > { %5200 = vrcp.f32 %v3455_v54 }
 0xc10   : > { %v4481_v2 = vpack.c.bf16 %v3558_v56, %v3556_v1  ;;  %v4483_v50 = vpack.c.bf16 %v3557_v39, %v3555_v46  ;;  %3700 = vrot.lane.b32.xlu0 %v3697_v31, %s5318_s30  ;;  %v7943_v1 = vld [vmem:[#allocation25_spill] sm:$0xff] }
 0xc11   : > { %v5197_v47 = vpop.eup %5196 }
 0xc12   : > { %4482 = vmatprep.subr.bf16.mxu0 %v4481_v2  ;;  %v3458_v61 = vpop.xlane.xlu0 %3457  ;;  %v3560_v37 = vmul.f32 %v5197_v47, %v7934_v30  ;;  %v3559_v51 = vmul.f32 %v5197_v47, %v7937_v44  ;;  %v7947_v30 = vld [vmem:[#allocation7_spill] sm:$0xff]  ;;  %v7508_v44 = vld [vmem:[#allocation2] sm:$0xff] }
 0xc13   : > { %5202 = vrcp.f32 %v3458_v61  ;;  %v7945_v61 = vld [vmem:[#allocation9_spill] sm:$0xff] }
 0xc14   : > { %3783 = vrot.lane.b32.xlu0 %v3693_v58, %s5319_s16 }
 0xc15   : > { %v5199_v16 = vpop.eup %5198 }
 0xc16   : > { %4484 = vmatpush1.bf16.xpose.msra.mxu0 %v4483_v50  ;;  %v3461_v57 = vpop.xlane.xlu1 %3460  ;;  %v3562_v0 = vmul.f32 %v5199_v16, %v7935_v38  ;;  %v3561_v43 = vmul.f32 %v5199_v16, %v7936_v19  ;;  %v7946_v16 = vld [vmem:[#allocation8_spill] sm:$0xff]  ;;  %v7949_v38 = vld [vmem:[#allocation10_spill] sm:$0xff] }
 0xc17   : > { %5204 = vrcp.f32 %v3461_v57 }
 0xc18   : > { %v4485_v42 = vpack.c.bf16 %v3562_v0, %v3560_v37  ;;  %v4487_v24 = vpack.c.bf16 %v3561_v43, %v3559_v51 }
 0xc19   : > { %v5201_v8 = vpop.eup %5200 }
 0xc1a   : > { %4486 = vmatprep.subr.bf16.mxu0 %v4485_v42  ;;  %v3464_v7 = vpop.xlane.xlu0 %3463  ;;  %v3564_v40 = vmul.f32 %v5201_v8, %v7336_v33  ;;  %v3563_v22 = vmul.f32 %v5201_v8, %v7938_v3 }
 0xc1b   : > { %5206 = vrcp.f32 %v3464_v7 }
 0xc1d   : > { %v5203_v32 = vpop.eup %5202 }
 0xc1e   : > { %4488 = vmatpush1.bf16.xpose.msra.mxu0 %v4487_v24  ;;  %v3467_v59 = vpop.xlane.xlu1 %3466  ;;  %v3566_v20 = vmul.f32 %v5203_v32, %v7344_v5  ;;  %v3565_v60 = vmul.f32 %v5203_v32, %v7342_v4  ;;  %v3749_v4 = vrot.slane %v4308_v62, %v7939_v28 }
 0xc1f   : > { %5208 = vrcp.f32 %v3467_v59 }
 0xc20   : > { %v4489_v13 = vpack.c.bf16 %v3566_v20, %v3564_v40  ;;  %v4491_v33 = vpack.c.bf16 %v3565_v60, %v3563_v22  ;;  %3754 = vrot.lane.b32.xlu1 %v3749_v4, %s5317_s29  ;;  %3816 = vrot.lane.b32.xlu0 %v3749_v4, %s5320_s17 }
 0xc21   : > { %v5205_v63 = vpop.eup %5204 }
 0xc22   : > { %4490 = vmatprep.subr.bf16.mxu0 %v4489_v13  ;;  %v3470_v5 = vpop.xlane.xlu0 %3469  ;;  %v3568_v17 = vmul.f32 %v5205_v63, %v7941_v41  ;;  %v3567_v39 = vmul.f32 %v5205_v63, %v7944_v14 }
 0xc23   : > { %5210 = vrcp.f32 %v3470_v5 }
 0xc24   : > { %3756 = vrot.lane.b32.xlu1 %v3753_v6, %s5317_s29  ;;  %3845 = vrot.lane.b32.xlu0 %v3693_v58, %s7948_s21 }
 0xc25   : > { %v5207_v53 = vpop.eup %5206 }
 0xc26   : > { %4492 = vmatpush1.bf16.xpose.msra.mxu0 %v4491_v33  ;;  %v3570_v54 = vmul.f32 %v5207_v53, %v7942_v35  ;;  %v3569_v56 = vmul.f32 %v5207_v53, %v7943_v1 }
 0xc28   : > { %v4493_v26 = vpack.c.bf16 %v3570_v54, %v3568_v17  ;;  %v4495_v46 = vpack.c.bf16 %v3569_v56, %v3567_v39  ;;  %3785 = vrot.lane.b32.xlu1 %v3697_v31, %s5319_s16  ;;  %3892 = vrot.lane.b32.xlu0 %v3749_v4, %s7950_s18 }
 0xc29   : > { %v5209_v2 = vpop.eup %5208 }
 0xc2a   : > { %4494 = vmatprep.subr.bf16.mxu0 %v4493_v26  ;;  %v3572_v47 = vmul.f32 %v5209_v2, %v7945_v61  ;;  %v3571_v0 = vmul.f32 %v5209_v2, %v7949_v38 }
 0xc2c   : > { %3818 = vrot.lane.b32.xlu1 %v3753_v6, %s5320_s17 }
 0xc2d   : > { %v5211_v50 = vpop.eup %5210 }
 0xc2e   : > { %4496 = vmatpush1.bf16.xpose.msra.mxu0 %v4495_v46  ;;  %v3574_v57 = vmul.f32 %v5211_v50, %v7946_v16  ;;  %v3573_v37 = vmul.f32 %v5211_v50, %v7947_v30  ;;  %v7954_v50 = vld [vmem:[#allocation13_spill] sm:$0xff]  ;;  %v7955_v30 = vld [vmem:[#allocation18_spill] sm:$0xff] }
 0xc30   : > { %v4497_v19 = vpack.c.bf16 %v3574_v57, %v3572_v47  ;;  %v4499_v43 = vpack.c.bf16 %v3573_v37, %v3571_v0  ;;  %3847 = vrot.lane.b32.xlu1 %v3697_v31, %s7948_s21 }
 0xc32   : > { %4498 = vmatprep.subr.bf16.mxu0 %v4497_v19  ;;  %v7956_v19 = vld [vmem:[#allocation16_spill] sm:$0xff] }
 0xc34   : > { %3894 = vrot.lane.b32.xlu1 %v3753_v6, %s7950_s18 }
 0xc36   : > { %4500 = vmatpush1.bf16.xpose.msra.mxu0 %v4499_v43 }
 0xc38   : > { %3730 = vrot.lane.b32.xlu1 %v7508_v44, %s7951_s26 }
 0xc6a   : > { %v3473_v51 = vpop.xlane.xlu1 %3472 }
 0xc6b   : > { %5212 = vrcp.f32 %v3473_v51 }
 0xc6e   : > { %v3476_v42 = vpop.xlane.xlu0 %3475 }
 0xc6f   : > { %5214 = vrcp.f32 %v3476_v42 }
 0xc72   : > { %v3479_v24 = vpop.xlane.xlu1 %3478 }
 0xc73   : > { %5216 = vrcp.f32 %v3479_v24 }
 0xc75   : > { %v5213_v8 = vpop.eup %5212 }
 0xc76   : > { %v3482_v7 = vpop.xlane.xlu0 %3481  ;;  %v3576_v40 = vmul.f32 %v5213_v8, %v7388_v9  ;;  %v3575_v60 = vmul.f32 %v5213_v8, %v7386_v36 }
 0xc77   : > { %5218 = vrcp.f32 %v3482_v7 }
 0xc79   : > { %v5215_v32 = vpop.eup %5214 }
 0xc7a   : > { %v3485_v59 = vpop.xlane.xlu1 %3484  ;;  %v3578_v20 = vmul.f32 %v5215_v32, %v7396_v52  ;;  %v3577_v27 = vmul.f32 %v5215_v32, %v7394_v10 }
 0xc7b   : > { %5220 = vrcp.f32 %v3485_v59 }
 0xc7c   : > { %v4501_v62 = vpack.c.bf16 %v3578_v20, %v3576_v40  ;;  %v4503_v3 = vpack.c.bf16 %v3577_v27, %v3575_v60 }
 0xc7d   : > { %v5217_v28 = vpop.eup %5216 }
 0xc7e   : > { %4502 = vmatprep.subr.bf16.mxu0 %v4501_v62  ;;  %v3580_v34 = vmul.f32 %v5217_v28, %v7408_v25  ;;  %v3579_v52 = vmul.f32 %v5217_v28, %v7406_v12 }
 0xc7f   : > { %v3488_v22 = vpop.xlane.xlu0 %3487  ;;  %4504 = vmatpush1.bf16.xpose.msra.mxu0 %v4503_v3 }
 0xc80   : > { %5222 = vrcp.f32 %v3488_v22  ;;  %v3815_v22 = vld [vmem:[#allocation2 + $0x18] sm:$0xff] }
 0xc81   : > { %v5219_v58 = vpop.eup %5218 }
 0xc82   : > { %v3491_v13 = vpop.xlane.xlu1 %3490  ;;  %v3582_v9 = vmul.f32 %v5219_v58, %v7416_v11  ;;  %v3581_v36 = vmul.f32 %v5219_v58, %v7414_v15 }
 0xc83   : > { %5224 = vrcp.f32 %v3491_v13 }
 0xc84   : > { %v4505_v31 = vpack.c.bf16 %v3582_v9, %v3580_v34  ;;  %v4507_v10 = vpack.c.bf16 %v3581_v36, %v3579_v52 }
 0xc85   : > { %v5221_v4 = vpop.eup %5220 }
 0xc86   : > { %4506 = vmatprep.subr.bf16.mxu0 %v4505_v31  ;;  %v3584_v63 = vmul.f32 %v5221_v4, %v7428_v48  ;;  %v3583_v25 = vmul.f32 %v5221_v4, %v7426_v23  ;;  %v3699_v1 = vpop.permute.xlu1 %3698 }
 0xc87   : > { %v3494_v33 = vpop.xlane.xlu0 %3493  ;;  %4508 = vmatpush1.bf16.xpose.msra.mxu0 %v4507_v10  ;;  %v3706_v23 = vmul.f32 %v7508_v44, %v3699_v1 }
 0xc88   : > { %5226 = vrcp.f32 %v3494_v33 }
 0xc89   : > { %3712 = vrot.lane.b32.xlu0 %v3706_v23, %s7950_s18 }
 0xc8a   : > { %v5223_v5 = vpop.eup %5222 }
 0xc8b   : > { %v3586_v53 = vmul.f32 %v5223_v5, %v7434_v21  ;;  %v3585_v11 = vmul.f32 %v5223_v5, %v7432_v55  ;;  %v3701_v55 = vpop.permute.xlu0 %3700 }
 0xc8c   : > { %v3702_v38 = vsel %vm480_vm1, %v3699_v1, %v3701_v55 }
 0xc8d   : > { %v4509_v12 = vpack.c.bf16 %v3586_v53, %v3584_v63  ;;  %v4511_v6 = vpack.c.bf16 %v3585_v11, %v3583_v25  ;;  %v5225_v15 = vpop.eup %5224 }
 0xc8e   : > { %v3588_v17 = vmul.f32 %v5225_v15, %v7444_v49  ;;  %v3587_v54 = vmul.f32 %v5225_v15, %v7442_v18  ;;  %v7952_v18 = vld [vmem:[#allocation14_spill] sm:$0xff] }
 0xc8f   : > { %4510 = vmatprep.subr.bf16.mxu0 %v4509_v12  ;;  %v3784_v49 = vpop.permute.xlu0 %3783 }
 0xc90   : > { %4512 = vmatpush1.bf16.xpose.msra.mxu0 %v4511_v6 }
 0xc92   : > { %v5227_v41 = vpop.eup %5226  ;;  %v3755_v14 = vpop.permute.xlu1 %3754 }
 0xc93   : > { %v3590_v35 = vmul.f32 %v5227_v41, %v7450_v29  ;;  %v3589_v48 = vmul.f32 %v5227_v41, %v7448_v45  ;;  %v3762_v39 = vmul.f32 %v7508_v44, %v3755_v14  ;;  %v3791_v29 = vmul.f32 %v7508_v44, %v3784_v49  ;;  %v7953_v45 = vld [vmem:[#allocation17_spill] sm:$0xff]  ;;  %v3817_v60 = vpop.permute.xlu0 %3816 }
 0xc94   : > { %v2678_v26 = vadd.f32 %v7953_v45, %v7952_v18 }
 0xc95   : > { %v4513_v21 = vpack.c.bf16 %v3590_v35, %v3588_v17  ;;  %v4515_v56 = vpack.c.bf16 %v3589_v48, %v3587_v54  ;;  %3768 = vrot.lane.b32.xlu0 %v3762_v39, %s7948_s21  ;;  %3797 = vrot.lane.b32.xlu1 %v3791_v29, %s5320_s17 }
 0xc96   : > { %v3757_v46 = vpop.permute.xlu1 %3756 }
 0xc97   : > { %4514 = vmatprep.subr.bf16.mxu0 %v4513_v21  ;;  %v3758_v42 = vsel %vm655_vm2, %v3755_v14, %v3757_v46  ;;  %v3846_v13 = vpop.permute.xlu0 %3845 }
 0xc98   : > { %4516 = vmatpush1.bf16.xpose.msra.mxu0 %v4515_v56 }
 0xc9a   : > { %v3786_v57 = vpop.permute.xlu1 %3785 }
 0xc9b   : > { %v3787_v0 = vsel %vm749_vm3, %v3784_v49, %v3786_v57  ;;  %v3893_v53 = vpop.permute.xlu0 %3892 }
 0xc9e   : > { %v3819_v62 = vpop.permute.xlu1 %3818 }
 0xc9f   : > { %3656 = vmatmul.mubr.f32.vlgmr.msra.gmra.mrb[66].mxu0 %v2678_v26  ;;  %v3820_v28 = vsel %vm802_vm4, %v3817_v60, %v3819_v62  ;;  %v3826_v34 = vmul.f32 %v3819_v62, %v3815_v22 }
 0xca2   : > { %v3848_v52 = vpop.permute.xlu1 %3847 }
 0xca3   : > { %v3849_v31 = vsel %vm708_vm5, %v3846_v13, %v3848_v52  ;;  %v3855_v4 = vmul.f32 %v3848_v52, %v3815_v22 }
 0xca6   : > { %v3895_v63 = vpop.permute.xlu1 %3894 }
 0xca7   : > { %v3902_v25 = vmul.f32 %v3895_v63, %v3815_v22  ;;  %v3896_v12 = vsel %vm426_vm0, %v3893_v53, %v3895_v63  ;;  %v3919_v63 = vld [vmem:[%s7735_s9 + $0x8] sm:$0xff] }
 0xcaa   : > { %v3731_v41 = vpop.permute.xlu1 %3730 }
 0xcfb   : > { %v3713_v17 = vpop.permute.xlu0 %3712 }
 0xd07   : > { %v3798_v35 = vpop.permute.xlu1 %3797  ;;  %v3769_v54 = vpop.permute.xlu0 %3768 }
 0xd72   : > { %v3657_v2 = vpop.f32.mrb[66].mxu0 }
 0xd73   : > { %v3662_v61 = vmul.f32 %v3657_v2, %v7954_v50  ;;  %v3659_v47 = vpop.f32.mrb[67].mxu0 }
 0xd74   : > { %v3663_v16 = vmul.f32 %v3659_v47, %v7954_v50 }
 0xd75   : > { %v7539_v37 = vadd.f32 %v3662_v61, %v7955_v30 }
 0xd76   : > { %v7544_v43 = vadd.f32 %v3663_v16, %v7956_v19 }
 0xd77   : > { %v3707_v51 = vmul.f32 %v3702_v38, %v7539_v37  ;;  %v3792_v8 = vmul.f32 %v3787_v0, %v7539_v37  ;;  %v3763_v40 = vmul.f32 %v3758_v42, %v7539_v37  ;;  %v3824_v58 = vmul.f32 %v3817_v60, %v7539_v37 }
 0xd78   : > { %v4807_v24 = vpack.i.bf16 %v7544_v43, %v7539_v37  ;;  %v3708_v7 = vmul.f32 %v3701_v55, %v7544_v43  ;;  %v3793_v32 = vmul.f32 %v3786_v57, %v7544_v43  ;;  %v3764_v20 = vmul.f32 %v3757_v46, %v7544_v43 }
 0xd79   : > { %v3825_v9 = vmul.f32 %v3820_v28, %v7544_v43  ;;  %v3853_v36 = vmul.f32 %v3846_v13, %v7539_v37  ;;  %v4827_v10 = vpack.i.bf16 %v3815_v22, %v7544_v43  ;;  %v3854_v5 = vmul.f32 %v3849_v31, %v7544_v43 }
 0xd7a   : > { %4808 = vrot.lane.b32.xlu1 %v4807_v24, %s7951_s26  ;;  %v4812_v59 = vpack.i.bf16 %v3708_v7, %v3707_v51  ;;  %v4822_v27 = vpack.i.bf16 %v3793_v32, %v3792_v8  ;;  %v4817_v3 = vpack.i.bf16 %v3764_v20, %v3763_v40  ;;  %v3901_v6 = vmul.f32 %v3896_v12, %v7544_v43 }
 0xd7b   : > { %v4832_v33 = vpack.i.bf16 %v3826_v34, %v3825_v9  ;;  %v4837_v11 = vpack.i.bf16 %v3855_v4, %v3854_v5  ;;  %v3900_v15 = vmul.f32 %v3893_v53, %v7539_v37  ;;  %v3918_v5 = vld [vmem:[%s7735_s9] sm:$0xff]  ;;  %v3920_v53 = vld [vmem:[%s7735_s9 + $0x10] sm:$0xff] }
 0xd7c   : > { %4813 = vrot.lane.b32.xlu0 %v4812_v59, %s7950_s18 }
 0xd7e   : > { %4823 = vrot.lane.b32.xlu1 %v4822_v27, %s5320_s17  ;;  %s7957_s17 = smov 112  }
 0xd80   : > { %4818 = vrot.lane.b32.xlu0 %v4817_v3, %s7948_s21 }
 0xd82   : > { %3830 = vrot.lane.b32.xlu1 %v3824_v58, %s5319_s16 }
 0xd84   : > { %3859 = vrot.lane.b32.xlu0 %v3853_v36, %s5317_s29 }
 0xd86   : > { %4828 = vrot.lane.b32.xlu1 %v4827_v10, %s7957_s17 }
 0xd88   : > { %4833 = vrot.lane.b32.xlu0 %v4832_v33, %s5319_s16 }
 0xd8a   : > { %3877 = vrot.lane.b32.xlu1 %v7539_v37, %s7957_s17 }
 0xd8c   : > { %4838 = vrot.lane.b32.xlu0 %v4837_v11, %s5317_s29  ;;  %s7958_s29 = sshll.u32 %s7960_s24, 6 }
 0xd8d   : > { %s414_s27 = scalar_lea.vmem %s7738_s12, %s7958_s29 }
 0xd8e   : > { %3910 = vrot.lane.b32.xlu1 %v3902_v25, %s5318_s30  ;;  %v3921_v25 = vld [vmem:[%s7735_s9 + $0x18] sm:$0xff] }
 0xd90   : > { %3908 = vrot.lane.b32.xlu0 %v3901_v6, %s5318_s30 }
 0xd94   : > { %3906 = vrot.lane.b32.xlu0 %v3900_v15, %s5318_s30 }
 0xdec   : > { %v4809_v48 = vpop.permute.xlu1 %4808 }
 0xded   : > { %v4811_v1 = vunpack.i.h.bf16 %v4809_v48  ;;  %v4810_v21 = vunpack.i.l.bf16 %v4809_v48 }
 0xdee   : > { %v4814_v56 = vpop.permute.xlu0 %4813 }
 0xdef   : > { %v4816_v23 = vunpack.i.h.bf16 %v4814_v56  ;;  %v4815_v55 = vunpack.i.l.bf16 %v4814_v56  ;;  %v3736_v39 = vsel %vm605_vm6, %v3731_v41, %v4810_v21  ;;  %v3737_v49 = vsel %vm605_vm6, %v4810_v21, %v4811_v1 }
 0xdf0   : > { %v4824_v14 = vpop.permute.xlu1 %4823 }
 0xdf1   : > { %v3718_v29 = vsel %vm426_vm0, %v3713_v17, %v4815_v55  ;;  %v4826_v18 = vunpack.i.h.bf16 %v4824_v14  ;;  %v4825_v45 = vunpack.i.l.bf16 %v4824_v14  ;;  %v3719_v26 = vsel %vm426_vm0, %v4815_v55, %v4816_v23 }
 0xdf2   : > { %v4519_v46 = vpack.c.bf16 %v3736_v39, %v3718_v29  ;;  %v4819_v2 = vpop.permute.xlu0 %4818  ;;  %v4517_v50 = vpack.c.bf16 %v3737_v49, %v3719_v26 }
 0xdf3   : > { %v4821_v61 = vunpack.i.h.bf16 %v4819_v2  ;;  %v4820_v47 = vunpack.i.l.bf16 %v4819_v2  ;;  %v3803_v57 = vsel %vm802_vm4, %v3798_v35, %v4825_v45  ;;  %v3804_v0 = vsel %vm802_vm4, %v4825_v45, %v4826_v18 }
 0xdf4   : > { %v3831_v16 = vpop.permute.xlu1 %3830  ;;  %4518 = vmatprep.subr.bf16.mxu1 %v4517_v50 }
 0xdf5   : > { %v3774_v30 = vsel %vm708_vm5, %v3769_v54, %v4820_v47  ;;  %4520 = vmatpush1.bf16.msra.mxu1 %v4519_v46  ;;  %v3775_v38 = vsel %vm708_vm5, %v4820_v47, %v4821_v61 }
 0xdf6   : > { %v4523_v19 = vpack.c.bf16 %v3803_v57, %v3774_v30  ;;  %v3860_v51 = vpop.permute.xlu0 %3859  ;;  %v4521_v42 = vpack.c.bf16 %v3804_v0, %v3775_v38 }
 0xdf8   : > { %v4829_v24 = vpop.permute.xlu1 %4828  ;;  %4522 = vmatprep.subr.bf16.mxu1 %v4521_v42 }
 0xdf9   : > { %4524 = vmatpush1.bf16.msra.mxu1 %v4523_v19  ;;  %v4831_v59 = vunpack.i.h.bf16 %v4829_v24  ;;  %v4830_v40 = vunpack.i.l.bf16 %v4829_v24 }
 0xdfa   : > { %v4834_v7 = vpop.permute.xlu0 %4833 }
 0xdfb   : > { %v4836_v8 = vunpack.i.h.bf16 %v4834_v7  ;;  %v4835_v32 = vunpack.i.l.bf16 %v4834_v7  ;;  %v3884_v52 = vsel %vm1075_vm7, %v4830_v40, %v4831_v59 }
 0xdfc   : > { %v3878_v62 = vpop.permute.xlu1 %3877 }
 0xdfd   : > { %v3836_v20 = vsel %vm749_vm3, %v3831_v16, %v4835_v32  ;;  %v3837_v60 = vsel %vm749_vm3, %v4835_v32, %v4836_v8  ;;  %v3883_v13 = vsel %vm1075_vm7, %v3878_v62, %v4830_v40 }
 0xdfe   : > { %v4527_v27 = vpack.c.bf16 %v3836_v20, %v7539_v37  ;;  %v4839_v3 = vpop.permute.xlu0 %4838  ;;  %v4525_v22 = vpack.c.bf16 %v3837_v60, %v7544_v43 }
 0xdff   : > { %v4841_v28 = vunpack.i.h.bf16 %v4839_v3  ;;  %v4840_v58 = vunpack.i.l.bf16 %v4839_v3 }
 0xe00   : > { %4526 = vmatprep.subr.bf16.mxu1 %v4525_v22  ;;  %v3911_v31 = vpop.permute.xlu1 %3910 }
 0xe01   : > { %v3865_v34 = vsel %vm655_vm2, %v3860_v51, %v4840_v58  ;;  %4528 = vmatpush1.bf16.msra.mxu1 %v4527_v27  ;;  %v3866_v9 = vsel %vm655_vm2, %v4840_v58, %v4841_v28 }
 0xe02   : > { %v4531_v36 = vpack.c.bf16 %v3883_v13, %v3865_v34  ;;  %v3909_v10 = vpop.permute.xlu0 %3908  ;;  %v4529_v37 = vpack.c.bf16 %v3884_v52, %v3866_v9 }
 0xe03   : > { %v3913_v43 = vsel %vm480_vm1, %v3909_v10, %v3911_v31 }
 0xe04   : > { %4530 = vmatprep.subr.bf16.mxu1 %v4529_v37  ;;  %v3667_v37 = vld [vmem:[%s7736_s10 + $0x8] sm:$0xff] }
 0xe05   : > { %4532 = vmatpush1.bf16.msra.mxu1 %v4531_v36 }
 0xe06   : > { %v3907_v33 = vpop.permute.xlu0 %3906  ;;  %3969 = vmatprep.subr.mxu1 %v3913_v43  ;;  %v3668_v43 = vld [vmem:[%s7736_s10 + $0x10] sm:$0xff] }
 0xe07   : > { %v3912_v4 = vsel %vm480_vm1, %v3907_v33, %v3909_v10  ;;  %v3666_v10 = vld [vmem:[%s7736_s10] sm:$0xff]  ;;  %v3669_v33 = vld [vmem:[%s7736_s10 + $0x18] sm:$0xff] }
 0xe09   : > { %3970 = vmatpush1.msra.mxu1 %v3912_v4  ;;  %v3670_v4 = vld [vmem:[%s7736_s10 + $0x20] sm:$0xff] }
 0xe0a   : > { %4309 = vmatmul.mubr.msk.f32.vlgmr.msra.gmra.mrb[80].mxu1 %vm3940_vm12, %v3918_v5  ;;  %v3671_v5 = vld [vmem:[%s7736_s10 + $0x28] sm:$0xff] }
 0xe0b   : > { %4023 = vmatprep.mubr.f32.mxu1 %v7508_v44 }
 0xe0e   : > { %4310 = vmatmul.mubr.msk.f32.gmra.mrb[82].mxu1 %vm3940_vm12, %v3919_v63  ;;  %v3672_v63 = vld [vmem:[%s7736_s10 + $0x30] sm:$0xff] }
 0xe0f   : > { %4029 = vmatprep.mubr.f32.mxu1 %v7508_v44 }
 0xe12   : > { %4311 = vmatmul.mubr.msk.f32.gmra.mrb[84].mxu1 %vm3940_vm12, %v3920_v53 }
 0xe13   : > { %4035 = vmatprep.mubr.f32.mxu1 %v7508_v44 }
 0xe16   : > { %4312 = vmatmul.mubr.msk.f32.gmra.mrb[86].mxu1 %vm3940_vm12, %v3921_v25  ;;  %v3673_v25 = vld [vmem:[%s7736_s10 + $0x38] sm:$0xff] }
 0xedd   : > { %v7612_v11 = vpop.f32.mrb[80].mxu1 }
 0xede   : > { %v4059_v12 = vmul.f32 %v7612_v11, %v7612_v11  ;;  %v7616_v6 = vpop.f32.mrb[81].mxu1 }
 0xedf   : > { %v4042_v15 = vadd.f32 %v7616_v6, %v7612_v11  ;;  %v4060_v41 = vmul.f32 %v7616_v6, %v7616_v6 }
 0xee1   : > { %v4067_v17 = vadd.f32 %v4060_v41, %v4059_v12  ;;  %v7622_v44 = vpop.f32.mrb[82].mxu1  ;;  %v3675_v12 = vld [vmem:[%s7737_s11 + $0x8] sm:$0xff] }
 0xee2   : > { %v4043_v35 = vadd.f32 %v4042_v15, %v7622_v44  ;;  %v4061_v54 = vmul.f32 %v7622_v44, %v7622_v44  ;;  %v7627_v48 = vpop.f32.mrb[83].mxu1 }
 0xee3   : > { %v4062_v1 = vmul.f32 %v7627_v48, %v7627_v48 }
 0xee4   : > { %v4068_v21 = vadd.f32 %v4067_v17, %v4061_v54  ;;  %v4044_v56 = vadd.f32 %v4043_v35, %v7627_v48  ;;  %v3677_v35 = vld [vmem:[%s7737_s11 + $0x18] sm:$0xff]  ;;  %v3678_v54 = vld [vmem:[%s7737_s11 + $0x20] sm:$0xff] }
 0xee5   : > { %v7632_v23 = vpop.f32.mrb[84].mxu1 }
 0xee6   : > { %v4069_v55 = vadd.f32 %v4068_v21, %v4062_v1  ;;  %v4045_v14 = vadd.f32 %v4044_v56, %v7632_v23  ;;  %v4063_v39 = vmul.f32 %v7632_v23, %v7632_v23  ;;  %v7637_v49 = vpop.f32.mrb[85].mxu1 }
 0xee7   : > { %v4064_v29 = vmul.f32 %v7637_v49, %v7637_v49 }
 0xee8   : > { %v4070_v18 = vadd.f32 %v4069_v55, %v4063_v39  ;;  %v4046_v45 = vadd.f32 %v4045_v14, %v7637_v49  ;;  %v3680_v55 = vld [vmem:[%s7737_s11 + $0x30] sm:$0xff]  ;;  %v3681_v14 = vld [vmem:[%s7737_s11 + $0x38] sm:$0xff] }
 0xee9   : > { %v7642_v26 = vpop.f32.mrb[86].mxu1 }
 0xeea   : > { %v4071_v46 = vadd.f32 %v4070_v18, %v4064_v29  ;;  %v4047_v2 = vadd.f32 %v4046_v45, %v7642_v26  ;;  %v4065_v50 = vmul.f32 %v7642_v26, %v7642_v26  ;;  %v7647_v61 = vpop.f32.mrb[87].mxu1 }
 0xeeb   : > { %v4066_v47 = vmul.f32 %v7647_v61, %v7647_v61 }
 0xeec   : > { %v4072_v16 = vadd.f32 %v4071_v46, %v4065_v50  ;;  %v4048_v57 = vadd.f32 %v4047_v2, %v7647_v61 }
 0xeee   : > { %v4073_v30 = vadd.f32 %v4072_v16, %v4066_v47  ;;  %4049 = vadd.xlane.f32.xlu1 %v4048_v57 }
 0xef0   : > { %4074 = vadd.xlane.f32.xlu0 %v4073_v30 }
 0xf7b   : > { %v4050_v38 = vpop.xlane.xlu1 %4049 }
 0xf7c   : > { %v4051_v0 = vrot.slane %v4050_v38, 4 }
 0xf7d   : > { %v4075_v19 = vpop.xlane.xlu0 %4074 }
 0xf7e   : > { %v4052_v51 = vadd.f32 %v4051_v0, %v4050_v38  ;;  %v4076_v42 = vrot.slane %v4075_v19, 4 }
 0xf80   : > { %v4053_v24 = vrot.slane %v4052_v51, 2  ;;  %v4077_v7 = vadd.f32 %v4076_v42, %v4075_v19 }
 0xf82   : > { %v4054_v8 = vadd.f32 %v4053_v24, %v4052_v51  ;;  %v4078_v32 = vrot.slane %v4077_v7, 2 }
 0xf84   : > { %v4079_v59 = vadd.f32 %v4078_v32, %v4077_v7  ;;  %v4055_v40 = vrot.slane %v4054_v8, 1 }
 0xf86   : > { %v4056_v20 = vadd.f32 %v4055_v40, %v4054_v8  ;;  %v4080_v60 = vrot.slane %v4079_v59, 1 }
 0xf88   : > { %4541 = vpush %v4056_v20  ;;  %v4081_v27 = vadd.f32 %v4080_v60, %v4079_v59 }
 0xf8a   : > { %4543 = vpush %v4081_v27 }
 0xfb9   : > { %s4542_s25 = spop %4541 }
 0xfba   : > { %s4058_s28 = smul.f32 0.00012207031, %s4542_s25 }
 0xfbb   : > { %s4544_s19 = spop %4543 }
 0xfbc   : > { %s4084_s20 = smul.f32 %s4058_s28, %s4058_s28  ;;  %v4086_v62 = vstv %s4058_s28 }
 0xfbd   : > { %s4083_s21 = smul.f32 0.00012207031, %s4544_s19  ;;  %v4087_v3 = vsub.f32 %v7612_v11, %v4086_v62  ;;  %v4088_v22 = vsub.f32 %v7616_v6, %v4086_v62  ;;  %v4089_v28 = vsub.f32 %v7622_v44, %v4086_v62  ;;  %v4090_v58 = vsub.f32 %v7627_v48, %v4086_v62  ;;  %v3674_v11 = vld [vmem:[%s7737_s11] sm:$0xff]  ;;  %v3676_v44 = vld [vmem:[%s7737_s11 + $0x10] sm:$0xff] }
 0xfbe   : > { %v4091_v13 = vsub.f32 %v7632_v23, %v4086_v62  ;;  %v4092_v34 = vsub.f32 %v7637_v49, %v4086_v62  ;;  %v4093_v9 = vsub.f32 %v7642_v26, %v4086_v62  ;;  %v4094_v52 = vsub.f32 %v7647_v61, %v4086_v62  ;;  %v3679_v23 = vld [vmem:[%s7737_s11 + $0x28] sm:$0xff] }
 0xfbf   : > { %s4085_s18 = ssub.f32 %s4083_s21, %s4084_s20 }
 0xfc1   : > { %s4095_s26 = sadd.f32 1e-05, %s4085_s18 }
 0xfc3   : > { %v4096_v36 = vstv %s4095_s26 }
 0xfc4   : > { %5228 = vrsqrt.f32 %v4096_v36 }
 0xfce   : > { %v5229_v31 = vpop.eup %5228 }
 0xfcf   : > { %4545 = vpush %v5229_v31  ;;  %v5303_v31 = vld [vmem:[#allocation2 + $0x30] sm:$0xff] }
0x1000   : > { %s4546_s8 = spop %4545 }
0x1001   : > { %v4099_v53 = vstv %s4546_s8 }
0x1002   : > { %v4100_v6 = vmul.f32 %v4099_v53, %v4087_v3  ;;  %v4101_v15 = vmul.f32 %v4099_v53, %v4088_v22  ;;  %v4102_v41 = vmul.f32 %v4099_v53, %v4089_v28  ;;  %v4103_v17 = vmul.f32 %v4099_v53, %v4090_v58  ;;  %v5300_v58 = vld [vmem:[%s5430_s15] sm:$0xff] }
0x1003   : > { %v4104_v48 = vmul.f32 %v4099_v53, %v4091_v13  ;;  %v4105_v1 = vmul.f32 %v4099_v53, %v4092_v34  ;;  %v4106_v21 = vmul.f32 %v4099_v53, %v4093_v9  ;;  %v4107_v56 = vmul.f32 %v4099_v53, %v4094_v52  ;;  %v5301_v34 = vld [vmem:[%s5430_s15 + $0x8] sm:$0xff]  ;;  %v5307_v53 = vld [vmem:[#allocation2 + $0x70] sm:$0xff] }
0x1004   : > { %v4108_v39 = vmul.f32 %v4100_v6, %v3666_v10  ;;  %v4109_v49 = vmul.f32 %v4101_v15, %v3667_v37  ;;  %v4110_v29 = vmul.f32 %v4102_v41, %v3668_v43  ;;  %v4111_v18 = vmul.f32 %v4103_v17, %v3669_v33  ;;  %v5302_v52 = vld [vmem:[#allocation2 + $0x28] sm:$0xff]  ;;  %v5305_v33 = vld [vmem:[#allocation2 + $0x50] sm:$0xff] }
0x1005   : > { %v4112_v45 = vmul.f32 %v4104_v48, %v3670_v4  ;;  %v4113_v26 = vmul.f32 %v4105_v1, %v3671_v5  ;;  %v4114_v46 = vmul.f32 %v4106_v21, %v3672_v63  ;;  %v4115_v2 = vmul.f32 %v4107_v56, %v3673_v25  ;;  %v5304_v37 = vld [vmem:[#allocation2 + $0x48] sm:$0xff] }
0x1006   : > { %v4116_v50 = vadd.f32 %v4108_v39, %v3674_v11  ;;  %v4117_v61 = vadd.f32 %v4109_v49, %v3675_v12  ;;  %v4118_v47 = vadd.f32 %v4110_v29, %v3676_v44  ;;  %v4119_v16 = vadd.f32 %v4111_v18, %v3677_v35  ;;  %v5306_v5 = vld [vmem:[#allocation2 + $0x68] sm:$0xff] }
0x1007   : > { %v4120_v57 = vadd.f32 %v4112_v45, %v3678_v54  ;;  %v4121_v30 = vadd.f32 %v4113_v26, %v3679_v23  ;;  %v4122_v38 = vadd.f32 %v4114_v46, %v3680_v55  ;;  %v4123_v0 = vadd.f32 %v4115_v2, %v3681_v14 }
0x1008   : > { %vm4124_vm13 = vcmp.ge.f32.partialorder %v4116_v50, 0.0  ;;  %vm4125_vm14 = vcmp.ge.f32.partialorder %v4117_v61, 0.0  ;;  %vm4126_vm15 = vcmp.ge.f32.partialorder %v4118_v47, 0.0  ;;  %vm4127_vm0 = vcmp.ge.f32.partialorder %v4119_v16, 0.0 }
0x1009   : > { %vm4128_vm1 = vcmp.ge.f32.partialorder %v4120_v57, 0.0  ;;  %vm4129_vm2 = vcmp.ge.f32.partialorder %v4121_v30, 0.0  ;;  %vm4130_vm3 = vcmp.ge.f32.partialorder %v4122_v38, 0.0  ;;  %vm4131_vm4 = vcmp.ge.f32.partialorder %v4123_v0, 0.0 }
0x100a   : > { %v4132_v19 = vmul.f32 0.3, %v4116_v50  ;;  %v4133_v51 = vmul.f32 0.3, %v4117_v61  ;;  %v4134_v42 = vmul.f32 0.3, %v4118_v47 }
0x100b   : > { %v4135_v24 = vmul.f32 0.3, %v4119_v16  ;;  %v4136_v7 = vmul.f32 0.3, %v4120_v57  ;;  %v4137_v8 = vmul.f32 0.3, %v4121_v30 }
0x100c   : > { %v4138_v32 = vmul.f32 0.3, %v4122_v38  ;;  %v4139_v59 = vmul.f32 0.3, %v4123_v0  ;;  %v4140_v40 = vsel %vm4124_vm13, %v4116_v50, %v4132_v19  ;;  %v4141_v20 = vsel %vm4125_vm14, %v4117_v61, %v4133_v51 }
0x100d   : > { %v4142_v60 = vsel %vm4126_vm15, %v4118_v47, %v4134_v42  ;;  %v4143_v27 = vsel %vm4127_vm0, %v4119_v16, %v4135_v24  ;;  %v4144_v62 = vsel %vm4128_vm1, %v4120_v57, %v4136_v7  ;;  %v4145_v3 = vsel %vm4129_vm2, %v4121_v30, %v4137_v8 }
0x100e   : > { %v4146_v22 = vsel %vm4130_vm3, %v4122_v38, %v4138_v32  ;;  %v4147_v28 = vsel %vm4131_vm4, %v4123_v0, %v4139_v59  ;;  %v4148_v13 = vmul.f32 %v5300_v58, %v4140_v40  ;;  %v4149_v9 = vmul.f32 %v5301_v34, %v4141_v20 }
0x100f   : > { %v4150_v36 = vmul.f32 %v5302_v52, %v4142_v60  ;;  %v4151_v10 = vmul.f32 %v5303_v31, %v4143_v27  ;;  %v4152_v43 = vmul.f32 %v5304_v37, %v4144_v62  ;;  %v4153_v4 = vmul.f32 %v5305_v33, %v4145_v3 }
0x1010   : > { %v4154_v63 = vmul.f32 %v5306_v5, %v4146_v22  ;;  %v4155_v25 = vmul.f32 %v5307_v53, %v4147_v28  ;;  %v4156_v11 = vadd.f32 %v5300_v58, %v4148_v13  ;;  %v4157_v12 = vadd.f32 %v5301_v34, %v4149_v9 }
0x1011   : > { %v4158_v6 = vadd.f32 %v5302_v52, %v4150_v36  ;;  %v4159_v15 = vadd.f32 %v5303_v31, %v4151_v10  ;;  %v4160_v41 = vadd.f32 %v5304_v37, %v4152_v43  ;;  %v4161_v17 = vadd.f32 %v5305_v33, %v4153_v4 }
0x1012   : > { %v4162_v44 = vadd.f32 %v5306_v5, %v4154_v63  ;;  %v4163_v35 = vadd.f32 %v5307_v53, %v4155_v25  ;;  %4164 = vst [vmem:[%s414_s27] sm:$0xff] %v4156_v11  ;;  %4165 = vst [vmem:[%s414_s27 + $0x8] sm:$0xff] %v4157_v12 }
0x1013   : > { %4166 = vst [vmem:[%s414_s27 + $0x10] sm:$0xff] %v4158_v6  ;;  %4167 = vst [vmem:[%s414_s27 + $0x18] sm:$0xff] %v4159_v15 }
0x1014   : > { %4168 = vst [vmem:[%s414_s27 + $0x20] sm:$0xff] %v4160_v41  ;;  %4169 = vst [vmem:[%s414_s27 + $0x28] sm:$0xff] %v4161_v17 }
0x1015   : > { %4170 = vst [vmem:[%s414_s27 + $0x30] sm:$0xff] %v4162_v44  ;;  %4171 = vst [vmem:[%s414_s27 + $0x38] sm:$0xff] %v4163_v35 }
0x1016 PF: > { %s23_s23 = sadd.s32 1, %s5314_s23  }
0x1017   : > { %p20_p4 = scmp.ge.s32.totalorder %s23_s23, 4  }
0x1019   :  { %22 = sbr.rel (!%p20_p4) target bundleno = 2 (0x2), region = 99 }

</bundles_post_ra>
